<compile_context>
chip_gen: v6e
topology: v6e:2x2x1
jax: 0.10.0
libtpu: 0.0.40
codegen_flags: <defaults>
</compile_context>

<pallas_src>
import functools
import math

import jax
import jax.numpy as jnp
from jax.experimental import pallas as pl
from jax.experimental.pallas import tpu as pltpu

_GATE_PERM = (0, 1, 3, 2)   # our gate order [i, f, o, g] <- PyTorch rows [i, f, g, o]
_BB = 8                     # batch rows per kernel tile (one f32 sublane group)


def _round_up(x, m):
    return ((x + m - 1) // m) * m


def _hp(hidden_size):
    # Pad per-direction hidden to a multiple of 64 lanes so 2*Hp (gate blocks,
    # carried state, per-step store) is a multiple of 128 -> vreg-aligned.
    return max(64, _round_up(hidden_size, 64))


def _cpad(num_classes):
    return max(128, _round_up(num_classes, 128))


# ----------------------------------------------------------------------------
# Fused bidirectional LSTM layer kernel (optionally with the FC folded in).
# Fused gate layout: gate-major [i | f | o | g], direction-minor [fwd | bwd],
# each sub-block Hp lanes; carried state h / c is [fwd | bwd] (2Hp lanes).
# ----------------------------------------------------------------------------
def _make_bilstm_kernel(T, Bb, Hp, Din, with_fc, c_pad):
    Hp2, Hp6, Hp8 = 2 * Hp, 6 * Hp, 8 * Hp

    def kernel(*refs):
        if with_fc:
            (x_ref, wih_ref, whh_ref, b_ref, fcwf_ref, fcwb_ref, fcb_ref,
             out_ref, xg_scr, y_scr, brev_scr) = refs
        else:
            (x_ref, wih_ref, whh_ref, b_ref, out_ref, xg_scr) = refs

        # ---- Hoisted input projection: one (T*Bb, Din) x (Din, 8Hp) bf16 MXU
        # matmul for the whole sequence, bias folded in; stored to bf16 scratch.
        x2d = x_ref[...].reshape(T * Bb, Din).astype(jnp.bfloat16)
        xg = jnp.dot(x2d, wih_ref[...], preferred_element_type=jnp.float32)
        xg = xg + b_ref[...]
        xg_scr[...] = xg.reshape(T, Bb, Hp8).astype(jnp.bfloat16)

        # Direction mask (fwd half of every 2Hp gate block), built once.
        lane8 = jax.lax.broadcasted_iota(jnp.int32, (Bb, Hp8), 1)
        is_fwd_lane = (lane8 % Hp2) < Hp

        whh = whh_ref[...]                    # (2Hp, 8Hp) bf16, block-diagonal

        y_store = y_scr if with_fc else out_ref

        # ---- Serial recurrence: fwd and bwd advance together; the bwd half
        # reads the precomputed input gates at time T-1-s.  (The fwd/bwd merge
        # is two loads + one select over ~4 vregs; pre-combining would require
        # a time reversal of the gate slab, which costs more than it saves.)
        def step(s, carry):
            h, c = carry                                   # (Bb, 2Hp) f32
            g_f = xg_scr[s]
            g_b = xg_scr[T - 1 - s]
            gates = jnp.where(is_fwd_lane, g_f, g_b).astype(jnp.float32)
            gates = gates + jnp.dot(h.astype(jnp.bfloat16), whh,
                                    preferred_element_type=jnp.float32)
            sig = jax.nn.sigmoid(gates[:, :Hp6])           # i | f | o blocks
            g_g = jnp.tanh(gates[:, Hp6:])                 # g block
            i_g = sig[:, 0 * Hp2:1 * Hp2]
            f_g = sig[:, 1 * Hp2:2 * Hp2]
            o_g = sig[:, 2 * Hp2:3 * Hp2]
            c_new = f_g * c + i_g * g_g
            h_new = o_g * jnp.tanh(c_new)
            # One lane-dense (Bb, 2Hp) store per step; combined-step order:
            # row s holds [h_fwd(s) | h_bwd(T-1-s)].
            y_store[s] = h_new
            return h_new, c_new

        zeros = jnp.zeros((Bb, Hp2), jnp.float32)
        jax.lax.fori_loop(0, T, step, (zeros, zeros),
                          unroll=(T if T <= 16 else 4))

        if with_fc:
            # ---- FC folded into the epilogue.  fwd contributions are already
            # time-aligned; bwd contributions land reversed and are added back
            # with a short dense, pipelineable loop (off the serial path).
            y2d = y_scr[...].reshape(T * Bb, Hp2)
            a_f = jnp.dot(y2d[:, :Hp].astype(jnp.bfloat16), fcwf_ref[...],
                          preferred_element_type=jnp.float32)
            a_b = jnp.dot(y2d[:, Hp:].astype(jnp.bfloat16), fcwb_ref[...],
                          preferred_element_type=jnp.float32)
            out_ref[...] = a_f.reshape(T, Bb, c_pad) + fcb_ref[...]
            brev_scr[...] = a_b.reshape(T, Bb, c_pad)

            def add_rev(t, _):
                out_ref[t] = out_ref[t] + brev_scr[T - 1 - t]
                return 0

            jax.lax.fori_loop(0, T, add_rev, 0, unroll=(T if T <= 16 else 4))
        else:
            # ---- Epilogue: time-align the bwd half (swap bwd columns of rows
            # t and T-1-t).  Dense 128-lane row stores, outside the recurrence.
            lane2 = jax.lax.broadcasted_iota(jnp.int32, (Bb, Hp2), 1)
            fwd_cols = lane2 < Hp

            def swap(t, _):
                u = T - 1 - t
                row_t = out_ref[t]
                row_u = out_ref[u]
                out_ref[t] = jnp.where(fwd_cols, row_t, row_u)
                out_ref[u] = jnp.where(fwd_cols, row_u, row_t)
                return 0

            half = T // 2
            jax.lax.fori_loop(0, half, swap, 0,
                              unroll=(max(half, 1) if half <= 16 else 4))

    return kernel


def _vmem_limit_bytes(T, Bb, Din, Hp, c_pad, with_fc):
    n = T * Bb
    need = n * Din * 4                              # input batch tile (f32)
    need += n * 8 * Hp * 2                          # xg scratch (bf16)
    need += n * 2 * Hp * 4                          # y (out block or FC scratch)
    if with_fc:
        need += 2 * n * c_pad * 4                   # logits block + reversed bwd
    need += (Din + 2 * Hp) * 8 * Hp * 2             # W_ih + W_hh (bf16)
    need += 2 * Hp * c_pad * 2 + (8 * Hp + c_pad) * 4   # FC weights + biases
    # 2x for double-buffered blocks + headroom; stay under v7x's 64 MiB physical.
    return int(min(max(2 * need + (8 << 20), 32 << 20), 64 << 20))


def _full_spec(arr):
    zeros = (0,) * arr.ndim
    return pl.BlockSpec(arr.shape, lambda i: zeros)


def bilstm_layer(x, wih, whh, bias, fc, *, T, Bp, Hp, Bb=_BB):
    """One fused bidirectional LSTM layer (single pallas_call over batch tiles).

    x    : (T, Bp, Din) f32 time-aligned activations ([fwd | bwd] for layers >= 1)
    wih  : (Din, 8Hp) bf16 fused input->gate weights
    whh  : (2Hp, 8Hp) bf16 fused (block-diagonal) hidden->gate weights
    bias : (1, 8Hp) f32 fused combined bias
    fc   : optional (fcw_fwd (Hp, Cp) bf16, fcw_bwd (Hp, Cp) bf16, fcb (1, Cp) f32)
    """
    Din = x.shape[-1]
    with_fc = fc is not None
    c_pad = fc[2].shape[-1] if with_fc else 0

    kernel = _make_bilstm_kernel(T, Bb, Hp, Din, with_fc, c_pad)

    in_specs = [pl.BlockSpec((T, Bb, Din), lambda i: (0, i, 0)),
                _full_spec(wih), _full_spec(whh), _full_spec(bias)]
    args = [x, wih, whh, bias]
    scratch = [pltpu.VMEM((T, Bb, 8 * Hp), jnp.bfloat16)]   # hoisted input gates

    if with_fc:
        in_specs += [_full_spec(fc[0]), _full_spec(fc[1]), _full_spec(fc[2])]
        args += list(fc)
        out_shape = jax.ShapeDtypeStruct((T, Bp, c_pad), jnp.float32)
        out_spec = pl.BlockSpec((T, Bb, c_pad), lambda i: (0, i, 0))
        scratch += [pltpu.VMEM((T, Bb, 2 * Hp), jnp.float32),   # hidden slab
                    pltpu.VMEM((T, Bb, c_pad), jnp.float32)]    # reversed bwd FC
    else:
        out_shape = jax.ShapeDtypeStruct((T, Bp, 2 * Hp), jnp.float32)
        out_spec = pl.BlockSpec((T, Bb, 2 * Hp), lambda i: (0, i, 0))

    return pl.pallas_call(
        kernel,
        out_shape=out_shape,
        grid=(Bp // Bb,),
        in_specs=in_specs,
        out_specs=out_spec,
        scratch_shapes=scratch,
        compiler_params=pltpu.CompilerParams(
            dimension_semantics=("parallel",),
            vmem_limit_bytes=_vmem_limit_bytes(T, Bb, Din, Hp, c_pad, with_fc)),
    )(*args)


# ----------------------------------------------------------------------------
# Parameter init (PyTorch-style ranges) + fusion into the padded kernel layout.
# ----------------------------------------------------------------------------
def _place_blocks(dst, src_t, H, Hp, row_off, direction):
    """Place a transposed PyTorch gate-stacked weight (rows, 4H) into the fused
    (.., 8Hp) layout: gate-major [i|f|o|g], direction-minor [fwd|bwd] columns."""
    rows = src_t.shape[0]
    for k, pg in enumerate(_GATE_PERM):
        col0 = k * 2 * Hp + direction * Hp
        dst = dst.at[row_off:row_off + rows, col0:col0 + H].set(
            src_t[:, pg * H:(pg + 1) * H])
    return dst


def init_params(key, vocab_size, embed_dim, hidden_size, num_layers, num_classes):
    H, Hp = hidden_size, _hp(hidden_size)
    c_pad = _cpad(num_classes)
    params = {}
    k_embed, k_lstm, k_fc = jax.random.split(key, 3)

    params["embed"] = jax.random.normal(
        k_embed, (vocab_size, embed_dim), dtype=jnp.float32)

    bound = 1.0 / math.sqrt(H)
    lstm_keys = jax.random.split(k_lstm, num_layers * 2 * 4)
    ki = 0
    for layer in range(num_layers):
        in_dim = embed_dim if layer == 0 else 2 * H
        in_dim_p = embed_dim if layer == 0 else 2 * Hp
        wih = jnp.zeros((in_dim_p, 8 * Hp), jnp.float32)
        whh = jnp.zeros((2 * Hp, 8 * Hp), jnp.float32)
        bias = jnp.zeros((1, 8 * Hp), jnp.float32)
        for d in range(2):                       # 0 = fwd, 1 = bwd
            w_ih = jax.random.uniform(lstm_keys[ki], (4 * H, in_dim),
                                      minval=-bound, maxval=bound,
                                      dtype=jnp.float32); ki += 1
            w_hh = jax.random.uniform(lstm_keys[ki], (4 * H, H),
                                      minval=-bound, maxval=bound,
                                      dtype=jnp.float32); ki += 1
            b_ih = jax.random.uniform(lstm_keys[ki], (4 * H,),
                                      minval=-bound, maxval=bound,
                                      dtype=jnp.float32); ki += 1
            b_hh = jax.random.uniform(lstm_keys[ki], (4 * H,),
                                      minval=-bound, maxval=bound,
                                      dtype=jnp.float32); ki += 1
            wt = w_ih.T                           # (in_dim, 4H)
            if layer == 0:
                wih = _place_blocks(wih, wt, H, Hp, 0, d)
            else:
                # input of layers >= 1 is [h_fwd | h_bwd], padded to 2*Hp rows.
                wih = _place_blocks(wih, wt[:H], H, Hp, 0, d)
                wih = _place_blocks(wih, wt[H:], H, Hp, Hp, d)
            whh = _place_blocks(whh, w_hh.T, H, Hp, d * Hp, d)
            bias = _place_blocks(bias, (b_ih + b_hh)[None, :], H, Hp, 0, d)
        params[f"wih_l{layer}"] = wih.astype(jnp.bfloat16)
        params[f"whh_l{layer}"] = whh.astype(jnp.bfloat16)
        params[f"b_l{layer}"] = bias                               # f32

    fc_in = 2 * H
    fc_bound = 1.0 / math.sqrt(fc_in)
    k_fw, k_fb = jax.random.split(k_fc)
    fc_w_t = jax.random.uniform(k_fw, (fc_in, num_classes),
                                minval=-fc_bound, maxval=fc_bound,
                                dtype=jnp.float32)
    fc_b = jax.random.uniform(k_fb, (num_classes,),
                              minval=-fc_bound, maxval=fc_bound,
                              dtype=jnp.float32)
    params["fcw_f"] = jnp.pad(
        fc_w_t[:H], ((0, Hp - H), (0, c_pad - num_classes))).astype(jnp.bfloat16)
    params["fcw_b"] = jnp.pad(
        fc_w_t[H:], ((0, Hp - H), (0, c_pad - num_classes))).astype(jnp.bfloat16)
    params["fcb"] = jnp.pad(fc_b, (0, c_pad - num_classes))[None, :]   # (1,Cp) f32
    return params


# ----------------------------------------------------------------------------
# Forward pass.
# ----------------------------------------------------------------------------
def ner_forward(params, tokens, *, num_layers, hidden_size, num_classes):
    # tokens: (B, T) int32 token ids
    B, T = tokens.shape
    Hp = _hp(hidden_size)
    Bp = _round_up(max(B, _BB), _BB)

    # Embedding lookup (plain-JAX gather) + embed_dropout (identity, eval mode).
    # TODO(synk): embedding gather could be fused into layer 0 via scalar-prefetch
    # row gather; kept in XLA here.
    x = params["embed"][tokens]                    # (B, T, E) f32
    x = jnp.transpose(x, (1, 0, 2))                # time-major (T, B, E)
    x = jnp.pad(x, ((0, 0), (0, Bp - B), (0, 0)))  # pad batch to sublane multiple

    y = x
    for layer in range(num_layers):
        last = layer == num_layers - 1
        fc = (params["fcw_f"], params["fcw_b"], params["fcb"]) if last else None
        y = bilstm_layer(y, params[f"wih_l{layer}"], params[f"whh_l{layer}"],
                         params[f"b_l{layer}"], fc, T=T, Bp=Bp, Hp=Hp)
        # inter-layer LSTM dropout (0.2) / fc_dropout: identity in eval mode.

    logits = y[:, :B, :num_classes]                # strip batch + lane padding
    # The Softmax `classifier` is not applied in the reference forward.
    return jnp.transpose(logits, (1, 0, 2))        # (B, T, C)


if __name__ == "__main__":
    VOCAB = 50
    EMBED = 32
    HIDDEN = 32
    NUM_LAYERS = 2
    NUM_CLASSES = 8
    B, T = 2, 8

    key = jax.random.PRNGKey(0)
    k_params, k_tokens = jax.random.split(key)

    params = init_params(k_params, VOCAB, EMBED, HIDDEN, NUM_LAYERS, NUM_CLASSES)
    tokens = jax.random.randint(k_tokens, (B, T), 0, VOCAB, dtype=jnp.int32)

    fwd = functools.partial(
        ner_forward, num_layers=NUM_LAYERS, hidden_size=HIDDEN,
        num_classes=NUM_CLASSES)
    out = jax.jit(fwd)(params, tokens)
    out = jax.block_until_ready(out)

    assert out.shape == (B, T, NUM_CLASSES), out.shape
    assert out.dtype == jnp.float32
    assert bool(jnp.all(jnp.isfinite(out)))
    print("KERNEL_OK")
</pallas_src>

<mosaic_0001>
module attributes {stable_mosaic.version = 11 : i64} {
  func.func @kernel(%arg0: i32, %arg1: memref<8x8x128xf32, #tpu.memory_space<vmem>>, %arg2: memref<128x512xbf16, #tpu.memory_space<vmem>>, %arg3: memref<128x512xbf16, #tpu.memory_space<vmem>>, %arg4: memref<1x512xf32, #tpu.memory_space<vmem>>, %arg5: memref<64x128xbf16, #tpu.memory_space<vmem>>, %arg6: memref<64x128xbf16, #tpu.memory_space<vmem>>, %arg7: memref<1x128xf32, #tpu.memory_space<vmem>>, %arg8: memref<8x8x128xf32, #tpu.memory_space<vmem>>, %arg9: memref<8x8x512xbf16, #tpu.memory_space<vmem>>, %arg10: memref<8x8x128xf32, #tpu.memory_space<vmem>>, %arg11: memref<8x8x128xf32, #tpu.memory_space<vmem>>) attributes {dimension_semantics = [#tpu.dimension_semantics<parallel>], iteration_bounds = array<i64: 1>, scalar_prefetch = 0 : i64, scratch_operands = 3 : i64, tpu.core_type = #tpu.core_type<tc>, window_params = [{transform_indices = @transform_0, window_bounds = array<i64: 8, 8, 128>}, {pipeline_mode = #tpu.pipeline_mode<synchronous>, transform_indices = @transform_1, window_bounds = array<i64: 128, 512>}, {pipeline_mode = #tpu.pipeline_mode<synchronous>, transform_indices = @transform_2, window_bounds = array<i64: 128, 512>}, {pipeline_mode = #tpu.pipeline_mode<synchronous>, transform_indices = @transform_3, window_bounds = array<i64: 1, 512>}, {pipeline_mode = #tpu.pipeline_mode<synchronous>, transform_indices = @transform_4, window_bounds = array<i64: 64, 128>}, {pipeline_mode = #tpu.pipeline_mode<synchronous>, transform_indices = @transform_5, window_bounds = array<i64: 64, 128>}, {pipeline_mode = #tpu.pipeline_mode<synchronous>, transform_indices = @transform_6, window_bounds = array<i64: 1, 128>}, {transform_indices = @transform_7, window_bounds = array<i64: 8, 8, 128>}]} {
    %c0 = arith.constant 0 : index
    %c0_0 = arith.constant 0 : index
    %c0_1 = arith.constant 0 : index
    %0 = vector.load %arg1[%c0, %c0_0, %c0_1] : memref<8x8x128xf32, #tpu.memory_space<vmem>>, vector<8x8x128xf32>
    %1 = vector.shape_cast %0 : vector<8x8x128xf32> to vector<64x128xf32>
    %2 = arith.truncf %1 : vector<64x128xf32> to vector<64x128xbf16>
    %c0_2 = arith.constant 0 : index
    %c0_3 = arith.constant 0 : index
    %3 = vector.load %arg2[%c0_2, %c0_3] : memref<128x512xbf16, #tpu.memory_space<vmem>>, vector<128x512xbf16>
    %cst = arith.constant dense<0.000000e+00> : vector<64x512xf32>
    %4 = tpu.matmul %2, %3, %cst {dimension_numbers = #tpu.dot_dimension_numbers<[1], [0], [0], [1], [0, 0, 1, 1], [], []>} : vector<64x128xbf16>, vector<128x512xbf16>, vector<64x512xf32> -> vector<64x512xf32>
    %c0_4 = arith.constant 0 : index
    %c0_5 = arith.constant 0 : index
    %5 = vector.load %arg4[%c0_4, %c0_5] : memref<1x512xf32, #tpu.memory_space<vmem>>, vector<1x512xf32>
    %6 = vector.broadcast %5 : vector<1x512xf32> to vector<64x512xf32>
    %7 = arith.addf %4, %6 : vector<64x512xf32>
    %8 = vector.shape_cast %7 : vector<64x512xf32> to vector<8x8x512xf32>
    %9 = arith.truncf %8 : vector<8x8x512xf32> to vector<8x8x512xbf16>
    %c0_6 = arith.constant 0 : index
    %c0_7 = arith.constant 0 : index
    %c0_8 = arith.constant 0 : index
    %10 = vector.load %arg9[%c0_6, %c0_7, %c0_8] : memref<8x8x512xbf16, #tpu.memory_space<vmem>>, vector<8x8x512xbf16>
    tpu.vector_store %arg9[%c0_6, %c0_7, %c0_8], %9 {strides = array<i32>} : memref<8x8x512xbf16, #tpu.memory_space<vmem>>, vector<8x8x512xbf16>,
    %11 = tpu.iota {dimensions = array<i32: 1>} : vector<8x512xi32>
    %c128_i32 = arith.constant 128 : i32
    %c0_i32 = arith.constant 0 : i32
    %12 = arith.cmpi eq, %c128_i32, %c0_i32 : i32
    %c1_i32 = arith.constant 1 : i32
    %13 = arith.select %12, %c1_i32, %c128_i32 : i32
    %14 = vector.broadcast %13 : i32 to vector<8x512xi32>
    %15 = arith.remsi %11, %14 : vector<8x512xi32>
    %c0_i32_9 = arith.constant 0 : i32
    %16 = vector.broadcast %c0_i32_9 : i32 to vector<8x512xi32>
    %17 = arith.cmpi ne, %15, %16 : vector<8x512xi32>
    %c0_i32_10 = arith.constant 0 : i32
    %18 = vector.broadcast %c0_i32_10 : i32 to vector<8x512xi32>
    %19 = arith.cmpi slt, %15, %18 : vector<8x512xi32>
    %c0_i32_11 = arith.constant 0 : i32
    %20 = arith.cmpi slt, %13, %c0_i32_11 : i32
    %21 = vector.broadcast %20 : i1 to vector<8x512xi1>
    %22 = vector.broadcast %21 : vector<8x512xi1> to vector<8x512xi1>
    %23 = arith.xori %19, %22 : vector<8x512xi1>
    %24 = arith.andi %23, %17 : vector<8x512xi1>
    %25 = vector.broadcast %13 : i32 to vector<8x512xi32>
    %26 = arith.addi %15, %25 : vector<8x512xi32>
    %27 = arith.select %24, %26, %15 : vector<8x512xi1>, vector<8x512xi32>
    %c64_i32 = arith.constant 64 : i32
    %28 = vector.broadcast %c64_i32 : i32 to vector<8x512xi32>
    %29 = arith.cmpi slt, %27, %28 : vector<8x512xi32>
    %c0_12 = arith.constant 0 : index
    %c0_13 = arith.constant 0 : index
    %30 = vector.load %arg3[%c0_12, %c0_13] : memref<128x512xbf16, #tpu.memory_space<vmem>>, vector<128x512xbf16>
    %cst_14 = arith.constant 0.000000e+00 : f32
    %31 = vector.broadcast %cst_14 : f32 to vector<8x128xf32>
    %c0_i32_15 = arith.constant 0 : i32
    %32 = arith.index_cast %c0_i32_15 : i32 to index
    %c0_16 = arith.constant 0 : index
    %c0_17 = arith.constant 0 : index
    %33 = vector.load %arg9[%32, %c0_16, %c0_17] : memref<8x8x512xbf16, #tpu.memory_space<vmem>>, vector<1x8x512xbf16>
    %34 = vector.shape_cast %33 : vector<1x8x512xbf16> to vector<8x512xbf16>
    %c7_i32 = arith.constant 7 : i32
    %35 = arith.subi %c7_i32, %c0_i32_15 : i32
    %36 = arith.index_cast %35 : i32 to index
    %c0_18 = arith.constant 0 : index
    %c0_19 = arith.constant 0 : index
    %37 = vector.load %arg9[%36, %c0_18, %c0_19] : memref<8x8x512xbf16, #tpu.memory_space<vmem>>, vector<1x8x512xbf16>
    %38 = vector.shape_cast %37 : vector<1x8x512xbf16> to vector<8x512xbf16>
    %39 = arith.select %29, %34, %38 : vector<8x512xi1>, vector<8x512xbf16>
    %40 = arith.extf %39 : vector<8x512xbf16> to vector<8x512xf32>
    %41 = arith.truncf %31 : vector<8x128xf32> to vector<8x128xbf16>
    %cst_20 = arith.constant dense<0.000000e+00> : vector<8x512xf32>
    %42 = tpu.matmul %41, %30, %cst_20 {dimension_numbers = #tpu.dot_dimension_numbers<[1], [0], [0], [1], [0, 0, 1, 1], [], []>} : vector<8x128xbf16>, vector<128x512xbf16>, vector<8x512xf32> -> vector<8x512xf32>
    %43 = arith.addf %40, %42 : vector<8x512xf32>
    %44 = vector.extract_strided_slice %43 {offsets = [0, 0], sizes = [8, 384], strides = [1, 1]} : vector<8x512xf32> to vector<8x384xf32>
    %45 = arith.negf %44 : vector<8x384xf32>
    %46 = math.exp %45 : vector<8x384xf32>
    %cst_21 = arith.constant 1.000000e+00 : f32
    %47 = vector.broadcast %cst_21 : f32 to vector<8x384xf32>
    %48 = arith.addf %47, %46 : vector<8x384xf32>
    %49 = arith.divf %47, %48 : vector<8x384xf32>
    %50 = vector.extract_strided_slice %43 {offsets = [0, 384], sizes = [8, 128], strides = [1, 1]} : vector<8x512xf32> to vector<8x128xf32>
    %51 = math.tanh %50 : vector<8x128xf32>
    %52 = vector.extract_strided_slice %49 {offsets = [0, 0], sizes = [8, 128], strides = [1, 1]} : vector<8x384xf32> to vector<8x128xf32>
    %53 = vector.extract_strided_slice %49 {offsets = [0, 128], sizes = [8, 128], strides = [1, 1]} : vector<8x384xf32> to vector<8x128xf32>
    %54 = vector.extract_strided_slice %49 {offsets = [0, 256], sizes = [8, 128], strides = [1, 1]} : vector<8x384xf32> to vector<8x128xf32>
    %55 = arith.mulf %53, %31 : vector<8x128xf32>
    %56 = arith.mulf %52, %51 : vector<8x128xf32>
    %57 = arith.addf %55, %56 : vector<8x128xf32>
    %58 = math.tanh %57 : vector<8x128xf32>
    %59 = arith.mulf %54, %58 : vector<8x128xf32>
    %60 = arith.index_cast %c0_i32_15 : i32 to index
    %c0_22 = arith.constant 0 : index
    %c0_23 = arith.constant 0 : index
    %61 = vector.load %arg10[%60, %c0_22, %c0_23] : memref<8x8x128xf32, #tpu.memory_space<vmem>>, vector<1x8x128xf32>
    %62 = vector.shape_cast %61 : vector<1x8x128xf32> to vector<8x128xf32>
    %63 = vector.shape_cast %59 : vector<8x128xf32> to vector<1x8x128xf32>
    tpu.vector_store %arg10[%60, %c0_22, %c0_23], %63 {strides = array<i32>} : memref<8x8x128xf32, #tpu.memory_space<vmem>>, vector<1x8x128xf32>,
    %c1_i32_24 = arith.constant 1 : i32
    %64 = arith.index_cast %c1_i32_24 : i32 to index
    %c0_25 = arith.constant 0 : index
    %c0_26 = arith.constant 0 : index
    %65 = vector.load %arg9[%64, %c0_25, %c0_26] : memref<8x8x512xbf16, #tpu.memory_space<vmem>>, vector<1x8x512xbf16>
    %66 = vector.shape_cast %65 : vector<1x8x512xbf16> to vector<8x512xbf16>
    %c7_i32_27 = arith.constant 7 : i32
    %67 = arith.subi %c7_i32_27, %c1_i32_24 : i32
    %68 = arith.index_cast %67 : i32 to index
    %c0_28 = arith.constant 0 : index
    %c0_29 = arith.constant 0 : index
    %69 = vector.load %arg9[%68, %c0_28, %c0_29] : memref<8x8x512xbf16, #tpu.memory_space<vmem>>, vector<1x8x512xbf16>
    %70 = vector.shape_cast %69 : vector<1x8x512xbf16> to vector<8x512xbf16>
    %71 = arith.select %29, %66, %70 : vector<8x512xi1>, vector<8x512xbf16>
    %72 = arith.extf %71 : vector<8x512xbf16> to vector<8x512xf32>
    %73 = arith.truncf %59 : vector<8x128xf32> to vector<8x128xbf16>
    %cst_30 = arith.constant dense<0.000000e+00> : vector<8x512xf32>
    %74 = tpu.matmul %73, %30, %cst_30 {dimension_numbers = #tpu.dot_dimension_numbers<[1], [0], [0], [1], [0, 0, 1, 1], [], []>} : vector<8x128xbf16>, vector<128x512xbf16>, vector<8x512xf32> -> vector<8x512xf32>
    %75 = arith.addf %72, %74 : vector<8x512xf32>
    %76 = vector.extract_strided_slice %75 {offsets = [0, 0], sizes = [8, 384], strides = [1, 1]} : vector<8x512xf32> to vector<8x384xf32>
    %77 = arith.negf %76 : vector<8x384xf32>
    %78 = math.exp %77 : vector<8x384xf32>
    %cst_31 = arith.constant 1.000000e+00 : f32
    %79 = vector.broadcast %cst_31 : f32 to vector<8x384xf32>
    %80 = arith.addf %79, %78 : vector<8x384xf32>
    %81 = arith.divf %79, %80 : vector<8x384xf32>
    %82 = vector.extract_strided_slice %75 {offsets = [0, 384], sizes = [8, 128], strides = [1, 1]} : vector<8x512xf32> to vector<8x128xf32>
    %83 = math.tanh %82 : vector<8x128xf32>
    %84 = vector.extract_strided_slice %81 {offsets = [0, 0], sizes = [8, 128], strides = [1, 1]} : vector<8x384xf32> to vector<8x128xf32>
    %85 = vector.extract_strided_slice %81 {offsets = [0, 128], sizes = [8, 128], strides = [1, 1]} : vector<8x384xf32> to vector<8x128xf32>
    %86 = vector.extract_strided_slice %81 {offsets = [0, 256], sizes = [8, 128], strides = [1, 1]} : vector<8x384xf32> to vector<8x128xf32>
    %87 = arith.mulf %85, %57 : vector<8x128xf32>
    %88 = arith.mulf %84, %83 : vector<8x128xf32>
    %89 = arith.addf %87, %88 : vector<8x128xf32>
    %90 = math.tanh %89 : vector<8x128xf32>
    %91 = arith.mulf %86, %90 : vector<8x128xf32>
    %92 = arith.index_cast %c1_i32_24 : i32 to index
    %c0_32 = arith.constant 0 : index
    %c0_33 = arith.constant 0 : index
    %93 = vector.load %arg10[%92, %c0_32, %c0_33] : memref<8x8x128xf32, #tpu.memory_space<vmem>>, vector<1x8x128xf32>
    %94 = vector.shape_cast %93 : vector<1x8x128xf32> to vector<8x128xf32>
    %95 = vector.shape_cast %91 : vector<8x128xf32> to vector<1x8x128xf32>
    tpu.vector_store %arg10[%92, %c0_32, %c0_33], %95 {strides = array<i32>} : memref<8x8x128xf32, #tpu.memory_space<vmem>>, vector<1x8x128xf32>,
    %c2_i32 = arith.constant 2 : i32
    %96 = arith.index_cast %c2_i32 : i32 to index
    %c0_34 = arith.constant 0 : index
    %c0_35 = arith.constant 0 : index
    %97 = vector.load %arg9[%96, %c0_34, %c0_35] : memref<8x8x512xbf16, #tpu.memory_space<vmem>>, vector<1x8x512xbf16>
    %98 = vector.shape_cast %97 : vector<1x8x512xbf16> to vector<8x512xbf16>
    %c7_i32_36 = arith.constant 7 : i32
    %99 = arith.subi %c7_i32_36, %c2_i32 : i32
    %100 = arith.index_cast %99 : i32 to index
    %c0_37 = arith.constant 0 : index
    %c0_38 = arith.constant 0 : index
    %101 = vector.load %arg9[%100, %c0_37, %c0_38] : memref<8x8x512xbf16, #tpu.memory_space<vmem>>, vector<1x8x512xbf16>
    %102 = vector.shape_cast %101 : vector<1x8x512xbf16> to vector<8x512xbf16>
    %103 = arith.select %29, %98, %102 : vector<8x512xi1>, vector<8x512xbf16>
    %104 = arith.extf %103 : vector<8x512xbf16> to vector<8x512xf32>
    %105 = arith.truncf %91 : vector<8x128xf32> to vector<8x128xbf16>
    %cst_39 = arith.constant dense<0.000000e+00> : vector<8x512xf32>
    %106 = tpu.matmul %105, %30, %cst_39 {dimension_numbers = #tpu.dot_dimension_numbers<[1], [0], [0], [1], [0, 0, 1, 1], [], []>} : vector<8x128xbf16>, vector<128x512xbf16>, vector<8x512xf32> -> vector<8x512xf32>
    %107 = arith.addf %104, %106 : vector<8x512xf32>
    %108 = vector.extract_strided_slice %107 {offsets = [0, 0], sizes = [8, 384], strides = [1, 1]} : vector<8x512xf32> to vector<8x384xf32>
    %109 = arith.negf %108 : vector<8x384xf32>
    %110 = math.exp %109 : vector<8x384xf32>
    %cst_40 = arith.constant 1.000000e+00 : f32
    %111 = vector.broadcast %cst_40 : f32 to vector<8x384xf32>
    %112 = arith.addf %111, %110 : vector<8x384xf32>
    %113 = arith.divf %111, %112 : vector<8x384xf32>
    %114 = vector.extract_strided_slice %107 {offsets = [0, 384], sizes = [8, 128], strides = [1, 1]} : vector<8x512xf32> to vector<8x128xf32>
    %115 = math.tanh %114 : vector<8x128xf32>
    %116 = vector.extract_strided_slice %113 {offsets = [0, 0], sizes = [8, 128], strides = [1, 1]} : vector<8x384xf32> to vector<8x128xf32>
    %117 = vector.extract_strided_slice %113 {offsets = [0, 128], sizes = [8, 128], strides = [1, 1]} : vector<8x384xf32> to vector<8x128xf32>
    %118 = vector.extract_strided_slice %113 {offsets = [0, 256], sizes = [8, 128], strides = [1, 1]} : vector<8x384xf32> to vector<8x128xf32>
    %119 = arith.mulf %117, %89 : vector<8x128xf32>
    %120 = arith.mulf %116, %115 : vector<8x128xf32>
    %121 = arith.addf %119, %120 : vector<8x128xf32>
    %122 = math.tanh %121 : vector<8x128xf32>
    %123 = arith.mulf %118, %122 : vector<8x128xf32>
    %124 = arith.index_cast %c2_i32 : i32 to index
    %c0_41 = arith.constant 0 : index
    %c0_42 = arith.constant 0 : index
    %125 = vector.load %arg10[%124, %c0_41, %c0_42] : memref<8x8x128xf32, #tpu.memory_space<vmem>>, vector<1x8x128xf32>
    %126 = vector.shape_cast %125 : vector<1x8x128xf32> to vector<8x128xf32>
    %127 = vector.shape_cast %123 : vector<8x128xf32> to vector<1x8x128xf32>
    tpu.vector_store %arg10[%124, %c0_41, %c0_42], %127 {strides = array<i32>} : memref<8x8x128xf32, #tpu.memory_space<vmem>>, vector<1x8x128xf32>,
    %c3_i32 = arith.constant 3 : i32
    %128 = arith.index_cast %c3_i32 : i32 to index
    %c0_43 = arith.constant 0 : index
    %c0_44 = arith.constant 0 : index
    %129 = vector.load %arg9[%128, %c0_43, %c0_44] : memref<8x8x512xbf16, #tpu.memory_space<vmem>>, vector<1x8x512xbf16>
    %130 = vector.shape_cast %129 : vector<1x8x512xbf16> to vector<8x512xbf16>
    %c7_i32_45 = arith.constant 7 : i32
    %131 = arith.subi %c7_i32_45, %c3_i32 : i32
    %132 = arith.index_cast %131 : i32 to index
    %c0_46 = arith.constant 0 : index
    %c0_47 = arith.constant 0 : index
    %133 = vector.load %arg9[%132, %c0_46, %c0_47] : memref<8x8x512xbf16, #tpu.memory_space<vmem>>, vector<1x8x512xbf16>
    %134 = vector.shape_cast %133 : vector<1x8x512xbf16> to vector<8x512xbf16>
    %135 = arith.select %29, %130, %134 : vector<8x512xi1>, vector<8x512xbf16>
    %136 = arith.extf %135 : vector<8x512xbf16> to vector<8x512xf32>
    %137 = arith.truncf %123 : vector<8x128xf32> to vector<8x128xbf16>
    %cst_48 = arith.constant dense<0.000000e+00> : vector<8x512xf32>
    %138 = tpu.matmul %137, %30, %cst_48 {dimension_numbers = #tpu.dot_dimension_numbers<[1], [0], [0], [1], [0, 0, 1, 1], [], []>} : vector<8x128xbf16>, vector<128x512xbf16>, vector<8x512xf32> -> vector<8x512xf32>
    %139 = arith.addf %136, %138 : vector<8x512xf32>
    %140 = vector.extract_strided_slice %139 {offsets = [0, 0], sizes = [8, 384], strides = [1, 1]} : vector<8x512xf32> to vector<8x384xf32>
    %141 = arith.negf %140 : vector<8x384xf32>
    %142 = math.exp %141 : vector<8x384xf32>
    %cst_49 = arith.constant 1.000000e+00 : f32
    %143 = vector.broadcast %cst_49 : f32 to vector<8x384xf32>
    %144 = arith.addf %143, %142 : vector<8x384xf32>
    %145 = arith.divf %143, %144 : vector<8x384xf32>
    %146 = vector.extract_strided_slice %139 {offsets = [0, 384], sizes = [8, 128], strides = [1, 1]} : vector<8x512xf32> to vector<8x128xf32>
    %147 = math.tanh %146 : vector<8x128xf32>
    %148 = vector.extract_strided_slice %145 {offsets = [0, 0], sizes = [8, 128], strides = [1, 1]} : vector<8x384xf32> to vector<8x128xf32>
    %149 = vector.extract_strided_slice %145 {offsets = [0, 128], sizes = [8, 128], strides = [1, 1]} : vector<8x384xf32> to vector<8x128xf32>
    %150 = vector.extract_strided_slice %145 {offsets = [0, 256], sizes = [8, 128], strides = [1, 1]} : vector<8x384xf32> to vector<8x128xf32>
    %151 = arith.mulf %149, %121 : vector<8x128xf32>
    %152 = arith.mulf %148, %147 : vector<8x128xf32>
    %153 = arith.addf %151, %152 : vector<8x128xf32>
    %154 = math.tanh %153 : vector<8x128xf32>
    %155 = arith.mulf %150, %154 : vector<8x128xf32>
    %156 = arith.index_cast %c3_i32 : i32 to index
    %c0_50 = arith.constant 0 : index
    %c0_51 = arith.constant 0 : index
    %157 = vector.load %arg10[%156, %c0_50, %c0_51] : memref<8x8x128xf32, #tpu.memory_space<vmem>>, vector<1x8x128xf32>
    %158 = vector.shape_cast %157 : vector<1x8x128xf32> to vector<8x128xf32>
    %159 = vector.shape_cast %155 : vector<8x128xf32> to vector<1x8x128xf32>
    tpu.vector_store %arg10[%156, %c0_50, %c0_51], %159 {strides = array<i32>} : memref<8x8x128xf32, #tpu.memory_space<vmem>>, vector<1x8x128xf32>,
    %c4_i32 = arith.constant 4 : i32
    %160 = arith.index_cast %c4_i32 : i32 to index
    %c0_52 = arith.constant 0 : index
    %c0_53 = arith.constant 0 : index
    %161 = vector.load %arg9[%160, %c0_52, %c0_53] : memref<8x8x512xbf16, #tpu.memory_space<vmem>>, vector<1x8x512xbf16>
    %162 = vector.shape_cast %161 : vector<1x8x512xbf16> to vector<8x512xbf16>
    %c7_i32_54 = arith.constant 7 : i32
    %163 = arith.subi %c7_i32_54, %c4_i32 : i32
    %164 = arith.index_cast %163 : i32 to index
    %c0_55 = arith.constant 0 : index
    %c0_56 = arith.constant 0 : index
    %165 = vector.load %arg9[%164, %c0_55, %c0_56] : memref<8x8x512xbf16, #tpu.memory_space<vmem>>, vector<1x8x512xbf16>
    %166 = vector.shape_cast %165 : vector<1x8x512xbf16> to vector<8x512xbf16>
    %167 = arith.select %29, %162, %166 : vector<8x512xi1>, vector<8x512xbf16>
    %168 = arith.extf %167 : vector<8x512xbf16> to vector<8x512xf32>
    %169 = arith.truncf %155 : vector<8x128xf32> to vector<8x128xbf16>
    %cst_57 = arith.constant dense<0.000000e+00> : vector<8x512xf32>
    %170 = tpu.matmul %169, %30, %cst_57 {dimension_numbers = #tpu.dot_dimension_numbers<[1], [0], [0], [1], [0, 0, 1, 1], [], []>} : vector<8x128xbf16>, vector<128x512xbf16>, vector<8x512xf32> -> vector<8x512xf32>
    %171 = arith.addf %168, %170 : vector<8x512xf32>
    %172 = vector.extract_strided_slice %171 {offsets = [0, 0], sizes = [8, 384], strides = [1, 1]} : vector<8x512xf32> to vector<8x384xf32>
    %173 = arith.negf %172 : vector<8x384xf32>
    %174 = math.exp %173 : vector<8x384xf32>
    %cst_58 = arith.constant 1.000000e+00 : f32
    %175 = vector.broadcast %cst_58 : f32 to vector<8x384xf32>
    %176 = arith.addf %175, %174 : vector<8x384xf32>
    %177 = arith.divf %175, %176 : vector<8x384xf32>
    %178 = vector.extract_strided_slice %171 {offsets = [0, 384], sizes = [8, 128], strides = [1, 1]} : vector<8x512xf32> to vector<8x128xf32>
    %179 = math.tanh %178 : vector<8x128xf32>
    %180 = vector.extract_strided_slice %177 {offsets = [0, 0], sizes = [8, 128], strides = [1, 1]} : vector<8x384xf32> to vector<8x128xf32>
    %181 = vector.extract_strided_slice %177 {offsets = [0, 128], sizes = [8, 128], strides = [1, 1]} : vector<8x384xf32> to vector<8x128xf32>
    %182 = vector.extract_strided_slice %177 {offsets = [0, 256], sizes = [8, 128], strides = [1, 1]} : vector<8x384xf32> to vector<8x128xf32>
    %183 = arith.mulf %181, %153 : vector<8x128xf32>
    %184 = arith.mulf %180, %179 : vector<8x128xf32>
    %185 = arith.addf %183, %184 : vector<8x128xf32>
    %186 = math.tanh %185 : vector<8x128xf32>
    %187 = arith.mulf %182, %186 : vector<8x128xf32>
    %188 = arith.index_cast %c4_i32 : i32 to index
    %c0_59 = arith.constant 0 : index
    %c0_60 = arith.constant 0 : index
    %189 = vector.load %arg10[%188, %c0_59, %c0_60] : memref<8x8x128xf32, #tpu.memory_space<vmem>>, vector<1x8x128xf32>
    %190 = vector.shape_cast %189 : vector<1x8x128xf32> to vector<8x128xf32>
    %191 = vector.shape_cast %187 : vector<8x128xf32> to vector<1x8x128xf32>
    tpu.vector_store %arg10[%188, %c0_59, %c0_60], %191 {strides = array<i32>} : memref<8x8x128xf32, #tpu.memory_space<vmem>>, vector<1x8x128xf32>,
    %c5_i32 = arith.constant 5 : i32
    %192 = arith.index_cast %c5_i32 : i32 to index
    %c0_61 = arith.constant 0 : index
    %c0_62 = arith.constant 0 : index
    %193 = vector.load %arg9[%192, %c0_61, %c0_62] : memref<8x8x512xbf16, #tpu.memory_space<vmem>>, vector<1x8x512xbf16>
    %194 = vector.shape_cast %193 : vector<1x8x512xbf16> to vector<8x512xbf16>
    %c7_i32_63 = arith.constant 7 : i32
    %195 = arith.subi %c7_i32_63, %c5_i32 : i32
    %196 = arith.index_cast %195 : i32 to index
    %c0_64 = arith.constant 0 : index
    %c0_65 = arith.constant 0 : index
    %197 = vector.load %arg9[%196, %c0_64, %c0_65] : memref<8x8x512xbf16, #tpu.memory_space<vmem>>, vector<1x8x512xbf16>
    %198 = vector.shape_cast %197 : vector<1x8x512xbf16> to vector<8x512xbf16>
    %199 = arith.select %29, %194, %198 : vector<8x512xi1>, vector<8x512xbf16>
    %200 = arith.extf %199 : vector<8x512xbf16> to vector<8x512xf32>
    %201 = arith.truncf %187 : vector<8x128xf32> to vector<8x128xbf16>
    %cst_66 = arith.constant dense<0.000000e+00> : vector<8x512xf32>
    %202 = tpu.matmul %201, %30, %cst_66 {dimension_numbers = #tpu.dot_dimension_numbers<[1], [0], [0], [1], [0, 0, 1, 1], [], []>} : vector<8x128xbf16>, vector<128x512xbf16>, vector<8x512xf32> -> vector<8x512xf32>
    %203 = arith.addf %200, %202 : vector<8x512xf32>
    %204 = vector.extract_strided_slice %203 {offsets = [0, 0], sizes = [8, 384], strides = [1, 1]} : vector<8x512xf32> to vector<8x384xf32>
    %205 = arith.negf %204 : vector<8x384xf32>
    %206 = math.exp %205 : vector<8x384xf32>
    %cst_67 = arith.constant 1.000000e+00 : f32
    %207 = vector.broadcast %cst_67 : f32 to vector<8x384xf32>
    %208 = arith.addf %207, %206 : vector<8x384xf32>
    %209 = arith.divf %207, %208 : vector<8x384xf32>
    %210 = vector.extract_strided_slice %203 {offsets = [0, 384], sizes = [8, 128], strides = [1, 1]} : vector<8x512xf32> to vector<8x128xf32>
    %211 = math.tanh %210 : vector<8x128xf32>
    %212 = vector.extract_strided_slice %209 {offsets = [0, 0], sizes = [8, 128], strides = [1, 1]} : vector<8x384xf32> to vector<8x128xf32>
    %213 = vector.extract_strided_slice %209 {offsets = [0, 128], sizes = [8, 128], strides = [1, 1]} : vector<8x384xf32> to vector<8x128xf32>
    %214 = vector.extract_strided_slice %209 {offsets = [0, 256], sizes = [8, 128], strides = [1, 1]} : vector<8x384xf32> to vector<8x128xf32>
    %215 = arith.mulf %213, %185 : vector<8x128xf32>
    %216 = arith.mulf %212, %211 : vector<8x128xf32>
    %217 = arith.addf %215, %216 : vector<8x128xf32>
    %218 = math.tanh %217 : vector<8x128xf32>
    %219 = arith.mulf %214, %218 : vector<8x128xf32>
    %220 = arith.index_cast %c5_i32 : i32 to index
    %c0_68 = arith.constant 0 : index
    %c0_69 = arith.constant 0 : index
    %221 = vector.load %arg10[%220, %c0_68, %c0_69] : memref<8x8x128xf32, #tpu.memory_space<vmem>>, vector<1x8x128xf32>
    %222 = vector.shape_cast %221 : vector<1x8x128xf32> to vector<8x128xf32>
    %223 = vector.shape_cast %219 : vector<8x128xf32> to vector<1x8x128xf32>
    tpu.vector_store %arg10[%220, %c0_68, %c0_69], %223 {strides = array<i32>} : memref<8x8x128xf32, #tpu.memory_space<vmem>>, vector<1x8x128xf32>,
    %c6_i32 = arith.constant 6 : i32
    %224 = arith.index_cast %c6_i32 : i32 to index
    %c0_70 = arith.constant 0 : index
    %c0_71 = arith.constant 0 : index
    %225 = vector.load %arg9[%224, %c0_70, %c0_71] : memref<8x8x512xbf16, #tpu.memory_space<vmem>>, vector<1x8x512xbf16>
    %226 = vector.shape_cast %225 : vector<1x8x512xbf16> to vector<8x512xbf16>
    %c7_i32_72 = arith.constant 7 : i32
    %227 = arith.subi %c7_i32_72, %c6_i32 : i32
    %228 = arith.index_cast %227 : i32 to index
    %c0_73 = arith.constant 0 : index
    %c0_74 = arith.constant 0 : index
    %229 = vector.load %arg9[%228, %c0_73, %c0_74] : memref<8x8x512xbf16, #tpu.memory_space<vmem>>, vector<1x8x512xbf16>
    %230 = vector.shape_cast %229 : vector<1x8x512xbf16> to vector<8x512xbf16>
    %231 = arith.select %29, %226, %230 : vector<8x512xi1>, vector<8x512xbf16>
    %232 = arith.extf %231 : vector<8x512xbf16> to vector<8x512xf32>
    %233 = arith.truncf %219 : vector<8x128xf32> to vector<8x128xbf16>
    %cst_75 = arith.constant dense<0.000000e+00> : vector<8x512xf32>
    %234 = tpu.matmul %233, %30, %cst_75 {dimension_numbers = #tpu.dot_dimension_numbers<[1], [0], [0], [1], [0, 0, 1, 1], [], []>} : vector<8x128xbf16>, vector<128x512xbf16>, vector<8x512xf32> -> vector<8x512xf32>
    %235 = arith.addf %232, %234 : vector<8x512xf32>
    %236 = vector.extract_strided_slice %235 {offsets = [0, 0], sizes = [8, 384], strides = [1, 1]} : vector<8x512xf32> to vector<8x384xf32>
    %237 = arith.negf %236 : vector<8x384xf32>
    %238 = math.exp %237 : vector<8x384xf32>
    %cst_76 = arith.constant 1.000000e+00 : f32
    %239 = vector.broadcast %cst_76 : f32 to vector<8x384xf32>
    %240 = arith.addf %239, %238 : vector<8x384xf32>
    %241 = arith.divf %239, %240 : vector<8x384xf32>
    %242 = vector.extract_strided_slice %235 {offsets = [0, 384], sizes = [8, 128], strides = [1, 1]} : vector<8x512xf32> to vector<8x128xf32>
    %243 = math.tanh %242 : vector<8x128xf32>
    %244 = vector.extract_strided_slice %241 {offsets = [0, 0], sizes = [8, 128], strides = [1, 1]} : vector<8x384xf32> to vector<8x128xf32>
    %245 = vector.extract_strided_slice %241 {offsets = [0, 128], sizes = [8, 128], strides = [1, 1]} : vector<8x384xf32> to vector<8x128xf32>
    %246 = vector.extract_strided_slice %241 {offsets = [0, 256], sizes = [8, 128], strides = [1, 1]} : vector<8x384xf32> to vector<8x128xf32>
    %247 = arith.mulf %245, %217 : vector<8x128xf32>
    %248 = arith.mulf %244, %243 : vector<8x128xf32>
    %249 = arith.addf %247, %248 : vector<8x128xf32>
    %250 = math.tanh %249 : vector<8x128xf32>
    %251 = arith.mulf %246, %250 : vector<8x128xf32>
    %252 = arith.index_cast %c6_i32 : i32 to index
    %c0_77 = arith.constant 0 : index
    %c0_78 = arith.constant 0 : index
    %253 = vector.load %arg10[%252, %c0_77, %c0_78] : memref<8x8x128xf32, #tpu.memory_space<vmem>>, vector<1x8x128xf32>
    %254 = vector.shape_cast %253 : vector<1x8x128xf32> to vector<8x128xf32>
    %255 = vector.shape_cast %251 : vector<8x128xf32> to vector<1x8x128xf32>
    tpu.vector_store %arg10[%252, %c0_77, %c0_78], %255 {strides = array<i32>} : memref<8x8x128xf32, #tpu.memory_space<vmem>>, vector<1x8x128xf32>,
    %c7_i32_79 = arith.constant 7 : i32
    %256 = arith.index_cast %c7_i32_79 : i32 to index
    %c0_80 = arith.constant 0 : index
    %c0_81 = arith.constant 0 : index
    %257 = vector.load %arg9[%256, %c0_80, %c0_81] : memref<8x8x512xbf16, #tpu.memory_space<vmem>>, vector<1x8x512xbf16>
    %258 = vector.shape_cast %257 : vector<1x8x512xbf16> to vector<8x512xbf16>
    %c7_i32_82 = arith.constant 7 : i32
    %259 = arith.subi %c7_i32_82, %c7_i32_79 : i32
    %260 = arith.index_cast %259 : i32 to index
    %c0_83 = arith.constant 0 : index
    %c0_84 = arith.constant 0 : index
    %261 = vector.load %arg9[%260, %c0_83, %c0_84] : memref<8x8x512xbf16, #tpu.memory_space<vmem>>, vector<1x8x512xbf16>
    %262 = vector.shape_cast %261 : vector<1x8x512xbf16> to vector<8x512xbf16>
    %263 = arith.select %29, %258, %262 : vector<8x512xi1>, vector<8x512xbf16>
    %264 = arith.extf %263 : vector<8x512xbf16> to vector<8x512xf32>
    %265 = arith.truncf %251 : vector<8x128xf32> to vector<8x128xbf16>
    %cst_85 = arith.constant dense<0.000000e+00> : vector<8x512xf32>
    %266 = tpu.matmul %265, %30, %cst_85 {dimension_numbers = #tpu.dot_dimension_numbers<[1], [0], [0], [1], [0, 0, 1, 1], [], []>} : vector<8x128xbf16>, vector<128x512xbf16>, vector<8x512xf32> -> vector<8x512xf32>
    %267 = arith.addf %264, %266 : vector<8x512xf32>
    %268 = vector.extract_strided_slice %267 {offsets = [0, 0], sizes = [8, 384], strides = [1, 1]} : vector<8x512xf32> to vector<8x384xf32>
    %269 = arith.negf %268 : vector<8x384xf32>
    %270 = math.exp %269 : vector<8x384xf32>
    %cst_86 = arith.constant 1.000000e+00 : f32
    %271 = vector.broadcast %cst_86 : f32 to vector<8x384xf32>
    %272 = arith.addf %271, %270 : vector<8x384xf32>
    %273 = arith.divf %271, %272 : vector<8x384xf32>
    %274 = vector.extract_strided_slice %267 {offsets = [0, 384], sizes = [8, 128], strides = [1, 1]} : vector<8x512xf32> to vector<8x128xf32>
    %275 = math.tanh %274 : vector<8x128xf32>
    %276 = vector.extract_strided_slice %273 {offsets = [0, 0], sizes = [8, 128], strides = [1, 1]} : vector<8x384xf32> to vector<8x128xf32>
    %277 = vector.extract_strided_slice %273 {offsets = [0, 128], sizes = [8, 128], strides = [1, 1]} : vector<8x384xf32> to vector<8x128xf32>
    %278 = vector.extract_strided_slice %273 {offsets = [0, 256], sizes = [8, 128], strides = [1, 1]} : vector<8x384xf32> to vector<8x128xf32>
    %279 = arith.mulf %277, %249 : vector<8x128xf32>
    %280 = arith.mulf %276, %275 : vector<8x128xf32>
    %281 = arith.addf %279, %280 : vector<8x128xf32>
    %282 = math.tanh %281 : vector<8x128xf32>
    %283 = arith.mulf %278, %282 : vector<8x128xf32>
    %284 = arith.index_cast %c7_i32_79 : i32 to index
    %c0_87 = arith.constant 0 : index
    %c0_88 = arith.constant 0 : index
    %285 = vector.load %arg10[%284, %c0_87, %c0_88] : memref<8x8x128xf32, #tpu.memory_space<vmem>>, vector<1x8x128xf32>
    %286 = vector.shape_cast %285 : vector<1x8x128xf32> to vector<8x128xf32>
    %287 = vector.shape_cast %283 : vector<8x128xf32> to vector<1x8x128xf32>
    tpu.vector_store %arg10[%284, %c0_87, %c0_88], %287 {strides = array<i32>} : memref<8x8x128xf32, #tpu.memory_space<vmem>>, vector<1x8x128xf32>,
    %c8_i32 = arith.constant 8 : i32
    %c0_89 = arith.constant 0 : index
    %c0_90 = arith.constant 0 : index
    %c0_91 = arith.constant 0 : index
    %288 = vector.load %arg10[%c0_89, %c0_90, %c0_91] : memref<8x8x128xf32, #tpu.memory_space<vmem>>, vector<8x8x128xf32>
    %289 = vector.shape_cast %288 : vector<8x8x128xf32> to vector<64x128xf32>
    %290 = vector.extract_strided_slice %289 {offsets = [0, 0], sizes = [64, 64], strides = [1, 1]} : vector<64x128xf32> to vector<64x64xf32>
    %291 = arith.truncf %290 : vector<64x64xf32> to vector<64x64xbf16>
    %c0_92 = arith.constant 0 : index
    %c0_93 = arith.constant 0 : index
    %292 = vector.load %arg5[%c0_92, %c0_93] : memref<64x128xbf16, #tpu.memory_space<vmem>>, vector<64x128xbf16>
    %cst_94 = arith.constant dense<0.000000e+00> : vector<64x128xf32>
    %293 = tpu.matmul %291, %292, %cst_94 {dimension_numbers = #tpu.dot_dimension_numbers<[1], [0], [0], [1], [0, 0, 1, 1], [], []>} : vector<64x64xbf16>, vector<64x128xbf16>, vector<64x128xf32> -> vector<64x128xf32>
    %294 = vector.extract_strided_slice %289 {offsets = [0, 64], sizes = [64, 64], strides = [1, 1]} : vector<64x128xf32> to vector<64x64xf32>
    %295 = arith.truncf %294 : vector<64x64xf32> to vector<64x64xbf16>
    %c0_95 = arith.constant 0 : index
    %c0_96 = arith.constant 0 : index
    %296 = vector.load %arg6[%c0_95, %c0_96] : memref<64x128xbf16, #tpu.memory_space<vmem>>, vector<64x128xbf16>
    %cst_97 = arith.constant dense<0.000000e+00> : vector<64x128xf32>
    %297 = tpu.matmul %295, %296, %cst_97 {dimension_numbers = #tpu.dot_dimension_numbers<[1], [0], [0], [1], [0, 0, 1, 1], [], []>} : vector<64x64xbf16>, vector<64x128xbf16>, vector<64x128xf32> -> vector<64x128xf32>
    %298 = vector.shape_cast %293 : vector<64x128xf32> to vector<8x8x128xf32>
    %c0_98 = arith.constant 0 : index
    %c0_99 = arith.constant 0 : index
    %299 = vector.load %arg7[%c0_98, %c0_99] : memref<1x128xf32, #tpu.memory_space<vmem>>, vector<1x128xf32>
    %300 = vector.shape_cast %299 : vector<1x128xf32> to vector<1x1x128xf32>
    %301 = vector.broadcast %300 : vector<1x1x128xf32> to vector<8x8x128xf32>
    %302 = arith.addf %298, %301 : vector<8x8x128xf32>
    %c0_100 = arith.constant 0 : index
    %c0_101 = arith.constant 0 : index
    %c0_102 = arith.constant 0 : index
    %303 = vector.load %arg8[%c0_100, %c0_101, %c0_102] : memref<8x8x128xf32, #tpu.memory_space<vmem>>, vector<8x8x128xf32>
    tpu.vector_store %arg8[%c0_100, %c0_101, %c0_102], %302 {strides = array<i32>} : memref<8x8x128xf32, #tpu.memory_space<vmem>>, vector<8x8x128xf32>,
    %304 = vector.shape_cast %297 : vector<64x128xf32> to vector<8x8x128xf32>
    %c0_103 = arith.constant 0 : index
    %c0_104 = arith.constant 0 : index
    %c0_105 = arith.constant 0 : index
    %305 = vector.load %arg11[%c0_103, %c0_104, %c0_105] : memref<8x8x128xf32, #tpu.memory_space<vmem>>, vector<8x8x128xf32>
    tpu.vector_store %arg11[%c0_103, %c0_104, %c0_105], %304 {strides = array<i32>} : memref<8x8x128xf32, #tpu.memory_space<vmem>>, vector<8x8x128xf32>,
    %c0_i32_106 = arith.constant 0 : i32
    %306 = arith.index_cast %c0_i32_106 : i32 to index
    %c0_107 = arith.constant 0 : index
    %c0_108 = arith.constant 0 : index
    %307 = vector.load %arg8[%306, %c0_107, %c0_108] : memref<8x8x128xf32, #tpu.memory_space<vmem>>, vector<1x8x128xf32>
    %308 = vector.shape_cast %307 : vector<1x8x128xf32> to vector<8x128xf32>
    %c7_i32_109 = arith.constant 7 : i32
    %309 = arith.subi %c7_i32_109, %c0_i32_106 : i32
    %310 = arith.index_cast %309 : i32 to index
    %c0_110 = arith.constant 0 : index
    %c0_111 = arith.constant 0 : index
    %311 = vector.load %arg11[%310, %c0_110, %c0_111] : memref<8x8x128xf32, #tpu.memory_space<vmem>>, vector<1x8x128xf32>
    %312 = vector.shape_cast %311 : vector<1x8x128xf32> to vector<8x128xf32>
    %313 = arith.addf %308, %312 : vector<8x128xf32>
    %314 = arith.index_cast %c0_i32_106 : i32 to index
    %c0_112 = arith.constant 0 : index
    %c0_113 = arith.constant 0 : index
    %315 = vector.load %arg8[%314, %c0_112, %c0_113] : memref<8x8x128xf32, #tpu.memory_space<vmem>>, vector<1x8x128xf32>
    %316 = vector.shape_cast %315 : vector<1x8x128xf32> to vector<8x128xf32>
    %317 = vector.shape_cast %313 : vector<8x128xf32> to vector<1x8x128xf32>
    tpu.vector_store %arg8[%314, %c0_112, %c0_113], %317 {strides = array<i32>} : memref<8x8x128xf32, #tpu.memory_space<vmem>>, vector<1x8x128xf32>,
    %c1_i32_114 = arith.constant 1 : i32
    %318 = arith.index_cast %c1_i32_114 : i32 to index
    %c0_115 = arith.constant 0 : index
    %c0_116 = arith.constant 0 : index
    %319 = vector.load %arg8[%318, %c0_115, %c0_116] : memref<8x8x128xf32, #tpu.memory_space<vmem>>, vector<1x8x128xf32>
    %320 = vector.shape_cast %319 : vector<1x8x128xf32> to vector<8x128xf32>
    %c7_i32_117 = arith.constant 7 : i32
    %321 = arith.subi %c7_i32_117, %c1_i32_114 : i32
    %322 = arith.index_cast %321 : i32 to index
    %c0_118 = arith.constant 0 : index
    %c0_119 = arith.constant 0 : index
    %323 = vector.load %arg11[%322, %c0_118, %c0_119] : memref<8x8x128xf32, #tpu.memory_space<vmem>>, vector<1x8x128xf32>
    %324 = vector.shape_cast %323 : vector<1x8x128xf32> to vector<8x128xf32>
    %325 = arith.addf %320, %324 : vector<8x128xf32>
    %326 = arith.index_cast %c1_i32_114 : i32 to index
    %c0_120 = arith.constant 0 : index
    %c0_121 = arith.constant 0 : index
    %327 = vector.load %arg8[%326, %c0_120, %c0_121] : memref<8x8x128xf32, #tpu.memory_space<vmem>>, vector<1x8x128xf32>
    %328 = vector.shape_cast %327 : vector<1x8x128xf32> to vector<8x128xf32>
    %329 = vector.shape_cast %325 : vector<8x128xf32> to vector<1x8x128xf32>
    tpu.vector_store %arg8[%326, %c0_120, %c0_121], %329 {strides = array<i32>} : memref<8x8x128xf32, #tpu.memory_space<vmem>>, vector<1x8x128xf32>,
    %c2_i32_122 = arith.constant 2 : i32
    %330 = arith.index_cast %c2_i32_122 : i32 to index
    %c0_123 = arith.constant 0 : index
    %c0_124 = arith.constant 0 : index
    %331 = vector.load %arg8[%330, %c0_123, %c0_124] : memref<8x8x128xf32, #tpu.memory_space<vmem>>, vector<1x8x128xf32>
    %332 = vector.shape_cast %331 : vector<1x8x128xf32> to vector<8x128xf32>
    %c7_i32_125 = arith.constant 7 : i32
    %333 = arith.subi %c7_i32_125, %c2_i32_122 : i32
    %334 = arith.index_cast %333 : i32 to index
    %c0_126 = arith.constant 0 : index
    %c0_127 = arith.constant 0 : index
    %335 = vector.load %arg11[%334, %c0_126, %c0_127] : memref<8x8x128xf32, #tpu.memory_space<vmem>>, vector<1x8x128xf32>
    %336 = vector.shape_cast %335 : vector<1x8x128xf32> to vector<8x128xf32>
    %337 = arith.addf %332, %336 : vector<8x128xf32>
    %338 = arith.index_cast %c2_i32_122 : i32 to index
    %c0_128 = arith.constant 0 : index
    %c0_129 = arith.constant 0 : index
    %339 = vector.load %arg8[%338, %c0_128, %c0_129] : memref<8x8x128xf32, #tpu.memory_space<vmem>>, vector<1x8x128xf32>
    %340 = vector.shape_cast %339 : vector<1x8x128xf32> to vector<8x128xf32>
    %341 = vector.shape_cast %337 : vector<8x128xf32> to vector<1x8x128xf32>
    tpu.vector_store %arg8[%338, %c0_128, %c0_129], %341 {strides = array<i32>} : memref<8x8x128xf32, #tpu.memory_space<vmem>>, vector<1x8x128xf32>,
    %c3_i32_130 = arith.constant 3 : i32
    %342 = arith.index_cast %c3_i32_130 : i32 to index
    %c0_131 = arith.constant 0 : index
    %c0_132 = arith.constant 0 : index
    %343 = vector.load %arg8[%342, %c0_131, %c0_132] : memref<8x8x128xf32, #tpu.memory_space<vmem>>, vector<1x8x128xf32>
    %344 = vector.shape_cast %343 : vector<1x8x128xf32> to vector<8x128xf32>
    %c7_i32_133 = arith.constant 7 : i32
    %345 = arith.subi %c7_i32_133, %c3_i32_130 : i32
    %346 = arith.index_cast %345 : i32 to index
    %c0_134 = arith.constant 0 : index
    %c0_135 = arith.constant 0 : index
    %347 = vector.load %arg11[%346, %c0_134, %c0_135] : memref<8x8x128xf32, #tpu.memory_space<vmem>>, vector<1x8x128xf32>
    %348 = vector.shape_cast %347 : vector<1x8x128xf32> to vector<8x128xf32>
    %349 = arith.addf %344, %348 : vector<8x128xf32>
    %350 = arith.index_cast %c3_i32_130 : i32 to index
    %c0_136 = arith.constant 0 : index
    %c0_137 = arith.constant 0 : index
    %351 = vector.load %arg8[%350, %c0_136, %c0_137] : memref<8x8x128xf32, #tpu.memory_space<vmem>>, vector<1x8x128xf32>
    %352 = vector.shape_cast %351 : vector<1x8x128xf32> to vector<8x128xf32>
    %353 = vector.shape_cast %349 : vector<8x128xf32> to vector<1x8x128xf32>
    tpu.vector_store %arg8[%350, %c0_136, %c0_137], %353 {strides = array<i32>} : memref<8x8x128xf32, #tpu.memory_space<vmem>>, vector<1x8x128xf32>,
    %c4_i32_138 = arith.constant 4 : i32
    %354 = arith.index_cast %c4_i32_138 : i32 to index
    %c0_139 = arith.constant 0 : index
    %c0_140 = arith.constant 0 : index
    %355 = vector.load %arg8[%354, %c0_139, %c0_140] : memref<8x8x128xf32, #tpu.memory_space<vmem>>, vector<1x8x128xf32>
    %356 = vector.shape_cast %355 : vector<1x8x128xf32> to vector<8x128xf32>
    %c7_i32_141 = arith.constant 7 : i32
    %357 = arith.subi %c7_i32_141, %c4_i32_138 : i32
    %358 = arith.index_cast %357 : i32 to index
    %c0_142 = arith.constant 0 : index
    %c0_143 = arith.constant 0 : index
    %359 = vector.load %arg11[%358, %c0_142, %c0_143] : memref<8x8x128xf32, #tpu.memory_space<vmem>>, vector<1x8x128xf32>
    %360 = vector.shape_cast %359 : vector<1x8x128xf32> to vector<8x128xf32>
    %361 = arith.addf %356, %360 : vector<8x128xf32>
    %362 = arith.index_cast %c4_i32_138 : i32 to index
    %c0_144 = arith.constant 0 : index
    %c0_145 = arith.constant 0 : index
    %363 = vector.load %arg8[%362, %c0_144, %c0_145] : memref<8x8x128xf32, #tpu.memory_space<vmem>>, vector<1x8x128xf32>
    %364 = vector.shape_cast %363 : vector<1x8x128xf32> to vector<8x128xf32>
    %365 = vector.shape_cast %361 : vector<8x128xf32> to vector<1x8x128xf32>
    tpu.vector_store %arg8[%362, %c0_144, %c0_145], %365 {strides = array<i32>} : memref<8x8x128xf32, #tpu.memory_space<vmem>>, vector<1x8x128xf32>,
    %c5_i32_146 = arith.constant 5 : i32
    %366 = arith.index_cast %c5_i32_146 : i32 to index
    %c0_147 = arith.constant 0 : index
    %c0_148 = arith.constant 0 : index
    %367 = vector.load %arg8[%366, %c0_147, %c0_148] : memref<8x8x128xf32, #tpu.memory_space<vmem>>, vector<1x8x128xf32>
    %368 = vector.shape_cast %367 : vector<1x8x128xf32> to vector<8x128xf32>
    %c7_i32_149 = arith.constant 7 : i32
    %369 = arith.subi %c7_i32_149, %c5_i32_146 : i32
    %370 = arith.index_cast %369 : i32 to index
    %c0_150 = arith.constant 0 : index
    %c0_151 = arith.constant 0 : index
    %371 = vector.load %arg11[%370, %c0_150, %c0_151] : memref<8x8x128xf32, #tpu.memory_space<vmem>>, vector<1x8x128xf32>
    %372 = vector.shape_cast %371 : vector<1x8x128xf32> to vector<8x128xf32>
    %373 = arith.addf %368, %372 : vector<8x128xf32>
    %374 = arith.index_cast %c5_i32_146 : i32 to index
    %c0_152 = arith.constant 0 : index
    %c0_153 = arith.constant 0 : index
    %375 = vector.load %arg8[%374, %c0_152, %c0_153] : memref<8x8x128xf32, #tpu.memory_space<vmem>>, vector<1x8x128xf32>
    %376 = vector.shape_cast %375 : vector<1x8x128xf32> to vector<8x128xf32>
    %377 = vector.shape_cast %373 : vector<8x128xf32> to vector<1x8x128xf32>
    tpu.vector_store %arg8[%374, %c0_152, %c0_153], %377 {strides = array<i32>} : memref<8x8x128xf32, #tpu.memory_space<vmem>>, vector<1x8x128xf32>,
    %c6_i32_154 = arith.constant 6 : i32
    %378 = arith.index_cast %c6_i32_154 : i32 to index
    %c0_155 = arith.constant 0 : index
    %c0_156 = arith.constant 0 : index
    %379 = vector.load %arg8[%378, %c0_155, %c0_156] : memref<8x8x128xf32, #tpu.memory_space<vmem>>, vector<1x8x128xf32>
    %380 = vector.shape_cast %379 : vector<1x8x128xf32> to vector<8x128xf32>
    %c7_i32_157 = arith.constant 7 : i32
    %381 = arith.subi %c7_i32_157, %c6_i32_154 : i32
    %382 = arith.index_cast %381 : i32 to index
    %c0_158 = arith.constant 0 : index
    %c0_159 = arith.constant 0 : index
    %383 = vector.load %arg11[%382, %c0_158, %c0_159] : memref<8x8x128xf32, #tpu.memory_space<vmem>>, vector<1x8x128xf32>
    %384 = vector.shape_cast %383 : vector<1x8x128xf32> to vector<8x128xf32>
    %385 = arith.addf %380, %384 : vector<8x128xf32>
    %386 = arith.index_cast %c6_i32_154 : i32 to index
    %c0_160 = arith.constant 0 : index
    %c0_161 = arith.constant 0 : index
    %387 = vector.load %arg8[%386, %c0_160, %c0_161] : memref<8x8x128xf32, #tpu.memory_space<vmem>>, vector<1x8x128xf32>
    %388 = vector.shape_cast %387 : vector<1x8x128xf32> to vector<8x128xf32>
    %389 = vector.shape_cast %385 : vector<8x128xf32> to vector<1x8x128xf32>
    tpu.vector_store %arg8[%386, %c0_160, %c0_161], %389 {strides = array<i32>} : memref<8x8x128xf32, #tpu.memory_space<vmem>>, vector<1x8x128xf32>,
    %c7_i32_162 = arith.constant 7 : i32
    %390 = arith.index_cast %c7_i32_162 : i32 to index
    %c0_163 = arith.constant 0 : index
    %c0_164 = arith.constant 0 : index
    %391 = vector.load %arg8[%390, %c0_163, %c0_164] : memref<8x8x128xf32, #tpu.memory_space<vmem>>, vector<1x8x128xf32>
    %392 = vector.shape_cast %391 : vector<1x8x128xf32> to vector<8x128xf32>
    %c7_i32_165 = arith.constant 7 : i32
    %393 = arith.subi %c7_i32_165, %c7_i32_162 : i32
    %394 = arith.index_cast %393 : i32 to index
    %c0_166 = arith.constant 0 : index
    %c0_167 = arith.constant 0 : index
    %395 = vector.load %arg11[%394, %c0_166, %c0_167] : memref<8x8x128xf32, #tpu.memory_space<vmem>>, vector<1x8x128xf32>
    %396 = vector.shape_cast %395 : vector<1x8x128xf32> to vector<8x128xf32>
    %397 = arith.addf %392, %396 : vector<8x128xf32>
    %398 = arith.index_cast %c7_i32_162 : i32 to index
    %c0_168 = arith.constant 0 : index
    %c0_169 = arith.constant 0 : index
    %399 = vector.load %arg8[%398, %c0_168, %c0_169] : memref<8x8x128xf32, #tpu.memory_space<vmem>>, vector<1x8x128xf32>
    %400 = vector.shape_cast %399 : vector<1x8x128xf32> to vector<8x128xf32>
    %401 = vector.shape_cast %397 : vector<8x128xf32> to vector<1x8x128xf32>
    tpu.vector_store %arg8[%398, %c0_168, %c0_169], %401 {strides = array<i32>} : memref<8x8x128xf32, #tpu.memory_space<vmem>>, vector<1x8x128xf32>,
    %c8_i32_170 = arith.constant 8 : i32
    return
  }
  func.func @transform_0(%arg0: i32) -> (i32, i32, i32) {
    %c0_i32 = arith.constant 0 : i32
    %c0_i32_0 = arith.constant 0 : i32
    %c0_i32_1 = arith.constant 0 : i32
    return %c0_i32, %arg0, %c0_i32_0 : i32, i32, i32
  }
  func.func @transform_1(%arg0: i32) -> (i32, i32) {
    %c0_i32 = arith.constant 0 : i32
    %c0_i32_0 = arith.constant 0 : i32
    %c0_i32_1 = arith.constant 0 : i32
    return %c0_i32, %c0_i32_0 : i32, i32
  }
  func.func @transform_2(%arg0: i32) -> (i32, i32) {
    %c0_i32 = arith.constant 0 : i32
    %c0_i32_0 = arith.constant 0 : i32
    %c0_i32_1 = arith.constant 0 : i32
    return %c0_i32, %c0_i32_0 : i32, i32
  }
  func.func @transform_3(%arg0: i32) -> (i32, i32) {
    %c0_i32 = arith.constant 0 : i32
    %c0_i32_0 = arith.constant 0 : i32
    %c0_i32_1 = arith.constant 0 : i32
    return %c0_i32, %c0_i32_0 : i32, i32
  }
  func.func @transform_4(%arg0: i32) -> (i32, i32) {
    %c0_i32 = arith.constant 0 : i32
    %c0_i32_0 = arith.constant 0 : i32
    %c0_i32_1 = arith.constant 0 : i32
    return %c0_i32, %c0_i32_0 : i32, i32
  }
  func.func @transform_5(%arg0: i32) -> (i32, i32) {
    %c0_i32 = arith.constant 0 : i32
    %c0_i32_0 = arith.constant 0 : i32
    %c0_i32_1 = arith.constant 0 : i32
    return %c0_i32, %c0_i32_0 : i32, i32
  }
  func.func @transform_6(%arg0: i32) -> (i32, i32) {
    %c0_i32 = arith.constant 0 : i32
    %c0_i32_0 = arith.constant 0 : i32
    %c0_i32_1 = arith.constant 0 : i32
    return %c0_i32, %c0_i32_0 : i32, i32
  }
  func.func @transform_7(%arg0: i32) -> (i32, i32, i32) {
    %c0_i32 = arith.constant 0 : i32
    %c0_i32_0 = arith.constant 0 : i32
    %c0_i32_1 = arith.constant 0 : i32
    return %c0_i32, %arg0, %c0_i32_0 : i32, i32, i32
  }
}

module attributes {stable_mosaic.version = 11 : i64} {
  func.func @kernel(%arg0: i32, %arg1: memref<8x8x32xf32, #tpu.memory_space<vmem>>, %arg2: memref<32x512xbf16, #tpu.memory_space<vmem>>, %arg3: memref<128x512xbf16, #tpu.memory_space<vmem>>, %arg4: memref<1x512xf32, #tpu.memory_space<vmem>>, %arg5: memref<8x8x128xf32, #tpu.memory_space<vmem>>, %arg6: memref<8x8x512xbf16, #tpu.memory_space<vmem>>) attributes {dimension_semantics = [#tpu.dimension_semantics<parallel>], iteration_bounds = array<i64: 1>, scalar_prefetch = 0 : i64, scratch_operands = 1 : i64, tpu.core_type = #tpu.core_type<tc>, window_params = [{transform_indices = @transform_0, window_bounds = array<i64: 8, 8, 32>}, {pipeline_mode = #tpu.pipeline_mode<synchronous>, transform_indices = @transform_1, window_bounds = array<i64: 32, 512>}, {pipeline_mode = #tpu.pipeline_mode<synchronous>, transform_indices = @transform_2, window_bounds = array<i64: 128, 512>}, {pipeline_mode = #tpu.pipeline_mode<synchronous>, transform_indices = @transform_3, window_bounds = array<i64: 1, 512>}, {transform_indices = @transform_4, window_bounds = array<i64: 8, 8, 128>}]} {
    %c0 = arith.constant 0 : index
    %c0_0 = arith.constant 0 : index
    %c0_1 = arith.constant 0 : index
    %0 = vector.load %arg1[%c0, %c0_0, %c0_1] : memref<8x8x32xf32, #tpu.memory_space<vmem>>, vector<8x8x32xf32>
    %1 = vector.shape_cast %0 : vector<8x8x32xf32> to vector<64x32xf32>
    %2 = arith.truncf %1 : vector<64x32xf32> to vector<64x32xbf16>
    %c0_2 = arith.constant 0 : index
    %c0_3 = arith.constant 0 : index
    %3 = vector.load %arg2[%c0_2, %c0_3] : memref<32x512xbf16, #tpu.memory_space<vmem>>, vector<32x512xbf16>
    %cst = arith.constant dense<0.000000e+00> : vector<64x512xf32>
    %4 = tpu.matmul %2, %3, %cst {dimension_numbers = #tpu.dot_dimension_numbers<[1], [0], [0], [1], [0, 0, 1, 1], [], []>} : vector<64x32xbf16>, vector<32x512xbf16>, vector<64x512xf32> -> vector<64x512xf32>
    %c0_4 = arith.constant 0 : index
    %c0_5 = arith.constant 0 : index
    %5 = vector.load %arg4[%c0_4, %c0_5] : memref<1x512xf32, #tpu.memory_space<vmem>>, vector<1x512xf32>
    %6 = vector.broadcast %5 : vector<1x512xf32> to vector<64x512xf32>
    %7 = arith.addf %4, %6 : vector<64x512xf32>
    %8 = vector.shape_cast %7 : vector<64x512xf32> to vector<8x8x512xf32>
    %9 = arith.truncf %8 : vector<8x8x512xf32> to vector<8x8x512xbf16>
    %c0_6 = arith.constant 0 : index
    %c0_7 = arith.constant 0 : index
    %c0_8 = arith.constant 0 : index
    %10 = vector.load %arg6[%c0_6, %c0_7, %c0_8] : memref<8x8x512xbf16, #tpu.memory_space<vmem>>, vector<8x8x512xbf16>
    tpu.vector_store %arg6[%c0_6, %c0_7, %c0_8], %9 {strides = array<i32>} : memref<8x8x512xbf16, #tpu.memory_space<vmem>>, vector<8x8x512xbf16>,
    %11 = tpu.iota {dimensions = array<i32: 1>} : vector<8x512xi32>
    %c128_i32 = arith.constant 128 : i32
    %c0_i32 = arith.constant 0 : i32
    %12 = arith.cmpi eq, %c128_i32, %c0_i32 : i32
    %c1_i32 = arith.constant 1 : i32
    %13 = arith.select %12, %c1_i32, %c128_i32 : i32
    %14 = vector.broadcast %13 : i32 to vector<8x512xi32>
    %15 = arith.remsi %11, %14 : vector<8x512xi32>
    %c0_i32_9 = arith.constant 0 : i32
    %16 = vector.broadcast %c0_i32_9 : i32 to vector<8x512xi32>
    %17 = arith.cmpi ne, %15, %16 : vector<8x512xi32>
    %c0_i32_10 = arith.constant 0 : i32
    %18 = vector.broadcast %c0_i32_10 : i32 to vector<8x512xi32>
    %19 = arith.cmpi slt, %15, %18 : vector<8x512xi32>
    %c0_i32_11 = arith.constant 0 : i32
    %20 = arith.cmpi slt, %13, %c0_i32_11 : i32
    %21 = vector.broadcast %20 : i1 to vector<8x512xi1>
    %22 = vector.broadcast %21 : vector<8x512xi1> to vector<8x512xi1>
    %23 = arith.xori %19, %22 : vector<8x512xi1>
    %24 = arith.andi %23, %17 : vector<8x512xi1>
    %25 = vector.broadcast %13 : i32 to vector<8x512xi32>
    %26 = arith.addi %15, %25 : vector<8x512xi32>
    %27 = arith.select %24, %26, %15 : vector<8x512xi1>, vector<8x512xi32>
    %c64_i32 = arith.constant 64 : i32
    %28 = vector.broadcast %c64_i32 : i32 to vector<8x512xi32>
    %29 = arith.cmpi slt, %27, %28 : vector<8x512xi32>
    %c0_12 = arith.constant 0 : index
    %c0_13 = arith.constant 0 : index
    %30 = vector.load %arg3[%c0_12, %c0_13] : memref<128x512xbf16, #tpu.memory_space<vmem>>, vector<128x512xbf16>
    %cst_14 = arith.constant 0.000000e+00 : f32
    %31 = vector.broadcast %cst_14 : f32 to vector<8x128xf32>
    %c0_i32_15 = arith.constant 0 : i32
    %32 = arith.index_cast %c0_i32_15 : i32 to index
    %c0_16 = arith.constant 0 : index
    %c0_17 = arith.constant 0 : index
    %33 = vector.load %arg6[%32, %c0_16, %c0_17] : memref<8x8x512xbf16, #tpu.memory_space<vmem>>, vector<1x8x512xbf16>
    %34 = vector.shape_cast %33 : vector<1x8x512xbf16> to vector<8x512xbf16>
    %c7_i32 = arith.constant 7 : i32
    %35 = arith.subi %c7_i32, %c0_i32_15 : i32
    %36 = arith.index_cast %35 : i32 to index
    %c0_18 = arith.constant 0 : index
    %c0_19 = arith.constant 0 : index
    %37 = vector.load %arg6[%36, %c0_18, %c0_19] : memref<8x8x512xbf16, #tpu.memory_space<vmem>>, vector<1x8x512xbf16>
    %38 = vector.shape_cast %37 : vector<1x8x512xbf16> to vector<8x512xbf16>
    %39 = arith.select %29, %34, %38 : vector<8x512xi1>, vector<8x512xbf16>
    %40 = arith.extf %39 : vector<8x512xbf16> to vector<8x512xf32>
    %41 = arith.truncf %31 : vector<8x128xf32> to vector<8x128xbf16>
    %cst_20 = arith.constant dense<0.000000e+00> : vector<8x512xf32>
    %42 = tpu.matmul %41, %30, %cst_20 {dimension_numbers = #tpu.dot_dimension_numbers<[1], [0], [0], [1], [0, 0, 1, 1], [], []>} : vector<8x128xbf16>, vector<128x512xbf16>, vector<8x512xf32> -> vector<8x512xf32>
    %43 = arith.addf %40, %42 : vector<8x512xf32>
    %44 = vector.extract_strided_slice %43 {offsets = [0, 0], sizes = [8, 384], strides = [1, 1]} : vector<8x512xf32> to vector<8x384xf32>
    %45 = arith.negf %44 : vector<8x384xf32>
    %46 = math.exp %45 : vector<8x384xf32>
    %cst_21 = arith.constant 1.000000e+00 : f32
    %47 = vector.broadcast %cst_21 : f32 to vector<8x384xf32>
    %48 = arith.addf %47, %46 : vector<8x384xf32>
    %49 = arith.divf %47, %48 : vector<8x384xf32>
    %50 = vector.extract_strided_slice %43 {offsets = [0, 384], sizes = [8, 128], strides = [1, 1]} : vector<8x512xf32> to vector<8x128xf32>
    %51 = math.tanh %50 : vector<8x128xf32>
    %52 = vector.extract_strided_slice %49 {offsets = [0, 0], sizes = [8, 128], strides = [1, 1]} : vector<8x384xf32> to vector<8x128xf32>
    %53 = vector.extract_strided_slice %49 {offsets = [0, 128], sizes = [8, 128], strides = [1, 1]} : vector<8x384xf32> to vector<8x128xf32>
    %54 = vector.extract_strided_slice %49 {offsets = [0, 256], sizes = [8, 128], strides = [1, 1]} : vector<8x384xf32> to vector<8x128xf32>
    %55 = arith.mulf %53, %31 : vector<8x128xf32>
    %56 = arith.mulf %52, %51 : vector<8x128xf32>
    %57 = arith.addf %55, %56 : vector<8x128xf32>
    %58 = math.tanh %57 : vector<8x128xf32>
    %59 = arith.mulf %54, %58 : vector<8x128xf32>
    %60 = arith.index_cast %c0_i32_15 : i32 to index
    %c0_22 = arith.constant 0 : index
    %c0_23 = arith.constant 0 : index
    %61 = vector.load %arg5[%60, %c0_22, %c0_23] : memref<8x8x128xf32, #tpu.memory_space<vmem>>, vector<1x8x128xf32>
    %62 = vector.shape_cast %61 : vector<1x8x128xf32> to vector<8x128xf32>
    %63 = vector.shape_cast %59 : vector<8x128xf32> to vector<1x8x128xf32>
    tpu.vector_store %arg5[%60, %c0_22, %c0_23], %63 {strides = array<i32>} : memref<8x8x128xf32, #tpu.memory_space<vmem>>, vector<1x8x128xf32>,
    %c1_i32_24 = arith.constant 1 : i32
    %64 = arith.index_cast %c1_i32_24 : i32 to index
    %c0_25 = arith.constant 0 : index
    %c0_26 = arith.constant 0 : index
    %65 = vector.load %arg6[%64, %c0_25, %c0_26] : memref<8x8x512xbf16, #tpu.memory_space<vmem>>, vector<1x8x512xbf16>
    %66 = vector.shape_cast %65 : vector<1x8x512xbf16> to vector<8x512xbf16>
    %c7_i32_27 = arith.constant 7 : i32
    %67 = arith.subi %c7_i32_27, %c1_i32_24 : i32
    %68 = arith.index_cast %67 : i32 to index
    %c0_28 = arith.constant 0 : index
    %c0_29 = arith.constant 0 : index
    %69 = vector.load %arg6[%68, %c0_28, %c0_29] : memref<8x8x512xbf16, #tpu.memory_space<vmem>>, vector<1x8x512xbf16>
    %70 = vector.shape_cast %69 : vector<1x8x512xbf16> to vector<8x512xbf16>
    %71 = arith.select %29, %66, %70 : vector<8x512xi1>, vector<8x512xbf16>
    %72 = arith.extf %71 : vector<8x512xbf16> to vector<8x512xf32>
    %73 = arith.truncf %59 : vector<8x128xf32> to vector<8x128xbf16>
    %cst_30 = arith.constant dense<0.000000e+00> : vector<8x512xf32>
    %74 = tpu.matmul %73, %30, %cst_30 {dimension_numbers = #tpu.dot_dimension_numbers<[1], [0], [0], [1], [0, 0, 1, 1], [], []>} : vector<8x128xbf16>, vector<128x512xbf16>, vector<8x512xf32> -> vector<8x512xf32>
    %75 = arith.addf %72, %74 : vector<8x512xf32>
    %76 = vector.extract_strided_slice %75 {offsets = [0, 0], sizes = [8, 384], strides = [1, 1]} : vector<8x512xf32> to vector<8x384xf32>
    %77 = arith.negf %76 : vector<8x384xf32>
    %78 = math.exp %77 : vector<8x384xf32>
    %cst_31 = arith.constant 1.000000e+00 : f32
    %79 = vector.broadcast %cst_31 : f32 to vector<8x384xf32>
    %80 = arith.addf %79, %78 : vector<8x384xf32>
    %81 = arith.divf %79, %80 : vector<8x384xf32>
    %82 = vector.extract_strided_slice %75 {offsets = [0, 384], sizes = [8, 128], strides = [1, 1]} : vector<8x512xf32> to vector<8x128xf32>
    %83 = math.tanh %82 : vector<8x128xf32>
    %84 = vector.extract_strided_slice %81 {offsets = [0, 0], sizes = [8, 128], strides = [1, 1]} : vector<8x384xf32> to vector<8x128xf32>
    %85 = vector.extract_strided_slice %81 {offsets = [0, 128], sizes = [8, 128], strides = [1, 1]} : vector<8x384xf32> to vector<8x128xf32>
    %86 = vector.extract_strided_slice %81 {offsets = [0, 256], sizes = [8, 128], strides = [1, 1]} : vector<8x384xf32> to vector<8x128xf32>
    %87 = arith.mulf %85, %57 : vector<8x128xf32>
    %88 = arith.mulf %84, %83 : vector<8x128xf32>
    %89 = arith.addf %87, %88 : vector<8x128xf32>
    %90 = math.tanh %89 : vector<8x128xf32>
    %91 = arith.mulf %86, %90 : vector<8x128xf32>
    %92 = arith.index_cast %c1_i32_24 : i32 to index
    %c0_32 = arith.constant 0 : index
    %c0_33 = arith.constant 0 : index
    %93 = vector.load %arg5[%92, %c0_32, %c0_33] : memref<8x8x128xf32, #tpu.memory_space<vmem>>, vector<1x8x128xf32>
    %94 = vector.shape_cast %93 : vector<1x8x128xf32> to vector<8x128xf32>
    %95 = vector.shape_cast %91 : vector<8x128xf32> to vector<1x8x128xf32>
    tpu.vector_store %arg5[%92, %c0_32, %c0_33], %95 {strides = array<i32>} : memref<8x8x128xf32, #tpu.memory_space<vmem>>, vector<1x8x128xf32>,
    %c2_i32 = arith.constant 2 : i32
    %96 = arith.index_cast %c2_i32 : i32 to index
    %c0_34 = arith.constant 0 : index
    %c0_35 = arith.constant 0 : index
    %97 = vector.load %arg6[%96, %c0_34, %c0_35] : memref<8x8x512xbf16, #tpu.memory_space<vmem>>, vector<1x8x512xbf16>
    %98 = vector.shape_cast %97 : vector<1x8x512xbf16> to vector<8x512xbf16>
    %c7_i32_36 = arith.constant 7 : i32
    %99 = arith.subi %c7_i32_36, %c2_i32 : i32
    %100 = arith.index_cast %99 : i32 to index
    %c0_37 = arith.constant 0 : index
    %c0_38 = arith.constant 0 : index
    %101 = vector.load %arg6[%100, %c0_37, %c0_38] : memref<8x8x512xbf16, #tpu.memory_space<vmem>>, vector<1x8x512xbf16>
    %102 = vector.shape_cast %101 : vector<1x8x512xbf16> to vector<8x512xbf16>
    %103 = arith.select %29, %98, %102 : vector<8x512xi1>, vector<8x512xbf16>
    %104 = arith.extf %103 : vector<8x512xbf16> to vector<8x512xf32>
    %105 = arith.truncf %91 : vector<8x128xf32> to vector<8x128xbf16>
    %cst_39 = arith.constant dense<0.000000e+00> : vector<8x512xf32>
    %106 = tpu.matmul %105, %30, %cst_39 {dimension_numbers = #tpu.dot_dimension_numbers<[1], [0], [0], [1], [0, 0, 1, 1], [], []>} : vector<8x128xbf16>, vector<128x512xbf16>, vector<8x512xf32> -> vector<8x512xf32>
    %107 = arith.addf %104, %106 : vector<8x512xf32>
    %108 = vector.extract_strided_slice %107 {offsets = [0, 0], sizes = [8, 384], strides = [1, 1]} : vector<8x512xf32> to vector<8x384xf32>
    %109 = arith.negf %108 : vector<8x384xf32>
    %110 = math.exp %109 : vector<8x384xf32>
    %cst_40 = arith.constant 1.000000e+00 : f32
    %111 = vector.broadcast %cst_40 : f32 to vector<8x384xf32>
    %112 = arith.addf %111, %110 : vector<8x384xf32>
    %113 = arith.divf %111, %112 : vector<8x384xf32>
    %114 = vector.extract_strided_slice %107 {offsets = [0, 384], sizes = [8, 128], strides = [1, 1]} : vector<8x512xf32> to vector<8x128xf32>
    %115 = math.tanh %114 : vector<8x128xf32>
    %116 = vector.extract_strided_slice %113 {offsets = [0, 0], sizes = [8, 128], strides = [1, 1]} : vector<8x384xf32> to vector<8x128xf32>
    %117 = vector.extract_strided_slice %113 {offsets = [0, 128], sizes = [8, 128], strides = [1, 1]} : vector<8x384xf32> to vector<8x128xf32>
    %118 = vector.extract_strided_slice %113 {offsets = [0, 256], sizes = [8, 128], strides = [1, 1]} : vector<8x384xf32> to vector<8x128xf32>
    %119 = arith.mulf %117, %89 : vector<8x128xf32>
    %120 = arith.mulf %116, %115 : vector<8x128xf32>
    %121 = arith.addf %119, %120 : vector<8x128xf32>
    %122 = math.tanh %121 : vector<8x128xf32>
    %123 = arith.mulf %118, %122 : vector<8x128xf32>
    %124 = arith.index_cast %c2_i32 : i32 to index
    %c0_41 = arith.constant 0 : index
    %c0_42 = arith.constant 0 : index
    %125 = vector.load %arg5[%124, %c0_41, %c0_42] : memref<8x8x128xf32, #tpu.memory_space<vmem>>, vector<1x8x128xf32>
    %126 = vector.shape_cast %125 : vector<1x8x128xf32> to vector<8x128xf32>
    %127 = vector.shape_cast %123 : vector<8x128xf32> to vector<1x8x128xf32>
    tpu.vector_store %arg5[%124, %c0_41, %c0_42], %127 {strides = array<i32>} : memref<8x8x128xf32, #tpu.memory_space<vmem>>, vector<1x8x128xf32>,
    %c3_i32 = arith.constant 3 : i32
    %128 = arith.index_cast %c3_i32 : i32 to index
    %c0_43 = arith.constant 0 : index
    %c0_44 = arith.constant 0 : index
    %129 = vector.load %arg6[%128, %c0_43, %c0_44] : memref<8x8x512xbf16, #tpu.memory_space<vmem>>, vector<1x8x512xbf16>
    %130 = vector.shape_cast %129 : vector<1x8x512xbf16> to vector<8x512xbf16>
    %c7_i32_45 = arith.constant 7 : i32
    %131 = arith.subi %c7_i32_45, %c3_i32 : i32
    %132 = arith.index_cast %131 : i32 to index
    %c0_46 = arith.constant 0 : index
    %c0_47 = arith.constant 0 : index
    %133 = vector.load %arg6[%132, %c0_46, %c0_47] : memref<8x8x512xbf16, #tpu.memory_space<vmem>>, vector<1x8x512xbf16>
    %134 = vector.shape_cast %133 : vector<1x8x512xbf16> to vector<8x512xbf16>
    %135 = arith.select %29, %130, %134 : vector<8x512xi1>, vector<8x512xbf16>
    %136 = arith.extf %135 : vector<8x512xbf16> to vector<8x512xf32>
    %137 = arith.truncf %123 : vector<8x128xf32> to vector<8x128xbf16>
    %cst_48 = arith.constant dense<0.000000e+00> : vector<8x512xf32>
    %138 = tpu.matmul %137, %30, %cst_48 {dimension_numbers = #tpu.dot_dimension_numbers<[1], [0], [0], [1], [0, 0, 1, 1], [], []>} : vector<8x128xbf16>, vector<128x512xbf16>, vector<8x512xf32> -> vector<8x512xf32>
    %139 = arith.addf %136, %138 : vector<8x512xf32>
    %140 = vector.extract_strided_slice %139 {offsets = [0, 0], sizes = [8, 384], strides = [1, 1]} : vector<8x512xf32> to vector<8x384xf32>
    %141 = arith.negf %140 : vector<8x384xf32>
    %142 = math.exp %141 : vector<8x384xf32>
    %cst_49 = arith.constant 1.000000e+00 : f32
    %143 = vector.broadcast %cst_49 : f32 to vector<8x384xf32>
    %144 = arith.addf %143, %142 : vector<8x384xf32>
    %145 = arith.divf %143, %144 : vector<8x384xf32>
    %146 = vector.extract_strided_slice %139 {offsets = [0, 384], sizes = [8, 128], strides = [1, 1]} : vector<8x512xf32> to vector<8x128xf32>
    %147 = math.tanh %146 : vector<8x128xf32>
    %148 = vector.extract_strided_slice %145 {offsets = [0, 0], sizes = [8, 128], strides = [1, 1]} : vector<8x384xf32> to vector<8x128xf32>
    %149 = vector.extract_strided_slice %145 {offsets = [0, 128], sizes = [8, 128], strides = [1, 1]} : vector<8x384xf32> to vector<8x128xf32>
    %150 = vector.extract_strided_slice %145 {offsets = [0, 256], sizes = [8, 128], strides = [1, 1]} : vector<8x384xf32> to vector<8x128xf32>
    %151 = arith.mulf %149, %121 : vector<8x128xf32>
    %152 = arith.mulf %148, %147 : vector<8x128xf32>
    %153 = arith.addf %151, %152 : vector<8x128xf32>
    %154 = math.tanh %153 : vector<8x128xf32>
    %155 = arith.mulf %150, %154 : vector<8x128xf32>
    %156 = arith.index_cast %c3_i32 : i32 to index
    %c0_50 = arith.constant 0 : index
    %c0_51 = arith.constant 0 : index
    %157 = vector.load %arg5[%156, %c0_50, %c0_51] : memref<8x8x128xf32, #tpu.memory_space<vmem>>, vector<1x8x128xf32>
    %158 = vector.shape_cast %157 : vector<1x8x128xf32> to vector<8x128xf32>
    %159 = vector.shape_cast %155 : vector<8x128xf32> to vector<1x8x128xf32>
    tpu.vector_store %arg5[%156, %c0_50, %c0_51], %159 {strides = array<i32>} : memref<8x8x128xf32, #tpu.memory_space<vmem>>, vector<1x8x128xf32>,
    %c4_i32 = arith.constant 4 : i32
    %160 = arith.index_cast %c4_i32 : i32 to index
    %c0_52 = arith.constant 0 : index
    %c0_53 = arith.constant 0 : index
    %161 = vector.load %arg6[%160, %c0_52, %c0_53] : memref<8x8x512xbf16, #tpu.memory_space<vmem>>, vector<1x8x512xbf16>
    %162 = vector.shape_cast %161 : vector<1x8x512xbf16> to vector<8x512xbf16>
    %c7_i32_54 = arith.constant 7 : i32
    %163 = arith.subi %c7_i32_54, %c4_i32 : i32
    %164 = arith.index_cast %163 : i32 to index
    %c0_55 = arith.constant 0 : index
    %c0_56 = arith.constant 0 : index
    %165 = vector.load %arg6[%164, %c0_55, %c0_56] : memref<8x8x512xbf16, #tpu.memory_space<vmem>>, vector<1x8x512xbf16>
    %166 = vector.shape_cast %165 : vector<1x8x512xbf16> to vector<8x512xbf16>
    %167 = arith.select %29, %162, %166 : vector<8x512xi1>, vector<8x512xbf16>
    %168 = arith.extf %167 : vector<8x512xbf16> to vector<8x512xf32>
    %169 = arith.truncf %155 : vector<8x128xf32> to vector<8x128xbf16>
    %cst_57 = arith.constant dense<0.000000e+00> : vector<8x512xf32>
    %170 = tpu.matmul %169, %30, %cst_57 {dimension_numbers = #tpu.dot_dimension_numbers<[1], [0], [0], [1], [0, 0, 1, 1], [], []>} : vector<8x128xbf16>, vector<128x512xbf16>, vector<8x512xf32> -> vector<8x512xf32>
    %171 = arith.addf %168, %170 : vector<8x512xf32>
    %172 = vector.extract_strided_slice %171 {offsets = [0, 0], sizes = [8, 384], strides = [1, 1]} : vector<8x512xf32> to vector<8x384xf32>
    %173 = arith.negf %172 : vector<8x384xf32>
    %174 = math.exp %173 : vector<8x384xf32>
    %cst_58 = arith.constant 1.000000e+00 : f32
    %175 = vector.broadcast %cst_58 : f32 to vector<8x384xf32>
    %176 = arith.addf %175, %174 : vector<8x384xf32>
    %177 = arith.divf %175, %176 : vector<8x384xf32>
    %178 = vector.extract_strided_slice %171 {offsets = [0, 384], sizes = [8, 128], strides = [1, 1]} : vector<8x512xf32> to vector<8x128xf32>
    %179 = math.tanh %178 : vector<8x128xf32>
    %180 = vector.extract_strided_slice %177 {offsets = [0, 0], sizes = [8, 128], strides = [1, 1]} : vector<8x384xf32> to vector<8x128xf32>
    %181 = vector.extract_strided_slice %177 {offsets = [0, 128], sizes = [8, 128], strides = [1, 1]} : vector<8x384xf32> to vector<8x128xf32>
    %182 = vector.extract_strided_slice %177 {offsets = [0, 256], sizes = [8, 128], strides = [1, 1]} : vector<8x384xf32> to vector<8x128xf32>
    %183 = arith.mulf %181, %153 : vector<8x128xf32>
    %184 = arith.mulf %180, %179 : vector<8x128xf32>
    %185 = arith.addf %183, %184 : vector<8x128xf32>
    %186 = math.tanh %185 : vector<8x128xf32>
    %187 = arith.mulf %182, %186 : vector<8x128xf32>
    %188 = arith.index_cast %c4_i32 : i32 to index
    %c0_59 = arith.constant 0 : index
    %c0_60 = arith.constant 0 : index
    %189 = vector.load %arg5[%188, %c0_59, %c0_60] : memref<8x8x128xf32, #tpu.memory_space<vmem>>, vector<1x8x128xf32>
    %190 = vector.shape_cast %189 : vector<1x8x128xf32> to vector<8x128xf32>
    %191 = vector.shape_cast %187 : vector<8x128xf32> to vector<1x8x128xf32>
    tpu.vector_store %arg5[%188, %c0_59, %c0_60], %191 {strides = array<i32>} : memref<8x8x128xf32, #tpu.memory_space<vmem>>, vector<1x8x128xf32>,
    %c5_i32 = arith.constant 5 : i32
    %192 = arith.index_cast %c5_i32 : i32 to index
    %c0_61 = arith.constant 0 : index
    %c0_62 = arith.constant 0 : index
    %193 = vector.load %arg6[%192, %c0_61, %c0_62] : memref<8x8x512xbf16, #tpu.memory_space<vmem>>, vector<1x8x512xbf16>
    %194 = vector.shape_cast %193 : vector<1x8x512xbf16> to vector<8x512xbf16>
    %c7_i32_63 = arith.constant 7 : i32
    %195 = arith.subi %c7_i32_63, %c5_i32 : i32
    %196 = arith.index_cast %195 : i32 to index
    %c0_64 = arith.constant 0 : index
    %c0_65 = arith.constant 0 : index
    %197 = vector.load %arg6[%196, %c0_64, %c0_65] : memref<8x8x512xbf16, #tpu.memory_space<vmem>>, vector<1x8x512xbf16>
    %198 = vector.shape_cast %197 : vector<1x8x512xbf16> to vector<8x512xbf16>
    %199 = arith.select %29, %194, %198 : vector<8x512xi1>, vector<8x512xbf16>
    %200 = arith.extf %199 : vector<8x512xbf16> to vector<8x512xf32>
    %201 = arith.truncf %187 : vector<8x128xf32> to vector<8x128xbf16>
    %cst_66 = arith.constant dense<0.000000e+00> : vector<8x512xf32>
    %202 = tpu.matmul %201, %30, %cst_66 {dimension_numbers = #tpu.dot_dimension_numbers<[1], [0], [0], [1], [0, 0, 1, 1], [], []>} : vector<8x128xbf16>, vector<128x512xbf16>, vector<8x512xf32> -> vector<8x512xf32>
    %203 = arith.addf %200, %202 : vector<8x512xf32>
    %204 = vector.extract_strided_slice %203 {offsets = [0, 0], sizes = [8, 384], strides = [1, 1]} : vector<8x512xf32> to vector<8x384xf32>
    %205 = arith.negf %204 : vector<8x384xf32>
    %206 = math.exp %205 : vector<8x384xf32>
    %cst_67 = arith.constant 1.000000e+00 : f32
    %207 = vector.broadcast %cst_67 : f32 to vector<8x384xf32>
    %208 = arith.addf %207, %206 : vector<8x384xf32>
    %209 = arith.divf %207, %208 : vector<8x384xf32>
    %210 = vector.extract_strided_slice %203 {offsets = [0, 384], sizes = [8, 128], strides = [1, 1]} : vector<8x512xf32> to vector<8x128xf32>
    %211 = math.tanh %210 : vector<8x128xf32>
    %212 = vector.extract_strided_slice %209 {offsets = [0, 0], sizes = [8, 128], strides = [1, 1]} : vector<8x384xf32> to vector<8x128xf32>
    %213 = vector.extract_strided_slice %209 {offsets = [0, 128], sizes = [8, 128], strides = [1, 1]} : vector<8x384xf32> to vector<8x128xf32>
    %214 = vector.extract_strided_slice %209 {offsets = [0, 256], sizes = [8, 128], strides = [1, 1]} : vector<8x384xf32> to vector<8x128xf32>
    %215 = arith.mulf %213, %185 : vector<8x128xf32>
    %216 = arith.mulf %212, %211 : vector<8x128xf32>
    %217 = arith.addf %215, %216 : vector<8x128xf32>
    %218 = math.tanh %217 : vector<8x128xf32>
    %219 = arith.mulf %214, %218 : vector<8x128xf32>
    %220 = arith.index_cast %c5_i32 : i32 to index
    %c0_68 = arith.constant 0 : index
    %c0_69 = arith.constant 0 : index
    %221 = vector.load %arg5[%220, %c0_68, %c0_69] : memref<8x8x128xf32, #tpu.memory_space<vmem>>, vector<1x8x128xf32>
    %222 = vector.shape_cast %221 : vector<1x8x128xf32> to vector<8x128xf32>
    %223 = vector.shape_cast %219 : vector<8x128xf32> to vector<1x8x128xf32>
    tpu.vector_store %arg5[%220, %c0_68, %c0_69], %223 {strides = array<i32>} : memref<8x8x128xf32, #tpu.memory_space<vmem>>, vector<1x8x128xf32>,
    %c6_i32 = arith.constant 6 : i32
    %224 = arith.index_cast %c6_i32 : i32 to index
    %c0_70 = arith.constant 0 : index
    %c0_71 = arith.constant 0 : index
    %225 = vector.load %arg6[%224, %c0_70, %c0_71] : memref<8x8x512xbf16, #tpu.memory_space<vmem>>, vector<1x8x512xbf16>
    %226 = vector.shape_cast %225 : vector<1x8x512xbf16> to vector<8x512xbf16>
    %c7_i32_72 = arith.constant 7 : i32
    %227 = arith.subi %c7_i32_72, %c6_i32 : i32
    %228 = arith.index_cast %227 : i32 to index
    %c0_73 = arith.constant 0 : index
    %c0_74 = arith.constant 0 : index
    %229 = vector.load %arg6[%228, %c0_73, %c0_74] : memref<8x8x512xbf16, #tpu.memory_space<vmem>>, vector<1x8x512xbf16>
    %230 = vector.shape_cast %229 : vector<1x8x512xbf16> to vector<8x512xbf16>
    %231 = arith.select %29, %226, %230 : vector<8x512xi1>, vector<8x512xbf16>
    %232 = arith.extf %231 : vector<8x512xbf16> to vector<8x512xf32>
    %233 = arith.truncf %219 : vector<8x128xf32> to vector<8x128xbf16>
    %cst_75 = arith.constant dense<0.000000e+00> : vector<8x512xf32>
    %234 = tpu.matmul %233, %30, %cst_75 {dimension_numbers = #tpu.dot_dimension_numbers<[1], [0], [0], [1], [0, 0, 1, 1], [], []>} : vector<8x128xbf16>, vector<128x512xbf16>, vector<8x512xf32> -> vector<8x512xf32>
    %235 = arith.addf %232, %234 : vector<8x512xf32>
    %236 = vector.extract_strided_slice %235 {offsets = [0, 0], sizes = [8, 384], strides = [1, 1]} : vector<8x512xf32> to vector<8x384xf32>
    %237 = arith.negf %236 : vector<8x384xf32>
    %238 = math.exp %237 : vector<8x384xf32>
    %cst_76 = arith.constant 1.000000e+00 : f32
    %239 = vector.broadcast %cst_76 : f32 to vector<8x384xf32>
    %240 = arith.addf %239, %238 : vector<8x384xf32>
    %241 = arith.divf %239, %240 : vector<8x384xf32>
    %242 = vector.extract_strided_slice %235 {offsets = [0, 384], sizes = [8, 128], strides = [1, 1]} : vector<8x512xf32> to vector<8x128xf32>
    %243 = math.tanh %242 : vector<8x128xf32>
    %244 = vector.extract_strided_slice %241 {offsets = [0, 0], sizes = [8, 128], strides = [1, 1]} : vector<8x384xf32> to vector<8x128xf32>
    %245 = vector.extract_strided_slice %241 {offsets = [0, 128], sizes = [8, 128], strides = [1, 1]} : vector<8x384xf32> to vector<8x128xf32>
    %246 = vector.extract_strided_slice %241 {offsets = [0, 256], sizes = [8, 128], strides = [1, 1]} : vector<8x384xf32> to vector<8x128xf32>
    %247 = arith.mulf %245, %217 : vector<8x128xf32>
    %248 = arith.mulf %244, %243 : vector<8x128xf32>
    %249 = arith.addf %247, %248 : vector<8x128xf32>
    %250 = math.tanh %249 : vector<8x128xf32>
    %251 = arith.mulf %246, %250 : vector<8x128xf32>
    %252 = arith.index_cast %c6_i32 : i32 to index
    %c0_77 = arith.constant 0 : index
    %c0_78 = arith.constant 0 : index
    %253 = vector.load %arg5[%252, %c0_77, %c0_78] : memref<8x8x128xf32, #tpu.memory_space<vmem>>, vector<1x8x128xf32>
    %254 = vector.shape_cast %253 : vector<1x8x128xf32> to vector<8x128xf32>
    %255 = vector.shape_cast %251 : vector<8x128xf32> to vector<1x8x128xf32>
    tpu.vector_store %arg5[%252, %c0_77, %c0_78], %255 {strides = array<i32>} : memref<8x8x128xf32, #tpu.memory_space<vmem>>, vector<1x8x128xf32>,
    %c7_i32_79 = arith.constant 7 : i32
    %256 = arith.index_cast %c7_i32_79 : i32 to index
    %c0_80 = arith.constant 0 : index
    %c0_81 = arith.constant 0 : index
    %257 = vector.load %arg6[%256, %c0_80, %c0_81] : memref<8x8x512xbf16, #tpu.memory_space<vmem>>, vector<1x8x512xbf16>
    %258 = vector.shape_cast %257 : vector<1x8x512xbf16> to vector<8x512xbf16>
    %c7_i32_82 = arith.constant 7 : i32
    %259 = arith.subi %c7_i32_82, %c7_i32_79 : i32
    %260 = arith.index_cast %259 : i32 to index
    %c0_83 = arith.constant 0 : index
    %c0_84 = arith.constant 0 : index
    %261 = vector.load %arg6[%260, %c0_83, %c0_84] : memref<8x8x512xbf16, #tpu.memory_space<vmem>>, vector<1x8x512xbf16>
    %262 = vector.shape_cast %261 : vector<1x8x512xbf16> to vector<8x512xbf16>
    %263 = arith.select %29, %258, %262 : vector<8x512xi1>, vector<8x512xbf16>
    %264 = arith.extf %263 : vector<8x512xbf16> to vector<8x512xf32>
    %265 = arith.truncf %251 : vector<8x128xf32> to vector<8x128xbf16>
    %cst_85 = arith.constant dense<0.000000e+00> : vector<8x512xf32>
    %266 = tpu.matmul %265, %30, %cst_85 {dimension_numbers = #tpu.dot_dimension_numbers<[1], [0], [0], [1], [0, 0, 1, 1], [], []>} : vector<8x128xbf16>, vector<128x512xbf16>, vector<8x512xf32> -> vector<8x512xf32>
    %267 = arith.addf %264, %266 : vector<8x512xf32>
    %268 = vector.extract_strided_slice %267 {offsets = [0, 0], sizes = [8, 384], strides = [1, 1]} : vector<8x512xf32> to vector<8x384xf32>
    %269 = arith.negf %268 : vector<8x384xf32>
    %270 = math.exp %269 : vector<8x384xf32>
    %cst_86 = arith.constant 1.000000e+00 : f32
    %271 = vector.broadcast %cst_86 : f32 to vector<8x384xf32>
    %272 = arith.addf %271, %270 : vector<8x384xf32>
    %273 = arith.divf %271, %272 : vector<8x384xf32>
    %274 = vector.extract_strided_slice %267 {offsets = [0, 384], sizes = [8, 128], strides = [1, 1]} : vector<8x512xf32> to vector<8x128xf32>
    %275 = math.tanh %274 : vector<8x128xf32>
    %276 = vector.extract_strided_slice %273 {offsets = [0, 0], sizes = [8, 128], strides = [1, 1]} : vector<8x384xf32> to vector<8x128xf32>
    %277 = vector.extract_strided_slice %273 {offsets = [0, 128], sizes = [8, 128], strides = [1, 1]} : vector<8x384xf32> to vector<8x128xf32>
    %278 = vector.extract_strided_slice %273 {offsets = [0, 256], sizes = [8, 128], strides = [1, 1]} : vector<8x384xf32> to vector<8x128xf32>
    %279 = arith.mulf %277, %249 : vector<8x128xf32>
    %280 = arith.mulf %276, %275 : vector<8x128xf32>
    %281 = arith.addf %279, %280 : vector<8x128xf32>
    %282 = math.tanh %281 : vector<8x128xf32>
    %283 = arith.mulf %278, %282 : vector<8x128xf32>
    %284 = arith.index_cast %c7_i32_79 : i32 to index
    %c0_87 = arith.constant 0 : index
    %c0_88 = arith.constant 0 : index
    %285 = vector.load %arg5[%284, %c0_87, %c0_88] : memref<8x8x128xf32, #tpu.memory_space<vmem>>, vector<1x8x128xf32>
    %286 = vector.shape_cast %285 : vector<1x8x128xf32> to vector<8x128xf32>
    %287 = vector.shape_cast %283 : vector<8x128xf32> to vector<1x8x128xf32>
    tpu.vector_store %arg5[%284, %c0_87, %c0_88], %287 {strides = array<i32>} : memref<8x8x128xf32, #tpu.memory_space<vmem>>, vector<1x8x128xf32>,
    %c8_i32 = arith.constant 8 : i32
    %288 = tpu.iota {dimensions = array<i32: 1>} : vector<8x128xi32>
    %c64_i32_89 = arith.constant 64 : i32
    %289 = vector.broadcast %c64_i32_89 : i32 to vector<8x128xi32>
    %290 = arith.cmpi slt, %288, %289 : vector<8x128xi32>
    %c0_i32_90 = arith.constant 0 : i32
    %c7_i32_91 = arith.constant 7 : i32
    %291 = arith.subi %c7_i32_91, %c0_i32_90 : i32
    %292 = arith.index_cast %c0_i32_90 : i32 to index
    %c0_92 = arith.constant 0 : index
    %c0_93 = arith.constant 0 : index
    %293 = vector.load %arg5[%292, %c0_92, %c0_93] : memref<8x8x128xf32, #tpu.memory_space<vmem>>, vector<1x8x128xf32>
    %294 = vector.shape_cast %293 : vector<1x8x128xf32> to vector<8x128xf32>
    %295 = arith.index_cast %291 : i32 to index
    %c0_94 = arith.constant 0 : index
    %c0_95 = arith.constant 0 : index
    %296 = vector.load %arg5[%295, %c0_94, %c0_95] : memref<8x8x128xf32, #tpu.memory_space<vmem>>, vector<1x8x128xf32>
    %297 = vector.shape_cast %296 : vector<1x8x128xf32> to vector<8x128xf32>
    %298 = arith.select %290, %294, %297 : vector<8x128xi1>, vector<8x128xf32>
    %299 = arith.index_cast %c0_i32_90 : i32 to index
    %c0_96 = arith.constant 0 : index
    %c0_97 = arith.constant 0 : index
    %300 = vector.load %arg5[%299, %c0_96, %c0_97] : memref<8x8x128xf32, #tpu.memory_space<vmem>>, vector<1x8x128xf32>
    %301 = vector.shape_cast %300 : vector<1x8x128xf32> to vector<8x128xf32>
    %302 = vector.shape_cast %298 : vector<8x128xf32> to vector<1x8x128xf32>
    tpu.vector_store %arg5[%299, %c0_96, %c0_97], %302 {strides = array<i32>} : memref<8x8x128xf32, #tpu.memory_space<vmem>>, vector<1x8x128xf32>,
    %303 = arith.select %290, %297, %294 : vector<8x128xi1>, vector<8x128xf32>
    %304 = arith.index_cast %291 : i32 to index
    %c0_98 = arith.constant 0 : index
    %c0_99 = arith.constant 0 : index
    %305 = vector.load %arg5[%304, %c0_98, %c0_99] : memref<8x8x128xf32, #tpu.memory_space<vmem>>, vector<1x8x128xf32>
    %306 = vector.shape_cast %305 : vector<1x8x128xf32> to vector<8x128xf32>
    %307 = vector.shape_cast %303 : vector<8x128xf32> to vector<1x8x128xf32>
    tpu.vector_store %arg5[%304, %c0_98, %c0_99], %307 {strides = array<i32>} : memref<8x8x128xf32, #tpu.memory_space<vmem>>, vector<1x8x128xf32>,
    %c1_i32_100 = arith.constant 1 : i32
    %c7_i32_101 = arith.constant 7 : i32
    %308 = arith.subi %c7_i32_101, %c1_i32_100 : i32
    %309 = arith.index_cast %c1_i32_100 : i32 to index
    %c0_102 = arith.constant 0 : index
    %c0_103 = arith.constant 0 : index
    %310 = vector.load %arg5[%309, %c0_102, %c0_103] : memref<8x8x128xf32, #tpu.memory_space<vmem>>, vector<1x8x128xf32>
    %311 = vector.shape_cast %310 : vector<1x8x128xf32> to vector<8x128xf32>
    %312 = arith.index_cast %308 : i32 to index
    %c0_104 = arith.constant 0 : index
    %c0_105 = arith.constant 0 : index
    %313 = vector.load %arg5[%312, %c0_104, %c0_105] : memref<8x8x128xf32, #tpu.memory_space<vmem>>, vector<1x8x128xf32>
    %314 = vector.shape_cast %313 : vector<1x8x128xf32> to vector<8x128xf32>
    %315 = arith.select %290, %311, %314 : vector<8x128xi1>, vector<8x128xf32>
    %316 = arith.index_cast %c1_i32_100 : i32 to index
    %c0_106 = arith.constant 0 : index
    %c0_107 = arith.constant 0 : index
    %317 = vector.load %arg5[%316, %c0_106, %c0_107] : memref<8x8x128xf32, #tpu.memory_space<vmem>>, vector<1x8x128xf32>
    %318 = vector.shape_cast %317 : vector<1x8x128xf32> to vector<8x128xf32>
    %319 = vector.shape_cast %315 : vector<8x128xf32> to vector<1x8x128xf32>
    tpu.vector_store %arg5[%316, %c0_106, %c0_107], %319 {strides = array<i32>} : memref<8x8x128xf32, #tpu.memory_space<vmem>>, vector<1x8x128xf32>,
    %320 = arith.select %290, %314, %311 : vector<8x128xi1>, vector<8x128xf32>
    %321 = arith.index_cast %308 : i32 to index
    %c0_108 = arith.constant 0 : index
    %c0_109 = arith.constant 0 : index
    %322 = vector.load %arg5[%321, %c0_108, %c0_109] : memref<8x8x128xf32, #tpu.memory_space<vmem>>, vector<1x8x128xf32>
    %323 = vector.shape_cast %322 : vector<1x8x128xf32> to vector<8x128xf32>
    %324 = vector.shape_cast %320 : vector<8x128xf32> to vector<1x8x128xf32>
    tpu.vector_store %arg5[%321, %c0_108, %c0_109], %324 {strides = array<i32>} : memref<8x8x128xf32, #tpu.memory_space<vmem>>, vector<1x8x128xf32>,
    %c2_i32_110 = arith.constant 2 : i32
    %c7_i32_111 = arith.constant 7 : i32
    %325 = arith.subi %c7_i32_111, %c2_i32_110 : i32
    %326 = arith.index_cast %c2_i32_110 : i32 to index
    %c0_112 = arith.constant 0 : index
    %c0_113 = arith.constant 0 : index
    %327 = vector.load %arg5[%326, %c0_112, %c0_113] : memref<8x8x128xf32, #tpu.memory_space<vmem>>, vector<1x8x128xf32>
    %328 = vector.shape_cast %327 : vector<1x8x128xf32> to vector<8x128xf32>
    %329 = arith.index_cast %325 : i32 to index
    %c0_114 = arith.constant 0 : index
    %c0_115 = arith.constant 0 : index
    %330 = vector.load %arg5[%329, %c0_114, %c0_115] : memref<8x8x128xf32, #tpu.memory_space<vmem>>, vector<1x8x128xf32>
    %331 = vector.shape_cast %330 : vector<1x8x128xf32> to vector<8x128xf32>
    %332 = arith.select %290, %328, %331 : vector<8x128xi1>, vector<8x128xf32>
    %333 = arith.index_cast %c2_i32_110 : i32 to index
    %c0_116 = arith.constant 0 : index
    %c0_117 = arith.constant 0 : index
    %334 = vector.load %arg5[%333, %c0_116, %c0_117] : memref<8x8x128xf32, #tpu.memory_space<vmem>>, vector<1x8x128xf32>
    %335 = vector.shape_cast %334 : vector<1x8x128xf32> to vector<8x128xf32>
    %336 = vector.shape_cast %332 : vector<8x128xf32> to vector<1x8x128xf32>
    tpu.vector_store %arg5[%333, %c0_116, %c0_117], %336 {strides = array<i32>} : memref<8x8x128xf32, #tpu.memory_space<vmem>>, vector<1x8x128xf32>,
    %337 = arith.select %290, %331, %328 : vector<8x128xi1>, vector<8x128xf32>
    %338 = arith.index_cast %325 : i32 to index
    %c0_118 = arith.constant 0 : index
    %c0_119 = arith.constant 0 : index
    %339 = vector.load %arg5[%338, %c0_118, %c0_119] : memref<8x8x128xf32, #tpu.memory_space<vmem>>, vector<1x8x128xf32>
    %340 = vector.shape_cast %339 : vector<1x8x128xf32> to vector<8x128xf32>
    %341 = vector.shape_cast %337 : vector<8x128xf32> to vector<1x8x128xf32>
    tpu.vector_store %arg5[%338, %c0_118, %c0_119], %341 {strides = array<i32>} : memref<8x8x128xf32, #tpu.memory_space<vmem>>, vector<1x8x128xf32>,
    %c3_i32_120 = arith.constant 3 : i32
    %c7_i32_121 = arith.constant 7 : i32
    %342 = arith.subi %c7_i32_121, %c3_i32_120 : i32
    %343 = arith.index_cast %c3_i32_120 : i32 to index
    %c0_122 = arith.constant 0 : index
    %c0_123 = arith.constant 0 : index
    %344 = vector.load %arg5[%343, %c0_122, %c0_123] : memref<8x8x128xf32, #tpu.memory_space<vmem>>, vector<1x8x128xf32>
    %345 = vector.shape_cast %344 : vector<1x8x128xf32> to vector<8x128xf32>
    %346 = arith.index_cast %342 : i32 to index
    %c0_124 = arith.constant 0 : index
    %c0_125 = arith.constant 0 : index
    %347 = vector.load %arg5[%346, %c0_124, %c0_125] : memref<8x8x128xf32, #tpu.memory_space<vmem>>, vector<1x8x128xf32>
    %348 = vector.shape_cast %347 : vector<1x8x128xf32> to vector<8x128xf32>
    %349 = arith.select %290, %345, %348 : vector<8x128xi1>, vector<8x128xf32>
    %350 = arith.index_cast %c3_i32_120 : i32 to index
    %c0_126 = arith.constant 0 : index
    %c0_127 = arith.constant 0 : index
    %351 = vector.load %arg5[%350, %c0_126, %c0_127] : memref<8x8x128xf32, #tpu.memory_space<vmem>>, vector<1x8x128xf32>
    %352 = vector.shape_cast %351 : vector<1x8x128xf32> to vector<8x128xf32>
    %353 = vector.shape_cast %349 : vector<8x128xf32> to vector<1x8x128xf32>
    tpu.vector_store %arg5[%350, %c0_126, %c0_127], %353 {strides = array<i32>} : memref<8x8x128xf32, #tpu.memory_space<vmem>>, vector<1x8x128xf32>,
    %354 = arith.select %290, %348, %345 : vector<8x128xi1>, vector<8x128xf32>
    %355 = arith.index_cast %342 : i32 to index
    %c0_128 = arith.constant 0 : index
    %c0_129 = arith.constant 0 : index
    %356 = vector.load %arg5[%355, %c0_128, %c0_129] : memref<8x8x128xf32, #tpu.memory_space<vmem>>, vector<1x8x128xf32>
    %357 = vector.shape_cast %356 : vector<1x8x128xf32> to vector<8x128xf32>
    %358 = vector.shape_cast %354 : vector<8x128xf32> to vector<1x8x128xf32>
    tpu.vector_store %arg5[%355, %c0_128, %c0_129], %358 {strides = array<i32>} : memref<8x8x128xf32, #tpu.memory_space<vmem>>, vector<1x8x128xf32>,
    %c4_i32_130 = arith.constant 4 : i32
    return
  }
  func.func @transform_0(%arg0: i32) -> (i32, i32, i32) {
    %c0_i32 = arith.constant 0 : i32
    %c0_i32_0 = arith.constant 0 : i32
    %c0_i32_1 = arith.constant 0 : i32
    return %c0_i32, %arg0, %c0_i32_0 : i32, i32, i32
  }
  func.func @transform_1(%arg0: i32) -> (i32, i32) {
    %c0_i32 = arith.constant 0 : i32
    %c0_i32_0 = arith.constant 0 : i32
    %c0_i32_1 = arith.constant 0 : i32
    return %c0_i32, %c0_i32_0 : i32, i32
  }
  func.func @transform_2(%arg0: i32) -> (i32, i32) {
    %c0_i32 = arith.constant 0 : i32
    %c0_i32_0 = arith.constant 0 : i32
    %c0_i32_1 = arith.constant 0 : i32
    return %c0_i32, %c0_i32_0 : i32, i32
  }
  func.func @transform_3(%arg0: i32) -> (i32, i32) {
    %c0_i32 = arith.constant 0 : i32
    %c0_i32_0 = arith.constant 0 : i32
    %c0_i32_1 = arith.constant 0 : i32
    return %c0_i32, %c0_i32_0 : i32, i32
  }
  func.func @transform_4(%arg0: i32) -> (i32, i32, i32) {
    %c0_i32 = arith.constant 0 : i32
    %c0_i32_0 = arith.constant 0 : i32
    %c0_i32_1 = arith.constant 0 : i32
    return %c0_i32, %arg0, %c0_i32_0 : i32, i32, i32
  }
}

</mosaic_0001>

<bundles_post_ra>
// kernel: ner_forward.2
= control target key start
LH: loop header
LB: loop body
LE: loop exit
PB: predicated region body
PF: predicated region fallthrough
CT: control target
= control target key end

     0   :  { %9 = vsyncpa [#allocation4], 0  ;;  %s2058_s15 = smov [#allocation3]   ;;  %s2987_s0 = inlined_call_operand.vmem [shape: f32[8,8,32], index: 0, kind: input, shape index: {}]   ;;  %s2988_s1 = inlined_call_operand.hbm [shape: bf16[32,512], index: 1, kind: input, shape index: {}]   ;;  %s2989_s2 = inlined_call_operand.vmem [shape: bf16[128,512], index: 2, kind: input, shape index: {}]   ;;  %s2990_s3 = inlined_call_operand.vmem [shape: f32[1,512], index: 3, kind: input, shape index: {}]   ;;  %s2991_s4 = inlined_call_operand.vmem [shape: f32[8,8,128], index: 4, kind: output, shape index: {}]  }
   0x1   :  { %s17_s16 = sshll.u32 %s2058_s15, 4  ;;  %s18_s16 = int_to_ptr.vmem [resolvable:$true] %s17_s16 }
   0x2   :  { %s2044_s17 = scalar_lea.vmem %s18_s16, 1024  ;;  %p2049_p1 = scmp.lt.s32.totalorder %s18_s16, %s18_s16 }
   0x3   :  { %p2045_p0 = scmp.ne.s32.totalorder %s18_s16, %s2044_s17  ;;  %p2050_p2 = scmp.lt.s32.totalorder %s2044_s17, %s2044_s17 }
   0x5   :  { %p2051_p3 = por %p2050_p2, %p2049_p1 }
   0x7   :  { %p2052_p4 = pnand %p2051_p3, %p2045_p0 }
   0x9   :  { %2055 = shalt.err (!%p2052_p4)
}
   0xa   :  { %s2059_s18 = smov 256   ;;  %s2060_s19 = smov 16  }
   0xb   :  { %23 = dma.hbm_to_vmem [thread:$0]  %s2988_s1, 1024, %s18_s16, [#allocation4], %s2059_s18, %s2059_s18, %s2060_s19  }
   0xc   :  { %2056 = dma.done.wait [#allocation4], 1024  }
   0xd   :  { %2057 = vsyncadd [#allocation4], 4294966272  ;;  %v2992_v0 = vmov 0   ;;  %v1816_v1 = vld [vmem:[#allocation3 + $0x24] ss:$16 sps:$4 sm:$0xff]   ;;  %v33_v10 = vld [vmem:[%s2987_s0 + $0x8] sm:$0xff]  ;;  %v54_v53 = vlaneseq }
   0xe   :  { %159 = vmatprep.mubr.bf16.mxu0 %v2992_v0  ;;  %232 = vmatprep.mubr.bf16.mxu1 %v2992_v0  ;;  %v1818_v2 = vld [vmem:[#allocation3 + $0x2c] ss:$16 sps:$4 sm:$0xff]   ;;  %v1820_v3 = vld [vmem:[#allocation3 + $0x20] ss:$16 sps:$4 sm:$0xff]   ;;  %v1821_v4 = vld [vmem:[#allocation3 + $0x28] ss:$16 sps:$4 sm:$0xff]  }
   0xf   :  { %139 = vmatprep.subr.bf16.mxu0 %v1816_v1  ;;  %212 = vmatprep.subr.bf16.mxu1 %v1818_v2  ;;  %v1822_v5 = vld [vmem:[#allocation3 + $0x4] ss:$16 sps:$4 sm:$0xff]   ;;  %v1824_v6 = vld [vmem:[#allocation3 + $0xc] ss:$16 sps:$4 sm:$0xff]   ;;  %v1826_v7 = vld [vmem:[#allocation3] ss:$16 sps:$4 sm:$0xff]  }
  0x10   :  { %140 = vmatpush1.bf16.msra.mxu0 %v1820_v3  ;;  %213 = vmatpush1.bf16.msra.mxu1 %v1821_v4  ;;  %v1827_v8 = vld [vmem:[#allocation3 + $0x8] ss:$16 sps:$4 sm:$0xff]   ;;  %v32_v9 = vld [vmem:[%s2987_s0] sm:$0xff]  ;;  %vm114_vm0 = vcmask 261120   ;;  %v2111_v14 = vld [vmem:[%s2989_s2 + $0xec] ss:$16 sps:$4 sm:$0xff]  }
  0x11   :  { %141 = vmatprep.subr.bf16.mxu0 %v1822_v5  ;;  %214 = vmatprep.subr.bf16.mxu1 %v1824_v6  ;;  %v2101_v11 = vld [vmem:[%s2989_s2 + $0xe4] ss:$16 sps:$4 sm:$0xff]   ;;  %v40_v12 = vpack.c.bf16 %v33_v10, %v32_v9  ;;  %v2106_v13 = vld [vmem:[%s2989_s2 + $0xe0] ss:$16 sps:$4 sm:$0xff]   ;;  %3006 = vst [vmem:[#allocation7_spill] sm:$0xff] %v2111_v14  ;;  %v35_v20 = vld [vmem:[%s2987_s0 + $0x18] sm:$0xff] }
  0x12   :  { %3005 = vst [vmem:[#allocation6_spill] sm:$0xff] %v2101_v11  ;;  %v2117_v15 = vld [vmem:[%s2989_s2 + $0xc4] ss:$16 sps:$4 sm:$0xff]   ;;  %v2122_v16 = vld [vmem:[%s2989_s2 + $0xe8] ss:$16 sps:$4 sm:$0xff]   ;;  %v55_v54 = vshrl.u32 %v54_v53, 7 }
  0x13   :  { %v2128_v17 = vld [vmem:[%s2989_s2 + $0xcc] ss:$16 sps:$4 sm:$0xff]   ;;  %v2135_v18 = vld [vmem:[%s2989_s2 + $0xc0] ss:$16 sps:$4 sm:$0xff]   ;;  %v2148_v21 = vld [vmem:[%s2989_s2 + $0xc8] ss:$16 sps:$4 sm:$0xff]  }
  0x14   :  { %142 = vmatpush1.bf16.msra.mxu0 %v1826_v7  ;;  %215 = vmatpush1.bf16.msra.mxu1 %v1827_v8  ;;  %v34_v19 = vld [vmem:[%s2987_s0 + $0x10] sm:$0xff]  ;;  %v2162_v23 = vld [vmem:[%s2989_s2 + $0xac] ss:$16 sps:$4 sm:$0xff]   ;;  %v2174_v26 = vld [vmem:[%s2989_s2 + $0xa8] ss:$16 sps:$4 sm:$0xff]   ;;  %v64_v55 = vsub.s32 2, %v55_v54 }
  0x15   :  { %679 = vmatprep.subr.bf16.mxu0 %v2101_v11  ;;  %720 = vmatprep.subr.bf16.mxu1 %v2111_v14  ;;  %v2155_v22 = vld [vmem:[%s2989_s2 + $0xa4] ss:$16 sps:$4 sm:$0xff]   ;;  %v41_v24 = vpack.c.bf16 %v35_v20, %v34_v19  ;;  %v2167_v25 = vld [vmem:[%s2989_s2 + $0xa0] ss:$16 sps:$4 sm:$0xff]   ;;  %v2191_v29 = vld [vmem:[%s2989_s2 + $0x8c] ss:$16 sps:$4 sm:$0xff]  }
  0x16   :  { %v2181_v27 = vld [vmem:[%s2989_s2 + $0x84] ss:$16 sps:$4 sm:$0xff]   ;;  %v2186_v28 = vld [vmem:[%s2989_s2 + $0x80] ss:$16 sps:$4 sm:$0xff]   ;;  %v37_v31 = vld [vmem:[%s2987_s0 + $0x28] sm:$0xff]  ;;  %v56_v56 = vsub.s32 0, %v55_v54 }
  0x17   :  { %1695 = vmatmul.mubr.msk.bf16.vlgmr.msra.gmra.mxu0 %vm114_vm0, %v40_v12  ;;  %1699 = vmatmul.mubr.msk.bf16.vlgmr.msra.gmra.mxu1 %vm114_vm0, %v40_v12  ;;  %v36_v30 = vld [vmem:[%s2987_s0 + $0x20] sm:$0xff]  ;;  %v2206_v32 = vld [vmem:[%s2989_s2 + $0x88] ss:$16 sps:$4 sm:$0xff]   ;;  %v2218_v34 = vld [vmem:[%s2989_s2 + $0x6c] ss:$16 sps:$4 sm:$0xff]   ;;  %v68_v57 = vsub.s32 3, %v55_v54 }
  0x18   :  { %680 = vmatpush1.bf16.msra.mxu0 %v2106_v13  ;;  %721 = vmatpush1.bf16.msra.mxu1 %v2122_v16  ;;  %v2213_v33 = vld [vmem:[%s2989_s2 + $0x64] ss:$16 sps:$4 sm:$0xff]   ;;  %v42_v35 = vpack.c.bf16 %v37_v31, %v36_v30  ;;  %v2227_v36 = vld [vmem:[%s2989_s2 + $0x60] ss:$16 sps:$4 sm:$0xff]   ;;  %v2232_v37 = vld [vmem:[%s2989_s2 + $0x68] ss:$16 sps:$4 sm:$0xff]  }
  0x19   :  { %681 = vmatprep.subr.bf16.mxu0 %v2117_v15  ;;  %169 = vmatprep.mubr.bf16.mxu0 %v2992_v0  ;;  %v2239_v38 = vld [vmem:[%s2989_s2 + $0x44] ss:$16 sps:$4 sm:$0xff]   ;;  %v2244_v39 = vld [vmem:[%s2989_s2 + $0x4c] ss:$16 sps:$4 sm:$0xff]   ;;  %v2251_v40 = vld [vmem:[%s2989_s2 + $0x40] ss:$16 sps:$4 sm:$0xff]  }
  0x1a   :  { %242 = vmatprep.mubr.bf16.mxu1 %v2992_v0  ;;  %722 = vmatprep.subr.bf16.mxu1 %v2128_v17  ;;  %v38_v41 = vld [vmem:[%s2987_s0 + $0x30] sm:$0xff]  ;;  %v39_v42 = vld [vmem:[%s2987_s0 + $0x38] sm:$0xff]  ;;  %v52_v58 = vld [vmem:[%s2990_s3] sm:$0xf]  ;;  %v60_v62 = vsub.s32 1, %v55_v54  ;;  %v2379_v6 = vand.u32 127, %v54_v53 }
  0x1b   :  { %v2264_v43 = vld [vmem:[%s2989_s2 + $0x48] ss:$16 sps:$4 sm:$0xff]   ;;  %v2271_v44 = vld [vmem:[%s2989_s2 + $0x24] ss:$16 sps:$4 sm:$0xff]   ;;  %v2276_v45 = vld [vmem:[%s2989_s2 + $0x2c] ss:$16 sps:$4 sm:$0xff]   ;;  %v43_v46 = vpack.c.bf16 %v39_v42, %v38_v41  ;;  %v2369_v61 = vrot.slane %v52_v58, %v64_v55  ;;  %v2375_v2 = vrot.slane %v52_v58, %v56_v56  ;;  %v2377_v3 = vrot.slane %v52_v58, %v68_v57 }
  0x1c   :  { %682 = vmatpush1.bf16.msra.mxu0 %v2135_v18  ;;  %723 = vmatpush1.bf16.msra.mxu1 %v2148_v21  ;;  %v2285_v47 = vld [vmem:[%s2989_s2 + $0x20] ss:$16 sps:$4 sm:$0xff]   ;;  %v2290_v48 = vld [vmem:[%s2989_s2 + $0x28] ss:$16 sps:$4 sm:$0xff]   ;;  %v2297_v49 = vld [vmem:[%s2989_s2 + $0x4] ss:$16 sps:$4 sm:$0xff]   ;;  %v2381_v7 = vrot.slane %v52_v58, %v60_v62 }
  0x1d   :  { %683 = vmatprep.subr.bf16.mxu0 %v2155_v22  ;;  %724 = vmatprep.subr.bf16.mxu1 %v2162_v23  ;;  %v2302_v50 = vld [vmem:[%s2989_s2 + $0xc] ss:$16 sps:$4 sm:$0xff]   ;;  %v2311_v51 = vld [vmem:[%s2989_s2] ss:$16 sps:$4 sm:$0xff]   ;;  %v2316_v52 = vld [vmem:[%s2989_s2 + $0x8] ss:$16 sps:$4 sm:$0xff]  }
  0x1e   :  { %3007 = vst [vmem:[#allocation8_spill] sm:$0xff] %v2379_v6  ;;  %v419_v31 = vadd.s32 128, %v2379_v6  ;;  %v421_v41 = vadd.s32 384, %v2379_v6  ;;  %vm470_vm1 = vcmp.lt.s32.totalorder %v2379_v6, 64 }
  0x1f   :  { %1696 = vmatmul.mubr.msk.bf16.gmra.mxu0 %vm114_vm0, %v41_v24  ;;  %1700 = vmatmul.mubr.msk.bf16.gmra.mxu1 %vm114_vm0, %v41_v24 }
  0x20   :  { %684 = vmatpush1.bf16.msra.mxu0 %v2167_v25  ;;  %725 = vmatpush1.bf16.msra.mxu1 %v2174_v26 }
  0x21   :  { %685 = vmatprep.subr.bf16.mxu0 %v2181_v27  ;;  %179 = vmatprep.mubr.bf16.mxu0 %v2992_v0 }
  0x22   :  { %252 = vmatprep.mubr.bf16.mxu1 %v2992_v0  ;;  %726 = vmatprep.subr.bf16.mxu1 %v2191_v29 }
  0x24   :  { %686 = vmatpush1.bf16.msra.mxu0 %v2186_v28  ;;  %727 = vmatpush1.bf16.msra.mxu1 %v2206_v32 }
  0x25   :  { %687 = vmatprep.subr.bf16.mxu0 %v2213_v33  ;;  %728 = vmatprep.subr.bf16.mxu1 %v2218_v34 }
  0x27   :  { %1697 = vmatmul.mubr.msk.bf16.gmra.mxu0 %vm114_vm0, %v42_v35  ;;  %1701 = vmatmul.mubr.msk.bf16.gmra.mxu1 %vm114_vm0, %v42_v35  ;;  %v420_v35 = vadd.s32 256, %v2379_v6 }
  0x28   :  { %688 = vmatpush1.bf16.msra.mxu0 %v2227_v36  ;;  %729 = vmatpush1.bf16.msra.mxu1 %v2232_v37 }
  0x29   :  { %689 = vmatprep.subr.bf16.mxu0 %v2239_v38  ;;  %189 = vmatprep.mubr.bf16.mxu0 %v2992_v0 }
  0x2a   :  { %262 = vmatprep.mubr.bf16.mxu1 %v2992_v0  ;;  %730 = vmatprep.subr.bf16.mxu1 %v2244_v39 }
  0x2c   :  { %690 = vmatpush1.bf16.msra.mxu0 %v2251_v40  ;;  %731 = vmatpush1.bf16.msra.mxu1 %v2264_v43 }
  0x2d   :  { %691 = vmatprep.subr.bf16.mxu0 %v2271_v44  ;;  %732 = vmatprep.subr.bf16.mxu1 %v2276_v45 }
  0x2f   :  { %1698 = vmatmul.mubr.msk.bf16.gmra.mxu0 %vm114_vm0, %v43_v46  ;;  %1702 = vmatmul.mubr.msk.bf16.gmra.mxu1 %vm114_vm0, %v43_v46 }
  0x30   :  { %692 = vmatpush1.bf16.msra.mxu0 %v2285_v47  ;;  %733 = vmatpush1.bf16.msra.mxu1 %v2290_v48 }
  0x31   :  { %693 = vmatprep.subr.bf16.mxu0 %v2297_v49  ;;  %711 = vmatprep.mubr.bf16.mxu0 %v2992_v0 }
  0x32   :  { %734 = vmatprep.subr.bf16.mxu1 %v2302_v50  ;;  %752 = vmatprep.mubr.bf16.mxu1 %v2992_v0 }
  0x34   :  { %694 = vmatpush1.bf16.msra.mxu0 %v2311_v51  ;;  %735 = vmatpush1.bf16.msra.mxu1 %v2316_v52 }
  0x35   :  { %803 = vmatprep.subr.bf16.mxu0 %v2101_v11  ;;  %844 = vmatprep.subr.bf16.mxu1 %v2111_v14 }
  0x37   :  { %712 = vmatmul.mubr.bf16.vlgmr.msra.gmra.mxu0 %v2992_v0  ;;  %753 = vmatmul.mubr.bf16.vlgmr.msra.gmra.mxu1 %v2992_v0 }
  0x38   :  { %804 = vmatpush1.bf16.msra.mxu0 %v2106_v13  ;;  %845 = vmatpush1.bf16.msra.mxu1 %v2122_v16 }
  0x39   :  { %805 = vmatprep.subr.bf16.mxu0 %v2117_v15  ;;  %846 = vmatprep.subr.bf16.mxu1 %v2128_v17 }
  0x3a   :  { %835 = vmatprep.mubr.bf16.mxu0 %v2992_v0  ;;  %876 = vmatprep.mubr.bf16.mxu1 %v2992_v0 }
  0x3c   :  { %806 = vmatpush1.bf16.msra.mxu0 %v2135_v18  ;;  %847 = vmatpush1.bf16.msra.mxu1 %v2148_v21 }
  0x3d   :  { %807 = vmatprep.subr.bf16.mxu0 %v2155_v22  ;;  %848 = vmatprep.subr.bf16.mxu1 %v2162_v23 }
  0x40   :  { %808 = vmatpush1.bf16.msra.mxu0 %v2167_v25  ;;  %849 = vmatpush1.bf16.msra.mxu1 %v2174_v26 }
  0x41   :  { %809 = vmatprep.subr.bf16.mxu0 %v2181_v27  ;;  %850 = vmatprep.subr.bf16.mxu1 %v2191_v29 }
  0x44   :  { %810 = vmatpush1.bf16.msra.mxu0 %v2186_v28  ;;  %851 = vmatpush1.bf16.msra.mxu1 %v2206_v32 }
  0x45   :  { %811 = vmatprep.subr.bf16.mxu0 %v2213_v33  ;;  %852 = vmatprep.subr.bf16.mxu1 %v2218_v34 }
  0x48   :  { %812 = vmatpush1.bf16.msra.mxu0 %v2227_v36  ;;  %853 = vmatpush1.bf16.msra.mxu1 %v2232_v37 }
  0x49   :  { %813 = vmatprep.subr.bf16.mxu0 %v2239_v38  ;;  %854 = vmatprep.subr.bf16.mxu1 %v2244_v39 }
  0x4c   :  { %814 = vmatpush1.bf16.msra.mxu0 %v2251_v40  ;;  %855 = vmatpush1.bf16.msra.mxu1 %v2264_v43 }
  0x4d   :  { %815 = vmatprep.subr.bf16.mxu0 %v2271_v44  ;;  %856 = vmatprep.subr.bf16.mxu1 %v2276_v45 }
  0x50   :  { %816 = vmatpush1.bf16.msra.mxu0 %v2285_v47  ;;  %857 = vmatpush1.bf16.msra.mxu1 %v2290_v48 }
  0x51   :  { %817 = vmatprep.subr.bf16.mxu0 %v2297_v49  ;;  %858 = vmatprep.subr.bf16.mxu1 %v2302_v50 }
  0x54   :  { %818 = vmatpush1.bf16.msra.mxu0 %v2311_v51  ;;  %859 = vmatpush1.bf16.msra.mxu1 %v2316_v52 }
  0x55   :  { %928 = vmatprep.subr.bf16.mxu0 %v2101_v11  ;;  %969 = vmatprep.subr.bf16.mxu1 %v2111_v14 }
  0xd7   :  { %v2365_v59 = vpop.f32.mrf.mxu0  ;;  %v2367_v60 = vpop.f32.mrf.mxu1 }
  0xd9   :  { %v2371_v63 = vpop.f32.mrf.mxu0  ;;  %v2373_v1 = vpop.f32.mrf.mxu1 }
  0xdb   :  { %v165_v4 = vpop.f32.mrf.mxu0  ;;  %v238_v5 = vpop.f32.mrf.mxu1 }
  0xdc   :  { %v166_v8 = vadd.f32 %v165_v4, %v2375_v2  ;;  %v239_v9 = vadd.f32 %v238_v5, %v2369_v61  ;;  %v433_v5 = vand.u32 127, %v419_v31 }
  0xdd   :  { %v167_v10 = vpop.f32.mrf.mxu0  ;;  %v240_v12 = vpop.f32.mrf.mxu1 }
  0xde   :  { %v168_v19 = vadd.f32 %v167_v10, %v2381_v7  ;;  %v241_v20 = vadd.f32 %v240_v12, %v2377_v3  ;;  %v440_v10 = vand.u32 127, %v420_v35  ;;  %v447_v12 = vand.u32 127, %v421_v41 }
  0xdf   :  { %v171_v24 = vpop.f32.mrf.mxu0  ;;  %v244_v30 = vpop.f32.mrf.mxu1  ;;  %vm471_vm2 = vcmp.lt.s32.totalorder %v433_v5, 64 }
  0xe0   :  { %v2390_v42 = vpack.c.bf16 %v168_v19, %v166_v8  ;;  %v2392_v46 = vpack.c.bf16 %v241_v20, %v239_v9  ;;  %v172_v53 = vadd.f32 %v171_v24, %v2375_v2  ;;  %v245_v54 = vadd.f32 %v244_v30, %v2369_v61  ;;  %vm2413_vm5 = vmpackc.low %vm471_vm2, %vm470_vm1 }
  0xe1   :  { %v173_v55 = vpop.f32.mrf.mxu0  ;;  %v246_v56 = vpop.f32.mrf.mxu1  ;;  %vm472_vm3 = vcmp.lt.s32.totalorder %v440_v10, 64  ;;  %vm473_vm4 = vcmp.lt.s32.totalorder %v447_v12, 64 }
  0xe2   :  { %v174_v57 = vadd.f32 %v173_v55, %v2381_v7  ;;  %v247_v58 = vadd.f32 %v246_v56, %v2377_v3  ;;  %vm2417_vm6 = vmpackc.low %vm473_vm4, %vm472_vm3 }
  0xe3   :  { %v175_v62 = vpop.f32.mrf.mxu0  ;;  %v248_v4 = vpop.f32.mrf.mxu1 }
  0xe4   :  { %v2398_v0 = vpack.c.bf16 %v174_v57, %v172_v53  ;;  %v2400_v8 = vpack.c.bf16 %v247_v58, %v245_v54  ;;  %v176_v9 = vadd.f32 %v175_v62, %v2375_v2  ;;  %v249_v19 = vadd.f32 %v248_v4, %v2369_v61 }
  0xe5   :  { %v177_v20 = vpop.f32.mrf.mxu0  ;;  %v250_v24 = vpop.f32.mrf.mxu1 }
  0xe6   :  { %v178_v30 = vadd.f32 %v177_v20, %v2381_v7  ;;  %v251_v55 = vadd.f32 %v250_v24, %v2377_v3 }
  0xe7   :  { %v181_v56 = vpop.f32.mrf.mxu0  ;;  %v254_v14 = vpop.f32.mrf.mxu1 }
  0xe8   :  { %v1802_v31 = vpack.c.bf16 %v178_v30, %v176_v9  ;;  %v1803_v35 = vpack.c.bf16 %v251_v55, %v249_v19  ;;  %v182_v41 = vadd.f32 %v181_v56, %v2375_v2  ;;  %v255_v53 = vadd.f32 %v254_v14, %v2369_v61 }
  0xe9   :  { %v183_v54 = vpop.f32.mrf.mxu0  ;;  %v256_v57 = vpop.f32.mrf.mxu1 }
  0xea   :  { %v184_v58 = vadd.f32 %v183_v54, %v2381_v7  ;;  %v257_v62 = vadd.f32 %v256_v57, %v2377_v3 }
  0xeb   :  { %v185_v5 = vpop.f32.mrf.mxu0  ;;  %v258_v10 = vpop.f32.mrf.mxu1 }
  0xec   :  { %v1804_v9 = vpack.c.bf16 %v184_v58, %v182_v41  ;;  %v1805_v14 = vpack.c.bf16 %v257_v62, %v255_v53  ;;  %v186_v19 = vadd.f32 %v185_v5, %v2375_v2  ;;  %v259_v20 = vadd.f32 %v258_v10, %v2369_v61 }
  0xed   :  { %v187_v24 = vpop.f32.mrf.mxu0  ;;  %v260_v30 = vpop.f32.mrf.mxu1 }
  0xee   :  { %v188_v55 = vadd.f32 %v187_v24, %v2381_v7  ;;  %v261_v56 = vadd.f32 %v260_v30, %v2377_v3  ;;  %v2427_v54 = vsel %vm2413_vm5, %v1802_v31, %v1804_v9  ;;  %v2431_v57 = vsel %vm2417_vm6, %v1803_v35, %v1805_v14 }
  0xef   :  { %3012 = vst [vmem:[#allocation9_spill] sm:$0xff] %v2427_v54  ;;  %3013 = vst [vmem:[#allocation10_spill] sm:$0xff] %v2431_v57  ;;  %v191_v41 = vpop.f32.mrf.mxu0  ;;  %v264_v53 = vpop.f32.mrf.mxu1  ;;  %v2437_v30 = vsel %vm2413_vm5, %v1804_v9, %v1802_v31  ;;  %v2441_v54 = vsel %vm2417_vm6, %v1805_v14, %v1803_v35  ;;  %v164_v35 = vadd.f32 %v2371_v63, %v2381_v7 }
  0xf0   :  { %v1806_v58 = vpack.c.bf16 %v188_v55, %v186_v19  ;;  %v1807_v62 = vpack.c.bf16 %v261_v56, %v259_v20  ;;  %v192_v5 = vadd.f32 %v191_v41, %v2375_v2  ;;  %v265_v10 = vadd.f32 %v264_v53, %v2369_v61  ;;  %3014 = vst [vmem:[#allocation11_spill] sm:$0xff] %v2437_v30 }
  0xf1   :  { %v193_v6 = vpop.f32.mrf.mxu0  ;;  %v266_v24 = vpop.f32.mrf.mxu1  ;;  %3015 = vst [vmem:[#allocation12_spill] sm:$0xff] %v2441_v54  ;;  %v237_v63 = vadd.f32 %v2373_v1, %v2377_v3 }
  0xf2   :  { %v194_v57 = vadd.f32 %v193_v6, %v2381_v7  ;;  %v267_v11 = vadd.f32 %v266_v24, %v2377_v3  ;;  %v2448_v19 = vsel %vm2413_vm5, %v2398_v0, %v1806_v58  ;;  %v2453_v20 = vsel %vm2417_vm6, %v2400_v8, %v1807_v62 }
  0xf3   :  { %3016 = vst [vmem:[#allocation13_spill] sm:$0xff] %v2453_v20  ;;  %v195_v31 = vpop.f32.mrf.mxu0  ;;  %v268_v9 = vpop.f32.mrf.mxu1  ;;  %v162_v6 = vadd.f32 %v2365_v59, %v2375_v2  ;;  %v235_v59 = vadd.f32 %v2367_v60, %v2369_v61 }
  0xf4   :  { %v1808_v14 = vpack.c.bf16 %v194_v57, %v192_v5  ;;  %v1809_v55 = vpack.c.bf16 %v267_v11, %v265_v10  ;;  %v196_v56 = vadd.f32 %v195_v31, %v2375_v2  ;;  %v269_v41 = vadd.f32 %v268_v9, %v2369_v61 }
  0xf5   :  { %v197_v53 = vpop.f32.mrf.mxu0  ;;  %v270_v24 = vpop.f32.mrf.mxu1  ;;  %v1796_v57 = vpack.c.bf16 %v164_v35, %v162_v6  ;;  %v2480_v10 = vsel %vm2413_vm5, %v1806_v58, %v2398_v0  ;;  %v2485_v31 = vsel %vm2417_vm6, %v1807_v62, %v2400_v8  ;;  %v1797_v62 = vpack.c.bf16 %v237_v63, %v235_v59 }
  0xf6   :  { %v198_v54 = vadd.f32 %v197_v53, %v2381_v7  ;;  %v271_v30 = vadd.f32 %v270_v24, %v2377_v3  ;;  %v2466_v20 = vsel %vm2413_vm5, %v2390_v42, %v1808_v14  ;;  %v2471_v11 = vsel %vm2417_vm6, %v2392_v46, %v1809_v55 }
  0xf7   :  { %v713_v2 = vpop.f32.mrf.mxu0  ;;  %v754_v7 = vpop.f32.mrf.mxu1  ;;  %v2492_v1 = vsel %vm2413_vm5, %v1808_v14, %v2390_v42  ;;  %v2497_v0 = vsel %vm2417_vm6, %v1809_v55, %v2392_v46 }
  0xf8   :  { %v1810_v5 = vpack.c.bf16 %v198_v54, %v196_v56  ;;  %v1811_v60 = vpack.c.bf16 %v271_v30, %v269_v41 }
  0xf9   :  { %v715_v9 = vpop.f32.mrf.mxu0  ;;  %v756_v53 = vpop.f32.mrf.mxu1 }
  0xfa   :  { %v513_v61 = vsel %vm2413_vm5, %v1796_v57, %v1810_v5  ;;  %v2501_v41 = vsel %vm2413_vm5, %v1810_v5, %v1796_v57  ;;  %v2505_v42 = vsel %vm2417_vm6, %v1811_v60, %v1797_v62  ;;  %v514_v55 = vsel %vm2417_vm6, %v1797_v62, %v1811_v60 }
  0xfb   :  { %v515_v3 = vunpack.c.l.bf16 %v513_v61  ;;  %v516_v54 = vunpack.c.h.bf16 %v513_v61  ;;  %v717_v8 = vpop.f32.mrf.mxu0  ;;  %v758_v58 = vpop.f32.mrf.mxu1  ;;  %v517_v24 = vunpack.c.l.bf16 %v514_v55  ;;  %v518_v63 = vunpack.c.h.bf16 %v514_v55 }
  0xfc   :  { %v798_v55 = vunpack.c.l.bf16 %v2466_v20 }
  0xfd   :  { %v761_v35 = vadd.f32 %v713_v2, %v515_v3  ;;  %v762_v30 = vadd.f32 %v715_v9, %v516_v54  ;;  %v718_v6 = vpop.f32.mrf.mxu0  ;;  %v759_v56 = vpop.f32.mrf.mxu1  ;;  %v763_v59 = vadd.f32 %v754_v7, %v517_v24  ;;  %v764_v9 = vadd.f32 %v756_v53, %v518_v63 }
  0xfe   :  { %v3017_v56 = vmov 0  }
  0xff   :  { %v1751_v14 = vmul.f32 -1.442695, %v761_v35  ;;  %v1752_v46 = vmul.f32 -1.442695, %v762_v30  ;;  %v1753_v2 = vmul.f32 -1.442695, %v763_v59 }
 0x101   :  { %1876 = vpow2.f32 %v1751_v14  ;;  %v3018_v14 = vld [vmem:[#allocation6_spill] sm:$0xff] }
 0x102   :  { %1878 = vpow2.f32 %v1752_v46  ;;  %v3019_v46 = vld [vmem:[#allocation7_spill] sm:$0xff] }
 0x103   :  { %1880 = vpow2.f32 %v1753_v2  ;;  %v799_v2 = vunpack.c.h.bf16 %v2466_v20 }
 0x104   :  { %1882 = vtanh.f32 %v764_v9 }
 0x10e   :  { %v1877_v61 = vpop.eup %1876 }
 0x10f   :  { %v1879_v4 = vpop.eup %1878  ;;  %v774_v57 = vadd.f32 1.0, %v1877_v61 }
 0x110   :  { %v775_v5 = vadd.f32 1.0, %v1879_v4  ;;  %v1881_v3 = vpop.eup %1880 }
 0x111   :  { %1884 = vrcp.f32 %v774_v57  ;;  %v1883_v54 = vpop.eup %1882  ;;  %v776_v60 = vadd.f32 1.0, %v1881_v3 }
 0x112   :  { %1886 = vrcp.f32 %v775_v5 }
 0x113   :  { %1888 = vrcp.f32 %v776_v60  ;;  %v800_v60 = vunpack.c.l.bf16 %v2471_v11 }
 0x11e   :  { %v1885_v8 = vpop.eup %1884 }
 0x11f   :  { %v1887_v12 = vpop.eup %1886  ;;  %v785_v58 = vmul.f32 %v1885_v8, %v1883_v54 }
 0x120   :  { %v784_v62 = vmul.f32 0.0, %v1887_v12  ;;  %v1889_v7 = vpop.eup %1888 }
 0x122   :  { %v2509_v35 = vadd.f32 %v785_v58, %v784_v62  ;;  %v801_v62 = vunpack.c.h.bf16 %v2471_v11 }
 0x124   :  { %1890 = vtanh.f32 %v2509_v35 }
 0x131   :  { %v1891_v53 = vpop.eup %1890 }
 0x132   :  { %v2512_v30 = vmul.f32 %v1891_v53, %v1889_v7 }
 0x134   :  { %v802_v6 = vpack.c.bf16 %v2512_v30, %v2512_v30 }
 0x136   :  { %836 = vmatmul.mubr.bf16.vlgmr.msra.gmra.mxu0 %v802_v6  ;;  %877 = vmatmul.mubr.bf16.vlgmr.msra.gmra.mxu1 %v802_v6 }
 0x137   :  { %929 = vmatpush1.bf16.msra.mxu0 %v2106_v13  ;;  %970 = vmatpush1.bf16.msra.mxu1 %v2122_v16 }
 0x138   :  { %930 = vmatprep.subr.bf16.mxu0 %v2117_v15  ;;  %971 = vmatprep.subr.bf16.mxu1 %v2128_v17 }
 0x139   :  { %960 = vmatprep.mubr.bf16.mxu0 %v3017_v56  ;;  %1001 = vmatprep.mubr.bf16.mxu1 %v3017_v56 }
 0x13b   :  { %931 = vmatpush1.bf16.msra.mxu0 %v2135_v18  ;;  %972 = vmatpush1.bf16.msra.mxu1 %v2148_v21 }
 0x13c   :  { %932 = vmatprep.subr.bf16.mxu0 %v2155_v22  ;;  %973 = vmatprep.subr.bf16.mxu1 %v2162_v23 }
 0x13f   :  { %933 = vmatpush1.bf16.msra.mxu0 %v2167_v25  ;;  %974 = vmatpush1.bf16.msra.mxu1 %v2174_v26 }
 0x140   :  { %934 = vmatprep.subr.bf16.mxu0 %v2181_v27  ;;  %975 = vmatprep.subr.bf16.mxu1 %v2191_v29 }
 0x143   :  { %935 = vmatpush1.bf16.msra.mxu0 %v2186_v28  ;;  %976 = vmatpush1.bf16.msra.mxu1 %v2206_v32 }
 0x144   :  { %936 = vmatprep.subr.bf16.mxu0 %v2213_v33  ;;  %977 = vmatprep.subr.bf16.mxu1 %v2218_v34 }
 0x147   :  { %937 = vmatpush1.bf16.msra.mxu0 %v2227_v36  ;;  %978 = vmatpush1.bf16.msra.mxu1 %v2232_v37 }
 0x148   :  { %938 = vmatprep.subr.bf16.mxu0 %v2239_v38  ;;  %979 = vmatprep.subr.bf16.mxu1 %v2244_v39 }
 0x14b   :  { %939 = vmatpush1.bf16.msra.mxu0 %v2251_v40  ;;  %980 = vmatpush1.bf16.msra.mxu1 %v2264_v43 }
 0x14c   :  { %940 = vmatprep.subr.bf16.mxu0 %v2271_v44  ;;  %981 = vmatprep.subr.bf16.mxu1 %v2276_v45 }
 0x14f   :  { %941 = vmatpush1.bf16.msra.mxu0 %v2285_v47  ;;  %982 = vmatpush1.bf16.msra.mxu1 %v2290_v48 }
 0x150   :  { %942 = vmatprep.subr.bf16.mxu0 %v2297_v49  ;;  %983 = vmatprep.subr.bf16.mxu1 %v2302_v50 }
 0x153   :  { %943 = vmatpush1.bf16.msra.mxu0 %v2311_v51  ;;  %984 = vmatpush1.bf16.msra.mxu1 %v2316_v52 }
 0x154   :  { %1053 = vmatprep.subr.bf16.mxu0 %v3018_v14  ;;  %1094 = vmatprep.subr.bf16.mxu1 %v3019_v46 }
 0x1f6   :  { %v837_v24 = vpop.f32.mrf.mxu0  ;;  %v878_v59 = vpop.f32.mrf.mxu1 }
 0x1f7   :  { %v885_v63 = vadd.f32 %v837_v24, %v798_v55  ;;  %v887_v58 = vadd.f32 %v878_v59, %v800_v60 }
 0x1f8   :  { %v839_v9 = vpop.f32.mrf.mxu0  ;;  %v880_v61 = vpop.f32.mrf.mxu1 }
 0x1f9   :  { %v1754_v4 = vmul.f32 -1.442695, %v885_v63  ;;  %v886_v57 = vadd.f32 %v839_v9, %v799_v2  ;;  %v1756_v7 = vmul.f32 -1.442695, %v887_v58  ;;  %v888_v53 = vadd.f32 %v880_v61, %v801_v62 }
 0x1fa   :  { %v841_v5 = vpop.f32.mrf.mxu0  ;;  %v882_v3 = vpop.f32.mrf.mxu1  ;;  %v924_v62 = vunpack.c.h.bf16 %v2448_v19 }
 0x1fb   :  { %1892 = vpow2.f32 %v1754_v4  ;;  %v1755_v54 = vmul.f32 -1.442695, %v886_v57 }
 0x1fc   :  { %v842_v8 = vpop.f32.mrf.mxu0  ;;  %v883_v12 = vpop.f32.mrf.mxu1 }
 0x1fd   :  { %1894 = vpow2.f32 %v1755_v54 }
 0x1fe   :  { %1896 = vpow2.f32 %v1756_v7 }
 0x1ff   :  { %1898 = vtanh.f32 %v888_v53 }
 0x208   :  { %v1893_v6 = vpop.eup %1892 }
 0x209   :  { %v898_v20 = vadd.f32 1.0, %v1893_v6 }
 0x20a   :  { %v1895_v55 = vpop.eup %1894 }
 0x20b   :  { %1900 = vrcp.f32 %v898_v20  ;;  %v899_v24 = vadd.f32 1.0, %v1895_v55  ;;  %v1897_v63 = vpop.eup %1896 }
 0x20c   :  { %v1899_v2 = vpop.eup %1898  ;;  %v900_v5 = vadd.f32 1.0, %v1897_v63 }
 0x20d   :  { %1902 = vrcp.f32 %v899_v24 }
 0x20e   :  { %1904 = vrcp.f32 %v900_v5 }
 0x218   :  { %v1901_v9 = vpop.eup %1900 }
 0x219   :  { %v909_v4 = vmul.f32 %v1901_v9, %v1899_v2 }
 0x21a   :  { %v1903_v57 = vpop.eup %1902 }
 0x21b   :  { %v908_v59 = vmul.f32 %v1903_v57, %v2509_v35  ;;  %v1905_v11 = vpop.eup %1904  ;;  %v923_v35 = vunpack.c.l.bf16 %v2448_v19 }
 0x21d   :  { %v2555_v3 = vadd.f32 %v909_v4, %v908_v59 }
 0x21f   :  { %1906 = vtanh.f32 %v2555_v3 }
 0x22c   :  { %v1907_v61 = vpop.eup %1906 }
 0x22d   :  { %v2558_v54 = vmul.f32 %v1907_v61, %v1905_v11 }
 0x22f   :  { %v927_v8 = vpack.c.bf16 %v2558_v54, %v2558_v54 }
 0x231   :  { %961 = vmatmul.mubr.bf16.vlgmr.msra.gmra.mxu0 %v927_v8  ;;  %1002 = vmatmul.mubr.bf16.vlgmr.msra.gmra.mxu1 %v927_v8 }
 0x232   :  { %1054 = vmatpush1.bf16.msra.mxu0 %v2106_v13  ;;  %1095 = vmatpush1.bf16.msra.mxu1 %v2122_v16 }
 0x233   :  { %1055 = vmatprep.subr.bf16.mxu0 %v2117_v15  ;;  %1096 = vmatprep.subr.bf16.mxu1 %v2128_v17 }
 0x234   :  { %1085 = vmatprep.mubr.bf16.mxu0 %v3017_v56  ;;  %1126 = vmatprep.mubr.bf16.mxu1 %v3017_v56 }
 0x236   :  { %1056 = vmatpush1.bf16.msra.mxu0 %v2135_v18  ;;  %1097 = vmatpush1.bf16.msra.mxu1 %v2148_v21 }
 0x237   :  { %1057 = vmatprep.subr.bf16.mxu0 %v2155_v22  ;;  %1098 = vmatprep.subr.bf16.mxu1 %v2162_v23 }
 0x23a   :  { %1058 = vmatpush1.bf16.msra.mxu0 %v2167_v25  ;;  %1099 = vmatpush1.bf16.msra.mxu1 %v2174_v26 }
 0x23b   :  { %1059 = vmatprep.subr.bf16.mxu0 %v2181_v27  ;;  %1100 = vmatprep.subr.bf16.mxu1 %v2191_v29 }
 0x23e   :  { %1060 = vmatpush1.bf16.msra.mxu0 %v2186_v28  ;;  %1101 = vmatpush1.bf16.msra.mxu1 %v2206_v32 }
 0x23f   :  { %1061 = vmatprep.subr.bf16.mxu0 %v2213_v33  ;;  %1102 = vmatprep.subr.bf16.mxu1 %v2218_v34 }
 0x242   :  { %1062 = vmatpush1.bf16.msra.mxu0 %v2227_v36  ;;  %1103 = vmatpush1.bf16.msra.mxu1 %v2232_v37 }
 0x243   :  { %1063 = vmatprep.subr.bf16.mxu0 %v2239_v38  ;;  %1104 = vmatprep.subr.bf16.mxu1 %v2244_v39 }
 0x246   :  { %1064 = vmatpush1.bf16.msra.mxu0 %v2251_v40  ;;  %1105 = vmatpush1.bf16.msra.mxu1 %v2264_v43 }
 0x247   :  { %1065 = vmatprep.subr.bf16.mxu0 %v2271_v44  ;;  %1106 = vmatprep.subr.bf16.mxu1 %v2276_v45 }
 0x24a   :  { %1066 = vmatpush1.bf16.msra.mxu0 %v2285_v47  ;;  %1107 = vmatpush1.bf16.msra.mxu1 %v2290_v48 }
 0x24b   :  { %1067 = vmatprep.subr.bf16.mxu0 %v2297_v49  ;;  %1108 = vmatprep.subr.bf16.mxu1 %v2302_v50 }
 0x24e   :  { %1068 = vmatpush1.bf16.msra.mxu0 %v2311_v51  ;;  %1109 = vmatpush1.bf16.msra.mxu1 %v2316_v52 }
 0x24f   :  { %1176 = vmatprep.subr.bf16.mxu0 %v3018_v14  ;;  %1217 = vmatprep.subr.bf16.mxu1 %v3019_v46  ;;  %v3020_v14 = vld [vmem:[#allocation13_spill] sm:$0xff] }
 0x250   :  { %v925_v4 = vunpack.c.l.bf16 %v3020_v14  ;;  %v926_v5 = vunpack.c.h.bf16 %v3020_v14 }
 0x2f1   :  { %v962_v12 = vpop.f32.mrf.mxu0  ;;  %v1003_v60 = vpop.f32.mrf.mxu1 }
 0x2f2   :  { %v1010_v58 = vadd.f32 %v962_v12, %v923_v35  ;;  %v1012_v57 = vadd.f32 %v1003_v60, %v925_v4 }
 0x2f3   :  { %v964_v7 = vpop.f32.mrf.mxu0  ;;  %v1005_v53 = vpop.f32.mrf.mxu1 }
 0x2f4   :  { %v1758_v6 = vmul.f32 -1.442695, %v1010_v58  ;;  %v1011_v20 = vadd.f32 %v964_v7, %v924_v62  ;;  %v1760_v59 = vmul.f32 -1.442695, %v1012_v57  ;;  %v1013_v11 = vadd.f32 %v1005_v53, %v926_v5 }
 0x2f5   :  { %v966_v55 = vpop.f32.mrf.mxu0  ;;  %v1007_v24 = vpop.f32.mrf.mxu1 }
 0x2f6   :  { %1908 = vpow2.f32 %v1758_v6  ;;  %v1759_v63 = vmul.f32 -1.442695, %v1011_v20 }
 0x2f7   :  { %v967_v2 = vpop.f32.mrf.mxu0  ;;  %v1008_v9 = vpop.f32.mrf.mxu1 }
 0x2f8   :  { %1910 = vpow2.f32 %v1759_v63 }
 0x2f9   :  { %1912 = vpow2.f32 %v1760_v59 }
 0x2fa   :  { %1914 = vtanh.f32 %v1013_v11 }
 0x303   :  { %v1909_v61 = vpop.eup %1908 }
 0x304   :  { %v1023_v19 = vadd.f32 1.0, %v1909_v61 }
 0x305   :  { %v1911_v8 = vpop.eup %1910 }
 0x306   :  { %1916 = vrcp.f32 %v1023_v19  ;;  %v1024_v35 = vadd.f32 1.0, %v1911_v8  ;;  %v1913_v12 = vpop.eup %1912 }
 0x307   :  { %v1915_v58 = vpop.eup %1914  ;;  %v1025_v20 = vadd.f32 1.0, %v1913_v12 }
 0x308   :  { %1918 = vrcp.f32 %v1024_v35 }
 0x309   :  { %1920 = vrcp.f32 %v1025_v20 }
 0x313   :  { %v1917_v62 = vpop.eup %1916 }
 0x314   :  { %v1034_v7 = vmul.f32 %v1917_v62, %v1915_v58 }
 0x315   :  { %v1919_v6 = vpop.eup %1918 }
 0x316   :  { %v1033_v60 = vmul.f32 %v1919_v6, %v2555_v3  ;;  %v1921_v53 = vpop.eup %1920  ;;  %v3022_v3 = vld [vmem:[#allocation10_spill] sm:$0xff] }
 0x317   :  { %v1051_v14 = vunpack.c.h.bf16 %v3022_v3 }
 0x318   :  { %v2601_v55 = vadd.f32 %v1034_v7, %v1033_v60 }
 0x31a   :  { %1922 = vtanh.f32 %v2601_v55 }
 0x327   :  { %v1923_v24 = vpop.eup %1922 }
 0x328   :  { %v2604_v63 = vmul.f32 %v1923_v24, %v1921_v53 }
 0x32a   :  { %v1052_v2 = vpack.c.bf16 %v2604_v63, %v2604_v63 }
 0x32c   :  { %1086 = vmatmul.mubr.bf16.vlgmr.msra.gmra.mxu0 %v1052_v2  ;;  %1127 = vmatmul.mubr.bf16.vlgmr.msra.gmra.mxu1 %v1052_v2  ;;  %v2662_v2 = vld [vmem:[%s2989_s2 + $0xe0] ss:$16 sps:$4 sm:$0xff]  }
 0x32d   :  { %1177 = vmatpush1.bf16.msra.mxu0 %v2106_v13  ;;  %1218 = vmatpush1.bf16.msra.mxu1 %v2122_v16  ;;  %v2643_v13 = vld [vmem:[%s2989_s2 + $0xe4] ss:$16 sps:$4 sm:$0xff]  }
 0x32e   :  { %1178 = vmatprep.subr.bf16.mxu0 %v2117_v15  ;;  %1219 = vmatprep.subr.bf16.mxu1 %v2128_v17  ;;  %v3021_v15 = vld [vmem:[#allocation9_spill] sm:$0xff] }
 0x32f   :  { %1208 = vmatprep.mubr.bf16.mxu0 %v3017_v56  ;;  %1249 = vmatprep.mubr.bf16.mxu1 %v3017_v56  ;;  %v1048_v16 = vunpack.c.l.bf16 %v3021_v15 }
 0x331   :  { %1179 = vmatpush1.bf16.msra.mxu0 %v2135_v18  ;;  %1220 = vmatpush1.bf16.msra.mxu1 %v2148_v21 }
 0x332   :  { %1180 = vmatprep.subr.bf16.mxu0 %v2155_v22  ;;  %1221 = vmatprep.subr.bf16.mxu1 %v2162_v23  ;;  %v1049_v22 = vunpack.c.h.bf16 %v3021_v15  ;;  %v2674_v15 = vld [vmem:[%s2989_s2 + $0xc4] ss:$16 sps:$4 sm:$0xff]  }
 0x335   :  { %1181 = vmatpush1.bf16.msra.mxu0 %v2167_v25  ;;  %1222 = vmatpush1.bf16.msra.mxu1 %v2174_v26 }
 0x336   :  { %1182 = vmatprep.subr.bf16.mxu0 %v2181_v27  ;;  %1223 = vmatprep.subr.bf16.mxu1 %v2191_v29 }
 0x339   :  { %1183 = vmatpush1.bf16.msra.mxu0 %v2186_v28  ;;  %1224 = vmatpush1.bf16.msra.mxu1 %v2206_v32 }
 0x33a   :  { %1184 = vmatprep.subr.bf16.mxu0 %v2213_v33  ;;  %1225 = vmatprep.subr.bf16.mxu1 %v2218_v34 }
 0x33d   :  { %1185 = vmatpush1.bf16.msra.mxu0 %v2227_v36  ;;  %1226 = vmatpush1.bf16.msra.mxu1 %v2232_v37 }
 0x33e   :  { %1186 = vmatprep.subr.bf16.mxu0 %v2239_v38  ;;  %1227 = vmatprep.subr.bf16.mxu1 %v2244_v39 }
 0x341   :  { %1187 = vmatpush1.bf16.msra.mxu0 %v2251_v40  ;;  %1228 = vmatpush1.bf16.msra.mxu1 %v2264_v43 }
 0x342   :  { %1188 = vmatprep.subr.bf16.mxu0 %v2271_v44  ;;  %1229 = vmatprep.subr.bf16.mxu1 %v2276_v45 }
 0x345   :  { %1189 = vmatpush1.bf16.msra.mxu0 %v2285_v47  ;;  %1230 = vmatpush1.bf16.msra.mxu1 %v2290_v48 }
 0x346   :  { %1190 = vmatprep.subr.bf16.mxu0 %v2297_v49  ;;  %1231 = vmatprep.subr.bf16.mxu1 %v2302_v50 }
 0x349   :  { %1191 = vmatpush1.bf16.msra.mxu0 %v2311_v51  ;;  %1232 = vmatpush1.bf16.msra.mxu1 %v2316_v52 }
 0x34a   :  { %1299 = vmatprep.subr.bf16.mxu0 %v2643_v13  ;;  %1340 = vmatprep.subr.bf16.mxu1 %v3019_v46  ;;  %v1050_v46 = vunpack.c.l.bf16 %v3022_v3 }
 0x3ec   :  { %v1087_v17 = vpop.f32.mrf.mxu0  ;;  %v1128_v18 = vpop.f32.mrf.mxu1 }
 0x3ed   :  { %v1135_v21 = vadd.f32 %v1087_v17, %v1048_v16  ;;  %v1137_v9 = vadd.f32 %v1128_v18, %v1050_v46  ;;  %v2680_v16 = vld [vmem:[%s2989_s2 + $0xcc] ss:$16 sps:$4 sm:$0xff]   ;;  %v2688_v17 = vld [vmem:[%s2989_s2 + $0xc0] ss:$16 sps:$4 sm:$0xff]   ;;  %v2694_v18 = vld [vmem:[%s2989_s2 + $0xc8] ss:$16 sps:$4 sm:$0xff]  }
 0x3ee   :  { %v1089_v23 = vpop.f32.mrf.mxu0  ;;  %v1130_v25 = vpop.f32.mrf.mxu1  ;;  %v3024_v46 = vld [vmem:[#allocation12_spill] sm:$0xff] }
 0x3ef   :  { %v1762_v26 = vmul.f32 -1.442695, %v1135_v21  ;;  %v1136_v27 = vadd.f32 %v1089_v23, %v1049_v22  ;;  %v1764_v4 = vmul.f32 -1.442695, %v1137_v9  ;;  %v1138_v57 = vadd.f32 %v1130_v25, %v1051_v14  ;;  %v2700_v21 = vld [vmem:[%s2989_s2 + $0xa4] ss:$16 sps:$4 sm:$0xff]  }
 0x3f0   :  { %v1091_v28 = vpop.f32.mrf.mxu0  ;;  %v1132_v29 = vpop.f32.mrf.mxu1  ;;  %v2706_v22 = vld [vmem:[%s2989_s2 + $0xac] ss:$16 sps:$4 sm:$0xff]   ;;  %v2712_v23 = vld [vmem:[%s2989_s2 + $0xa0] ss:$16 sps:$4 sm:$0xff]   ;;  %v2718_v25 = vld [vmem:[%s2989_s2 + $0xa8] ss:$16 sps:$4 sm:$0xff]   ;;  %v1173_v9 = vunpack.c.l.bf16 %v3024_v46 }
 0x3f1   :  { %1924 = vpow2.f32 %v1762_v26  ;;  %v1763_v32 = vmul.f32 -1.442695, %v1136_v27  ;;  %v2724_v26 = vld [vmem:[%s2989_s2 + $0x84] ss:$16 sps:$4 sm:$0xff]   ;;  %v2730_v27 = vld [vmem:[%s2989_s2 + $0x8c] ss:$16 sps:$4 sm:$0xff]  }
 0x3f2   :  { %v1092_v33 = vpop.f32.mrf.mxu0  ;;  %v1133_v34 = vpop.f32.mrf.mxu1  ;;  %v2736_v28 = vld [vmem:[%s2989_s2 + $0x80] ss:$16 sps:$4 sm:$0xff]   ;;  %v2742_v29 = vld [vmem:[%s2989_s2 + $0x88] ss:$16 sps:$4 sm:$0xff]  }
 0x3f3   :  { %1926 = vpow2.f32 %v1763_v32  ;;  %v2748_v32 = vld [vmem:[%s2989_s2 + $0x64] ss:$16 sps:$4 sm:$0xff]   ;;  %v2754_v33 = vld [vmem:[%s2989_s2 + $0x6c] ss:$16 sps:$4 sm:$0xff]  }
 0x3f4   :  { %1928 = vpow2.f32 %v1764_v4  ;;  %v1174_v4 = vunpack.c.h.bf16 %v3024_v46  ;;  %v2885_v46 = vld [vmem:[%s2989_s2 + $0xc] ss:$16 sps:$4 sm:$0xff]  }
 0x3f5   :  { %1930 = vtanh.f32 %v1138_v57 }
 0x3fe   :  { %v1925_v5 = vpop.eup %1924 }
 0x3ff   :  { %v1148_v59 = vadd.f32 1.0, %v1925_v5 }
 0x400   :  { %v1927_v11 = vpop.eup %1926 }
 0x401   :  { %1932 = vrcp.f32 %v1148_v59  ;;  %v1149_v61 = vadd.f32 1.0, %v1927_v11  ;;  %v1929_v19 = vpop.eup %1928 }
 0x402   :  { %v1931_v8 = vpop.eup %1930  ;;  %v1150_v62 = vadd.f32 1.0, %v1929_v19 }
 0x403   :  { %1934 = vrcp.f32 %v1149_v61 }
 0x404   :  { %1936 = vrcp.f32 %v1150_v62 }
 0x40e   :  { %v1933_v35 = vpop.eup %1932 }
 0x40f   :  { %v1159_v12 = vmul.f32 %v1933_v35, %v1931_v8 }
 0x410   :  { %v1935_v58 = vpop.eup %1934 }
 0x411   :  { %v1158_v7 = vmul.f32 %v1935_v58, %v2601_v55  ;;  %v1937_v20 = vpop.eup %1936  ;;  %v2668_v55 = vld [vmem:[%s2989_s2 + $0xe8] ss:$16 sps:$4 sm:$0xff]  }
 0x413   :  { %v2652_v6 = vadd.f32 %v1159_v12, %v1158_v7 }
 0x415   :  { %1938 = vtanh.f32 %v2652_v6 }
 0x422   :  { %v1939_v60 = vpop.eup %1938 }
 0x423   :  { %v2655_v53 = vmul.f32 %v1939_v60, %v1937_v20 }
 0x425   :  { %v1175_v24 = vpack.c.bf16 %v2655_v53, %v2655_v53 }
 0x427   :  { %1209 = vmatmul.mubr.bf16.vlgmr.msra.gmra.mxu0 %v1175_v24  ;;  %1250 = vmatmul.mubr.bf16.vlgmr.msra.gmra.mxu1 %v1175_v24 }
 0x428   :  { %1300 = vmatpush1.bf16.msra.mxu0 %v2662_v2  ;;  %1341 = vmatpush1.bf16.msra.mxu1 %v2668_v55 }
 0x429   :  { %1301 = vmatprep.subr.bf16.mxu0 %v2674_v15  ;;  %1342 = vmatprep.subr.bf16.mxu1 %v2680_v16 }
 0x42a   :  { %1331 = vmatprep.mubr.bf16.mxu0 %v3017_v56  ;;  %1372 = vmatprep.mubr.bf16.mxu1 %v3017_v56 }
 0x42c   :  { %1302 = vmatpush1.bf16.msra.mxu0 %v2688_v17  ;;  %1343 = vmatpush1.bf16.msra.mxu1 %v2694_v18 }
 0x42d   :  { %1303 = vmatprep.subr.bf16.mxu0 %v2700_v21  ;;  %1344 = vmatprep.subr.bf16.mxu1 %v2706_v22 }
 0x430   :  { %1304 = vmatpush1.bf16.msra.mxu0 %v2712_v23  ;;  %1345 = vmatpush1.bf16.msra.mxu1 %v2718_v25 }
 0x431   :  { %1305 = vmatprep.subr.bf16.mxu0 %v2724_v26  ;;  %1346 = vmatprep.subr.bf16.mxu1 %v2730_v27 }
 0x434   :  { %1306 = vmatpush1.bf16.msra.mxu0 %v2736_v28  ;;  %1347 = vmatpush1.bf16.msra.mxu1 %v2742_v29 }
 0x435   :  { %1307 = vmatprep.subr.bf16.mxu0 %v2748_v32  ;;  %1348 = vmatprep.subr.bf16.mxu1 %v2754_v33 }
 0x438   :  { %1308 = vmatpush1.bf16.msra.mxu0 %v2227_v36  ;;  %1349 = vmatpush1.bf16.msra.mxu1 %v2232_v37  ;;  %v2775_v36 = vld [vmem:[%s2989_s2 + $0xec] ss:$16 sps:$4 sm:$0xff]  }
 0x439   :  { %1309 = vmatprep.subr.bf16.mxu0 %v2239_v38  ;;  %1350 = vmatprep.subr.bf16.mxu1 %v2244_v39  ;;  %v3023_v37 = vld [vmem:[#allocation11_spill] sm:$0xff] }
 0x43a   :  { %v1171_v38 = vunpack.c.l.bf16 %v3023_v37 }
 0x43c   :  { %1310 = vmatpush1.bf16.msra.mxu0 %v2251_v40  ;;  %1351 = vmatpush1.bf16.msra.mxu1 %v2264_v43 }
 0x43d   :  { %1311 = vmatprep.subr.bf16.mxu0 %v2271_v44  ;;  %1352 = vmatprep.subr.bf16.mxu1 %v2276_v45  ;;  %v1172_v44 = vunpack.c.h.bf16 %v3023_v37 }
 0x440   :  { %1312 = vmatpush1.bf16.msra.mxu0 %v2285_v47  ;;  %1353 = vmatpush1.bf16.msra.mxu1 %v2290_v48 }
 0x441   :  { %1313 = vmatprep.subr.bf16.mxu0 %v2297_v49  ;;  %1354 = vmatprep.subr.bf16.mxu1 %v2302_v50 }
 0x444   :  { %1314 = vmatpush1.bf16.msra.mxu0 %v2311_v51  ;;  %1355 = vmatpush1.bf16.msra.mxu1 %v2316_v52 }
 0x445   :  { %1422 = vmatprep.subr.bf16.mxu0 %v2643_v13  ;;  %1463 = vmatprep.subr.bf16.mxu1 %v2775_v36 }
 0x4e7   :  { %v1210_v39 = vpop.f32.mrf.mxu0  ;;  %v1251_v40 = vpop.f32.mrf.mxu1 }
 0x4e8   :  { %v1258_v43 = vadd.f32 %v1210_v39, %v1171_v38  ;;  %v1260_v14 = vadd.f32 %v1251_v40, %v1173_v9  ;;  %v2891_v9 = vld [vmem:[%s2989_s2] ss:$16 sps:$4 sm:$0xff]  }
 0x4e9   :  { %v1212_v45 = vpop.f32.mrf.mxu0  ;;  %v1253_v47 = vpop.f32.mrf.mxu1 }
 0x4ea   :  { %v1766_v48 = vmul.f32 -1.442695, %v1258_v43  ;;  %v1259_v49 = vadd.f32 %v1212_v45, %v1172_v44  ;;  %v1768_v57 = vmul.f32 -1.442695, %v1260_v14  ;;  %v1261_v5 = vadd.f32 %v1253_v47, %v1174_v4  ;;  %v2831_v45 = vld [vmem:[%s2989_s2 + $0x44] ss:$16 sps:$4 sm:$0xff]  }
 0x4eb   :  { %v1214_v50 = vpop.f32.mrf.mxu0  ;;  %v1255_v51 = vpop.f32.mrf.mxu1  ;;  %v2837_v47 = vld [vmem:[%s2989_s2 + $0x4c] ss:$16 sps:$4 sm:$0xff]   ;;  %v2897_v14 = vld [vmem:[%s2989_s2 + $0x8] ss:$16 sps:$4 sm:$0xff]   ;;  %v1294_v4 = vunpack.c.l.bf16 %v2480_v10 }
 0x4ec   :  { %1940 = vpow2.f32 %v1766_v48  ;;  %v1767_v52 = vmul.f32 -1.442695, %v1259_v49  ;;  %v2843_v48 = vld [vmem:[%s2989_s2 + $0x40] ss:$16 sps:$4 sm:$0xff]   ;;  %v2849_v49 = vld [vmem:[%s2989_s2 + $0x48] ss:$16 sps:$4 sm:$0xff]  }
 0x4ed   :  { %v1215_v34 = vpop.f32.mrf.mxu0  ;;  %v1256_v3 = vpop.f32.mrf.mxu1  ;;  %v2855_v50 = vld [vmem:[%s2989_s2 + $0x24] ss:$16 sps:$4 sm:$0xff]   ;;  %v2861_v51 = vld [vmem:[%s2989_s2 + $0x2c] ss:$16 sps:$4 sm:$0xff]  }
 0x4ee   :  { %1942 = vpow2.f32 %v1767_v52  ;;  %v2867_v52 = vld [vmem:[%s2989_s2 + $0x20] ss:$16 sps:$4 sm:$0xff]   ;;  %v2873_v34 = vld [vmem:[%s2989_s2 + $0x28] ss:$16 sps:$4 sm:$0xff]   ;;  %v2879_v3 = vld [vmem:[%s2989_s2 + $0x4] ss:$16 sps:$4 sm:$0xff]  }
 0x4ef   :  { %1944 = vpow2.f32 %v1768_v57 }
 0x4f0   :  { %1946 = vtanh.f32 %v1261_v5 }
 0x4f9   :  { %v1941_v59 = vpop.eup %1940 }
 0x4fa   :  { %v1271_v11 = vadd.f32 1.0, %v1941_v59 }
 0x4fb   :  { %v1943_v61 = vpop.eup %1942 }
 0x4fc   :  { %1948 = vrcp.f32 %v1271_v11  ;;  %v1272_v19 = vadd.f32 1.0, %v1943_v61  ;;  %v1945_v8 = vpop.eup %1944  ;;  %v1295_v11 = vunpack.c.h.bf16 %v2480_v10 }
 0x4fd   :  { %v1947_v35 = vpop.eup %1946  ;;  %v1273_v7 = vadd.f32 1.0, %v1945_v8 }
 0x4fe   :  { %1950 = vrcp.f32 %v1272_v19 }
 0x4ff   :  { %1952 = vrcp.f32 %v1273_v7 }
 0x509   :  { %v1949_v12 = vpop.eup %1948 }
 0x50a   :  { %v1282_v58 = vmul.f32 %v1949_v12, %v1947_v35 }
 0x50b   :  { %v1951_v62 = vpop.eup %1950 }
 0x50c   :  { %v1281_v20 = vmul.f32 %v1951_v62, %v2652_v6  ;;  %v1953_v24 = vpop.eup %1952  ;;  %v2819_v6 = vld [vmem:[%s2989_s2 + $0x60] ss:$16 sps:$4 sm:$0xff]  }
 0x50e   :  { %v2783_v60 = vadd.f32 %v1282_v58, %v1281_v20 }
 0x510   :  { %1954 = vtanh.f32 %v2783_v60 }
 0x51d   :  { %v1955_v37 = vpop.eup %1954 }
 0x51e   :  { %v1285_v38 = vmul.f32 %v1955_v37, %v1953_v24  ;;  %v1297_v24 = vunpack.c.h.bf16 %v2485_v31 }
 0x520   :  { %v1298_v39 = vpack.c.bf16 %v1285_v38, %v1285_v38  ;;  %v1678_v43 = vsel %vm470_vm1, %v2655_v53, %v1285_v38  ;;  %v1680_v44 = vsel %vm470_vm1, %v1285_v38, %v2655_v53  ;;  %v2825_v53 = vld [vmem:[%s2989_s2 + $0x68] ss:$16 sps:$4 sm:$0xff]  }
 0x521   :  { %1794 = vst [vmem:[%s2991_s4 + $0x18] sm:$0xff] %v1678_v43  ;;  %1795 = vst [vmem:[%s2991_s4 + $0x20] sm:$0xff] %v1680_v44 }
 0x522   :  { %1332 = vmatmul.mubr.bf16.vlgmr.msra.gmra.mxu0 %v1298_v39  ;;  %1373 = vmatmul.mubr.bf16.vlgmr.msra.gmra.mxu1 %v1298_v39 }
 0x523   :  { %1423 = vmatpush1.bf16.msra.mxu0 %v2662_v2  ;;  %1464 = vmatpush1.bf16.msra.mxu1 %v2668_v55 }
 0x524   :  { %1424 = vmatprep.subr.bf16.mxu0 %v2674_v15  ;;  %1465 = vmatprep.subr.bf16.mxu1 %v2680_v16 }
 0x525   :  { %1454 = vmatprep.mubr.bf16.mxu0 %v3017_v56  ;;  %1495 = vmatprep.mubr.bf16.mxu1 %v3017_v56 }
 0x527   :  { %1425 = vmatpush1.bf16.msra.mxu0 %v2688_v17  ;;  %1466 = vmatpush1.bf16.msra.mxu1 %v2694_v18 }
 0x528   :  { %1426 = vmatprep.subr.bf16.mxu0 %v2700_v21  ;;  %1467 = vmatprep.subr.bf16.mxu1 %v2706_v22 }
 0x52b   :  { %1427 = vmatpush1.bf16.msra.mxu0 %v2712_v23  ;;  %1468 = vmatpush1.bf16.msra.mxu1 %v2718_v25 }
 0x52c   :  { %1428 = vmatprep.subr.bf16.mxu0 %v2724_v26  ;;  %1469 = vmatprep.subr.bf16.mxu1 %v2730_v27 }
 0x52f   :  { %1429 = vmatpush1.bf16.msra.mxu0 %v2736_v28  ;;  %1470 = vmatpush1.bf16.msra.mxu1 %v2742_v29 }
 0x530   :  { %1430 = vmatprep.subr.bf16.mxu0 %v2748_v32  ;;  %1471 = vmatprep.subr.bf16.mxu1 %v2754_v33 }
 0x533   :  { %1431 = vmatpush1.bf16.msra.mxu0 %v2819_v6  ;;  %1472 = vmatpush1.bf16.msra.mxu1 %v2825_v53 }
 0x534   :  { %1432 = vmatprep.subr.bf16.mxu0 %v2831_v45  ;;  %1473 = vmatprep.subr.bf16.mxu1 %v2837_v47 }
 0x537   :  { %1433 = vmatpush1.bf16.msra.mxu0 %v2843_v48  ;;  %1474 = vmatpush1.bf16.msra.mxu1 %v2849_v49 }
 0x538   :  { %1434 = vmatprep.subr.bf16.mxu0 %v2855_v50  ;;  %1475 = vmatprep.subr.bf16.mxu1 %v2861_v51 }
 0x53b   :  { %1435 = vmatpush1.bf16.msra.mxu0 %v2867_v52  ;;  %1476 = vmatpush1.bf16.msra.mxu1 %v2873_v34 }
 0x53c   :  { %1436 = vmatprep.subr.bf16.mxu0 %v2879_v3  ;;  %1477 = vmatprep.subr.bf16.mxu1 %v2885_v46 }
 0x53f   :  { %1437 = vmatpush1.bf16.msra.mxu0 %v2891_v9  ;;  %1478 = vmatpush1.bf16.msra.mxu1 %v2897_v14 }
 0x540   :  { %1545 = vmatprep.subr.bf16.mxu0 %v2643_v13  ;;  %1586 = vmatprep.subr.bf16.mxu1 %v2775_v36  ;;  %v1296_v13 = vunpack.c.l.bf16 %v2485_v31 }
 0x5e2   :  { %v1333_v57 = vpop.f32.mrf.mxu0  ;;  %v1374_v5 = vpop.f32.mrf.mxu1 }
 0x5e3   :  { %v1381_v59 = vadd.f32 %v1333_v57, %v1294_v4  ;;  %v1383_v36 = vadd.f32 %v1374_v5, %v1296_v13 }
 0x5e4   :  { %v1335_v61 = vpop.f32.mrf.mxu0  ;;  %v1376_v19 = vpop.f32.mrf.mxu1 }
 0x5e5   :  { %v1770_v8 = vmul.f32 -1.442695, %v1381_v59  ;;  %v1382_v35 = vadd.f32 %v1335_v61, %v1295_v11  ;;  %v1772_v37 = vmul.f32 -1.442695, %v1383_v36  ;;  %v1384_v38 = vadd.f32 %v1376_v19, %v1297_v24 }
 0x5e6   :  { %v1337_v12 = vpop.f32.mrf.mxu0  ;;  %v1378_v58 = vpop.f32.mrf.mxu1  ;;  %v1540_v36 = vunpack.c.l.bf16 %v2501_v41 }
 0x5e7   :  { %1956 = vpow2.f32 %v1770_v8  ;;  %v1771_v62 = vmul.f32 -1.442695, %v1382_v35 }
 0x5e8   :  { %v1338_v7 = vpop.f32.mrf.mxu0  ;;  %v1379_v20 = vpop.f32.mrf.mxu1 }
 0x5e9   :  { %1958 = vpow2.f32 %v1771_v62 }
 0x5ea   :  { %1960 = vpow2.f32 %v1772_v37 }
 0x5eb   :  { %1962 = vtanh.f32 %v1384_v38 }
 0x5f4   :  { %v1957_v39 = vpop.eup %1956 }
 0x5f5   :  { %v1394_v10 = vadd.f32 1.0, %v1957_v39  ;;  %v1541_v39 = vunpack.c.h.bf16 %v2501_v41 }
 0x5f6   :  { %v1959_v43 = vpop.eup %1958 }
 0x5f7   :  { %1964 = vrcp.f32 %v1394_v10  ;;  %v1395_v44 = vadd.f32 1.0, %v1959_v43  ;;  %v1961_v4 = vpop.eup %1960 }
 0x5f8   :  { %v1963_v57 = vpop.eup %1962  ;;  %v1396_v8 = vadd.f32 1.0, %v1961_v4 }
 0x5f9   :  { %1966 = vrcp.f32 %v1395_v44 }
 0x5fa   :  { %1968 = vrcp.f32 %v1396_v8  ;;  %v1542_v8 = vunpack.c.l.bf16 %v2505_v42 }
 0x604   :  { %v1965_v59 = vpop.eup %1964 }
 0x605   :  { %v1405_v11 = vmul.f32 %v1965_v59, %v1963_v57 }
 0x606   :  { %v1967_v61 = vpop.eup %1966 }
 0x607   :  { %v1404_v5 = vmul.f32 %v1967_v61, %v2783_v60  ;;  %v1969_v31 = vpop.eup %1968 }
 0x609   :  { %v2907_v35 = vadd.f32 %v1405_v11, %v1404_v5 }
 0x60b   :  { %1970 = vtanh.f32 %v2907_v35 }
 0x618   :  { %v1971_v19 = vpop.eup %1970 }
 0x619   :  { %v1408_v12 = vmul.f32 %v1971_v19, %v1969_v31 }
 0x61b   :  { %v1421_v58 = vpack.c.bf16 %v1408_v12, %v1408_v12  ;;  %v1672_v62 = vsel %vm470_vm1, %v2604_v63, %v1408_v12  ;;  %v1674_v7 = vsel %vm470_vm1, %v1408_v12, %v2604_v63 }
 0x61c   :  { %1790 = vst [vmem:[%s2991_s4 + $0x10] sm:$0xff] %v1672_v62  ;;  %1791 = vst [vmem:[%s2991_s4 + $0x28] sm:$0xff] %v1674_v7 }
 0x61d   :  { %1455 = vmatmul.mubr.bf16.vlgmr.msra.gmra.mxu0 %v1421_v58  ;;  %1496 = vmatmul.mubr.bf16.vlgmr.msra.gmra.mxu1 %v1421_v58 }
 0x61e   :  { %1546 = vmatpush1.bf16.msra.mxu0 %v2662_v2  ;;  %1587 = vmatpush1.bf16.msra.mxu1 %v2668_v55 }
 0x61f   :  { %1547 = vmatprep.subr.bf16.mxu0 %v2674_v15  ;;  %1588 = vmatprep.subr.bf16.mxu1 %v2680_v16  ;;  %v1418_v15 = vunpack.c.h.bf16 %v2492_v1 }
 0x620   :  { %1577 = vmatprep.mubr.bf16.mxu0 %v3017_v56  ;;  %1618 = vmatprep.mubr.bf16.mxu1 %v3017_v56  ;;  %v1417_v56 = vunpack.c.l.bf16 %v2492_v1 }
 0x622   :  { %1548 = vmatpush1.bf16.msra.mxu0 %v2688_v17  ;;  %1589 = vmatpush1.bf16.msra.mxu1 %v2694_v18 }
 0x623   :  { %1549 = vmatprep.subr.bf16.mxu0 %v2700_v21  ;;  %1590 = vmatprep.subr.bf16.mxu1 %v2706_v22 }
 0x626   :  { %1550 = vmatpush1.bf16.msra.mxu0 %v2712_v23  ;;  %1591 = vmatpush1.bf16.msra.mxu1 %v2718_v25 }
 0x627   :  { %1551 = vmatprep.subr.bf16.mxu0 %v2724_v26  ;;  %1592 = vmatprep.subr.bf16.mxu1 %v2730_v27 }
 0x62a   :  { %1552 = vmatpush1.bf16.msra.mxu0 %v2736_v28  ;;  %1593 = vmatpush1.bf16.msra.mxu1 %v2742_v29  ;;  %v1419_v28 = vunpack.c.l.bf16 %v2497_v0 }
 0x62b   :  { %1553 = vmatprep.subr.bf16.mxu0 %v2748_v32  ;;  %1594 = vmatprep.subr.bf16.mxu1 %v2754_v33  ;;  %v1420_v32 = vunpack.c.h.bf16 %v2497_v0 }
 0x62e   :  { %1554 = vmatpush1.bf16.msra.mxu0 %v2819_v6  ;;  %1595 = vmatpush1.bf16.msra.mxu1 %v2825_v53 }
 0x62f   :  { %1555 = vmatprep.subr.bf16.mxu0 %v2831_v45  ;;  %1596 = vmatprep.subr.bf16.mxu1 %v2837_v47 }
 0x632   :  { %1556 = vmatpush1.bf16.msra.mxu0 %v2843_v48  ;;  %1597 = vmatpush1.bf16.msra.mxu1 %v2849_v49 }
 0x633   :  { %1557 = vmatprep.subr.bf16.mxu0 %v2855_v50  ;;  %1598 = vmatprep.subr.bf16.mxu1 %v2861_v51 }
 0x636   :  { %1558 = vmatpush1.bf16.msra.mxu0 %v2867_v52  ;;  %1599 = vmatpush1.bf16.msra.mxu1 %v2873_v34 }
 0x637   :  { %1559 = vmatprep.subr.bf16.mxu0 %v2879_v3  ;;  %1600 = vmatprep.subr.bf16.mxu1 %v2885_v46 }
 0x63a   :  { %1560 = vmatpush1.bf16.msra.mxu0 %v2891_v9  ;;  %1601 = vmatpush1.bf16.msra.mxu1 %v2897_v14 }
 0x6dd   :  { %v1456_v63 = vpop.f32.mrf.mxu0  ;;  %v1497_v2 = vpop.f32.mrf.mxu1 }
 0x6de   :  { %v1504_v55 = vadd.f32 %v1456_v63, %v1417_v56  ;;  %v1506_v29 = vadd.f32 %v1497_v2, %v1419_v28 }
 0x6df   :  { %v1458_v16 = vpop.f32.mrf.mxu0  ;;  %v1499_v17 = vpop.f32.mrf.mxu1 }
 0x6e0   :  { %v1774_v18 = vmul.f32 -1.442695, %v1504_v55  ;;  %v1505_v21 = vadd.f32 %v1458_v16, %v1418_v15  ;;  %v1776_v33 = vmul.f32 -1.442695, %v1506_v29  ;;  %v1507_v60 = vadd.f32 %v1499_v17, %v1420_v32 }
 0x6e1   :  { %v1460_v22 = vpop.f32.mrf.mxu0  ;;  %v1501_v23 = vpop.f32.mrf.mxu1 }
 0x6e2   :  { %1972 = vpow2.f32 %v1774_v18  ;;  %v1775_v25 = vmul.f32 -1.442695, %v1505_v21 }
 0x6e3   :  { %v1461_v26 = vpop.f32.mrf.mxu0  ;;  %v1502_v27 = vpop.f32.mrf.mxu1 }
 0x6e4   :  { %1974 = vpow2.f32 %v1775_v25 }
 0x6e5   :  { %1976 = vpow2.f32 %v1776_v33 }
 0x6e6   :  { %1978 = vtanh.f32 %v1507_v60 }
 0x6ef   :  { %v1973_v6 = vpop.eup %1972 }
 0x6f0   :  { %v1517_v1 = vadd.f32 1.0, %v1973_v6 }
 0x6f1   :  { %v1975_v53 = vpop.eup %1974 }
 0x6f2   :  { %1980 = vrcp.f32 %v1517_v1  ;;  %v1518_v45 = vadd.f32 1.0, %v1975_v53  ;;  %v1977_v47 = vpop.eup %1976 }
 0x6f3   :  { %v1979_v48 = vpop.eup %1978  ;;  %v1519_v52 = vadd.f32 1.0, %v1977_v47 }
 0x6f4   :  { %1982 = vrcp.f32 %v1518_v45 }
 0x6f5   :  { %1984 = vrcp.f32 %v1519_v52 }
 0x6ff   :  { %v1981_v49 = vpop.eup %1980 }
 0x700   :  { %v1528_v50 = vmul.f32 %v1981_v49, %v1979_v48 }
 0x701   :  { %v1983_v51 = vpop.eup %1982 }
 0x702   :  { %v1527_v34 = vmul.f32 %v1983_v51, %v2907_v35  ;;  %v1985_v0 = vpop.eup %1984  ;;  %v1543_v35 = vunpack.c.h.bf16 %v2505_v42 }
 0x704   :  { %v1529_v3 = vadd.f32 %v1528_v50, %v1527_v34 }
 0x706   :  { %1986 = vtanh.f32 %v1529_v3 }
 0x713   :  { %v1987_v46 = vpop.eup %1986 }
 0x714   :  { %v1531_v9 = vmul.f32 %v1987_v46, %v1985_v0 }
 0x716   :  { %v1544_v14 = vpack.c.bf16 %v1531_v9, %v1531_v9  ;;  %v1666_v20 = vsel %vm470_vm1, %v2558_v54, %v1531_v9  ;;  %v1668_v13 = vsel %vm470_vm1, %v1531_v9, %v2558_v54 }
 0x717   :  { %1786 = vst [vmem:[%s2991_s4 + $0x8] sm:$0xff] %v1666_v20  ;;  %1787 = vst [vmem:[%s2991_s4 + $0x30] sm:$0xff] %v1668_v13 }
 0x718   :  { %1578 = vmatmul.mubr.bf16.vlgmr.msra.gmra.mxu0 %v1544_v14  ;;  %1619 = vmatmul.mubr.bf16.vlgmr.msra.gmra.mxu1 %v1544_v14 }
 0x7d8   :  { %v1579_v24 = vpop.f32.mrf.mxu0  ;;  %v1620_v37 = vpop.f32.mrf.mxu1 }
 0x7d9   :  { %v1627_v38 = vadd.f32 %v1579_v24, %v1540_v36  ;;  %v1629_v5 = vadd.f32 %v1620_v37, %v1542_v8 }
 0x7da   :  { %v1581_v10 = vpop.f32.mrf.mxu0  ;;  %v1622_v43 = vpop.f32.mrf.mxu1 }
 0x7db   :  { %v1778_v54 = vmul.f32 -1.442695, %v1627_v38  ;;  %v1628_v44 = vadd.f32 %v1581_v10, %v1541_v39  ;;  %v1780_v31 = vmul.f32 -1.442695, %v1629_v5  ;;  %v1630_v19 = vadd.f32 %v1622_v43, %v1543_v35 }
 0x7dc   :  { %v1583_v4 = vpop.f32.mrf.mxu0  ;;  %v1624_v57 = vpop.f32.mrf.mxu1 }
 0x7dd   :  { %1988 = vpow2.f32 %v1778_v54  ;;  %v1779_v59 = vmul.f32 -1.442695, %v1628_v44 }
 0x7de   :  { %v1584_v11 = vpop.f32.mrf.mxu0  ;;  %v1625_v61 = vpop.f32.mrf.mxu1 }
 0x7df   :  { %1990 = vpow2.f32 %v1779_v59 }
 0x7e0   :  { %1992 = vpow2.f32 %v1780_v31 }
 0x7e1   :  { %1994 = vtanh.f32 %v1630_v19 }
 0x7ea   :  { %v1989_v12 = vpop.eup %1988 }
 0x7eb   :  { %v1640_v41 = vadd.f32 1.0, %v1989_v12 }
 0x7ec   :  { %v1991_v58 = vpop.eup %1990 }
 0x7ed   :  { %1996 = vrcp.f32 %v1640_v41  ;;  %v1641_v62 = vadd.f32 1.0, %v1991_v58  ;;  %v1993_v7 = vpop.eup %1992 }
 0x7ee   :  { %v1995_v56 = vpop.eup %1994  ;;  %v1642_v15 = vadd.f32 1.0, %v1993_v7 }
 0x7ef   :  { %1998 = vrcp.f32 %v1641_v62 }
 0x7f0   :  { %2000 = vrcp.f32 %v1642_v15 }
 0x7fa   :  { %v1997_v63 = vpop.eup %1996 }
 0x7fb   :  { %v1651_v2 = vmul.f32 %v1997_v63, %v1995_v56 }
 0x7fc   :  { %v1999_v55 = vpop.eup %1998 }
 0x7fd   :  { %v1650_v16 = vmul.f32 %v1999_v55, %v1529_v3  ;;  %v2001_v42 = vpop.eup %2000 }
 0x7ff   :  { %v1652_v17 = vadd.f32 %v1651_v2, %v1650_v16 }
 0x801   :  { %2002 = vtanh.f32 %v1652_v17 }
 0x80e   :  { %v2003_v18 = vpop.eup %2002 }
 0x80f   :  { %v1654_v21 = vmul.f32 %v2003_v18, %v2001_v42 }
 0x811   :  { %v1660_v22 = vsel %vm470_vm1, %v2512_v30, %v1654_v21  ;;  %v1662_v23 = vsel %vm470_vm1, %v1654_v21, %v2512_v30 }
 0x812   :  { %1661 = vst [vmem:[%s2991_s4] sm:$0xff] %v1660_v22  ;;  %1783 = vst [vmem:[%s2991_s4 + $0x38] sm:$0xff] %v1662_v23 }
 0x813   :  { %1686 = vsyncpa [#allocation4], 1 }

// kernel: ner_forward.3
= control target key start
LH: loop header
LB: loop body
LE: loop exit
PB: predicated region body
PF: predicated region fallthrough
CT: control target
= control target key end

     0   :  { %12 = vsyncpa [#allocation6], 0  ;;  %s2611_s24 = smov [#allocation5]   ;;  %s3660_s0 = inlined_call_operand.vmem [shape: f32[8,8,128], index: 0, kind: input, shape index: {}]   ;;  %s3661_s1 = inlined_call_operand.vmem [shape: bf16[128,512], index: 1, kind: input, shape index: {}]   ;;  %s3662_s2 = inlined_call_operand.vmem [shape: bf16[128,512], index: 2, kind: input, shape index: {}]   ;;  %s3663_s3 = inlined_call_operand.vmem [shape: f32[1,512], index: 3, kind: input, shape index: {}]   ;;  %s3664_s4 = inlined_call_operand.vmem [shape: bf16[64,128], index: 4, kind: input, shape index: {}]   ;;  %s3665_s5 = inlined_call_operand.hbm [shape: bf16[64,128], index: 5, kind: input, shape index: {}]   ;;  %s3666_s6 = inlined_call_operand.vmem [shape: f32[1,128], index: 6, kind: input, shape index: {}]   ;;  %s3667_s7 = inlined_call_operand.vmem [shape: f32[8,8,128], index: 7, kind: output, shape index: {}]  }
   0x1   :  { %s28_s25 = sshll.u32 %s2611_s24, 4  ;;  %s29_s25 = int_to_ptr.vmem [resolvable:$true] %s28_s25 }
   0x2   :  { %s2597_s26 = scalar_lea.vmem %s29_s25, 512  ;;  %p2602_p1 = scmp.lt.s32.totalorder %s29_s25, %s29_s25 }
   0x3   :  { %p2598_p0 = scmp.ne.s32.totalorder %s29_s25, %s2597_s26  ;;  %p2603_p2 = scmp.lt.s32.totalorder %s2597_s26, %s2597_s26 }
   0x5   :  { %p2604_p3 = por %p2603_p2, %p2602_p1 }
   0x7   :  { %p2605_p4 = pnand %p2604_p3, %p2598_p0 }
   0x9   :  { %2608 = shalt.err (!%p2605_p4)
}
   0xa   :  { %s2612_s27 = smov 64   ;;  %s2613_s28 = smov 4  }
   0xb   :  { %34 = dma.hbm_to_vmem [thread:$0]  %s3665_s5, 512, %s29_s25, [#allocation6], %s2612_s27, %s2612_s27, %s2613_s28  }
   0xc   :  { %2609 = dma.done.wait [#allocation6], 512  }
   0xd   :  { %2610 = vsyncadd [#allocation6], 4294966784  ;;  %v3668_v0 = vmov 0   ;;  %v2325_v1 = vld [vmem:[%s3661_s1 + $0xe4] ss:$16 sps:$4 sm:$0xff]   ;;  %v42_v34 = vld [vmem:[%s3660_s0 + $0x8] sm:$0xff] }
   0xe   :  { %299 = vmatprep.mubr.bf16.mxu0 %v3668_v0  ;;  %372 = vmatprep.mubr.bf16.mxu1 %v3668_v0  ;;  %v2327_v2 = vld [vmem:[%s3661_s1 + $0xec] ss:$16 sps:$4 sm:$0xff]   ;;  %v2329_v3 = vld [vmem:[%s3661_s1 + $0xe0] ss:$16 sps:$4 sm:$0xff]   ;;  %v2330_v4 = vld [vmem:[%s3661_s1 + $0xe8] ss:$16 sps:$4 sm:$0xff]  }
   0xf   :  { %267 = vmatprep.subr.bf16.mxu0 %v2325_v1  ;;  %340 = vmatprep.subr.bf16.mxu1 %v2327_v2  ;;  %v2331_v5 = vld [vmem:[%s3661_s1 + $0xc4] ss:$16 sps:$4 sm:$0xff]   ;;  %v2333_v6 = vld [vmem:[%s3661_s1 + $0xcc] ss:$16 sps:$4 sm:$0xff]   ;;  %v2335_v7 = vld [vmem:[%s3661_s1 + $0xc0] ss:$16 sps:$4 sm:$0xff]  }
  0x10   :  { %268 = vmatpush1.bf16.msra.mxu0 %v2329_v3  ;;  %341 = vmatpush1.bf16.msra.mxu1 %v2330_v4  ;;  %v2336_v8 = vld [vmem:[%s3661_s1 + $0xc8] ss:$16 sps:$4 sm:$0xff]   ;;  %v2337_v9 = vld [vmem:[%s3661_s1 + $0xa4] ss:$16 sps:$4 sm:$0xff]   ;;  %v2339_v10 = vld [vmem:[%s3661_s1 + $0xac] ss:$16 sps:$4 sm:$0xff]  }
  0x11   :  { %269 = vmatprep.subr.bf16.mxu0 %v2331_v5  ;;  %342 = vmatprep.subr.bf16.mxu1 %v2333_v6  ;;  %v2341_v11 = vld [vmem:[%s3661_s1 + $0xa0] ss:$16 sps:$4 sm:$0xff]   ;;  %v2342_v12 = vld [vmem:[%s3661_s1 + $0xa8] ss:$16 sps:$4 sm:$0xff]   ;;  %v2343_v13 = vld [vmem:[%s3661_s1 + $0x84] ss:$16 sps:$4 sm:$0xff]  }
  0x12   :  { %v2345_v14 = vld [vmem:[%s3661_s1 + $0x8c] ss:$16 sps:$4 sm:$0xff]   ;;  %v2347_v15 = vld [vmem:[%s3661_s1 + $0x80] ss:$16 sps:$4 sm:$0xff]   ;;  %v2348_v16 = vld [vmem:[%s3661_s1 + $0x88] ss:$16 sps:$4 sm:$0xff]  }
  0x13   :  { %v2349_v17 = vld [vmem:[%s3661_s1 + $0x64] ss:$16 sps:$4 sm:$0xff]   ;;  %v2351_v18 = vld [vmem:[%s3661_s1 + $0x6c] ss:$16 sps:$4 sm:$0xff]   ;;  %v2353_v19 = vld [vmem:[%s3661_s1 + $0x60] ss:$16 sps:$4 sm:$0xff]  }
  0x14   :  { %270 = vmatpush1.bf16.msra.mxu0 %v2335_v7  ;;  %343 = vmatpush1.bf16.msra.mxu1 %v2336_v8  ;;  %v2354_v20 = vld [vmem:[%s3661_s1 + $0x68] ss:$16 sps:$4 sm:$0xff]   ;;  %v2355_v21 = vld [vmem:[%s3661_s1 + $0x44] ss:$16 sps:$4 sm:$0xff]   ;;  %v2357_v22 = vld [vmem:[%s3661_s1 + $0x4c] ss:$16 sps:$4 sm:$0xff]  }
  0x15   :  { %271 = vmatprep.subr.bf16.mxu0 %v2337_v9  ;;  %344 = vmatprep.subr.bf16.mxu1 %v2339_v10  ;;  %v2359_v23 = vld [vmem:[%s3661_s1 + $0x40] ss:$16 sps:$4 sm:$0xff]   ;;  %v2360_v24 = vld [vmem:[%s3661_s1 + $0x48] ss:$16 sps:$4 sm:$0xff]   ;;  %v2361_v25 = vld [vmem:[%s3661_s1 + $0x24] ss:$16 sps:$4 sm:$0xff]  }
  0x16   :  { %v2363_v26 = vld [vmem:[%s3661_s1 + $0x2c] ss:$16 sps:$4 sm:$0xff]   ;;  %v2365_v27 = vld [vmem:[%s3661_s1 + $0x20] ss:$16 sps:$4 sm:$0xff]   ;;  %v2366_v28 = vld [vmem:[%s3661_s1 + $0x28] ss:$16 sps:$4 sm:$0xff]  }
  0x17   :  { %v2367_v29 = vld [vmem:[%s3661_s1 + $0x4] ss:$16 sps:$4 sm:$0xff]   ;;  %v2369_v30 = vld [vmem:[%s3661_s1 + $0xc] ss:$16 sps:$4 sm:$0xff]   ;;  %v2371_v31 = vld [vmem:[%s3661_s1] ss:$16 sps:$4 sm:$0xff]  }
  0x18   :  { %272 = vmatpush1.bf16.msra.mxu0 %v2341_v11  ;;  %345 = vmatpush1.bf16.msra.mxu1 %v2342_v12  ;;  %v2372_v32 = vld [vmem:[%s3661_s1 + $0x8] ss:$16 sps:$4 sm:$0xff]   ;;  %v41_v33 = vld [vmem:[%s3660_s0] sm:$0xff]  ;;  %v2772_v36 = vld [vmem:[%s3662_s2 + $0xec] ss:$16 sps:$4 sm:$0xff]   ;;  %vm1841_vm6 = vcmask 523264  }
  0x19   :  { %273 = vmatprep.subr.bf16.mxu0 %v2343_v13  ;;  %346 = vmatprep.subr.bf16.mxu1 %v2345_v14  ;;  %v2767_v35 = vld [vmem:[%s3662_s2 + $0xe4] ss:$16 sps:$4 sm:$0xff]   ;;  %3680 = vst [vmem:[#allocation9_spill] sm:$0xff] %v2772_v36  ;;  %v49_v37 = vpack.c.bf16 %v42_v34, %v41_v33  ;;  %v2777_v38 = vld [vmem:[%s3662_s2 + $0xe0] ss:$16 sps:$4 sm:$0xff]   ;;  %v44_v44 = vld [vmem:[%s3660_s0 + $0x18] sm:$0xff]  ;;  %v87_v14 = vlaneseq }
  0x1a   :  { %3679 = vst [vmem:[#allocation8_spill] sm:$0xff] %v2767_v35  ;;  %v2782_v39 = vld [vmem:[%s3662_s2 + $0xe8] ss:$16 sps:$4 sm:$0xff]   ;;  %v2789_v40 = vld [vmem:[%s3662_s2 + $0xc4] ss:$16 sps:$4 sm:$0xff]  }
  0x1b   :  { %v2794_v41 = vld [vmem:[%s3662_s2 + $0xc0] ss:$16 sps:$4 sm:$0xff]   ;;  %v2799_v42 = vld [vmem:[%s3662_s2 + $0xcc] ss:$16 sps:$4 sm:$0xff]   ;;  %v2812_v45 = vld [vmem:[%s3662_s2 + $0xc8] ss:$16 sps:$4 sm:$0xff]  }
  0x1c   :  { %274 = vmatpush1.bf16.msra.mxu0 %v2347_v15  ;;  %347 = vmatpush1.bf16.msra.mxu1 %v2348_v16  ;;  %v43_v43 = vld [vmem:[%s3660_s0 + $0x10] sm:$0xff]  ;;  %v2824_v47 = vld [vmem:[%s3662_s2 + $0xac] ss:$16 sps:$4 sm:$0xff]   ;;  %v2838_v50 = vld [vmem:[%s3662_s2 + $0xa8] ss:$16 sps:$4 sm:$0xff]   ;;  %v88_v15 = vshrl.u32 %v87_v14, 7 }
  0x1d   :  { %275 = vmatprep.subr.bf16.mxu0 %v2349_v17  ;;  %348 = vmatprep.subr.bf16.mxu1 %v2351_v18  ;;  %v2819_v46 = vld [vmem:[%s3662_s2 + $0xa4] ss:$16 sps:$4 sm:$0xff]   ;;  %v50_v48 = vpack.c.bf16 %v44_v44, %v43_v43  ;;  %v2833_v49 = vld [vmem:[%s3662_s2 + $0xa0] ss:$16 sps:$4 sm:$0xff]   ;;  %v2850_v52 = vld [vmem:[%s3662_s2 + $0x8c] ss:$16 sps:$4 sm:$0xff]  }
  0x1e   :  { %v2845_v51 = vld [vmem:[%s3662_s2 + $0x84] ss:$16 sps:$4 sm:$0xff]   ;;  %v2855_v53 = vld [vmem:[%s3662_s2 + $0x80] ss:$16 sps:$4 sm:$0xff]   ;;  %v46_v55 = vld [vmem:[%s3660_s0 + $0x28] sm:$0xff]  ;;  %v97_v16 = vsub.s32 2, %v88_v15 }
  0x1f   :  { %v45_v54 = vld [vmem:[%s3660_s0 + $0x20] sm:$0xff]  ;;  %v2868_v56 = vld [vmem:[%s3662_s2 + $0x88] ss:$16 sps:$4 sm:$0xff]   ;;  %v2880_v58 = vld [vmem:[%s3662_s2 + $0x6c] ss:$16 sps:$4 sm:$0xff]   ;;  %v89_v17 = vsub.s32 0, %v88_v15 }
  0x20   :  { %276 = vmatpush1.bf16.msra.mxu0 %v2353_v19  ;;  %349 = vmatpush1.bf16.msra.mxu1 %v2354_v20  ;;  %v2875_v57 = vld [vmem:[%s3662_s2 + $0x64] ss:$16 sps:$4 sm:$0xff]   ;;  %v2887_v59 = vld [vmem:[%s3662_s2 + $0x60] ss:$16 sps:$4 sm:$0xff]   ;;  %v2892_v60 = vld [vmem:[%s3662_s2 + $0x68] ss:$16 sps:$4 sm:$0xff]   ;;  %v51_v61 = vpack.c.bf16 %v46_v55, %v45_v54 }
  0x21   :  { %277 = vmatprep.subr.bf16.mxu0 %v2355_v21  ;;  %350 = vmatprep.subr.bf16.mxu1 %v2357_v22  ;;  %v2897_v62 = vld [vmem:[%s3662_s2 + $0x44] ss:$16 sps:$4 sm:$0xff]   ;;  %v2904_v63 = vld [vmem:[%s3662_s2 + $0x4c] ss:$16 sps:$4 sm:$0xff]   ;;  %v2911_v1 = vld [vmem:[%s3662_s2 + $0x40] ss:$16 sps:$4 sm:$0xff]  }
  0x22   :  { %v47_v2 = vld [vmem:[%s3660_s0 + $0x30] sm:$0xff]  ;;  %v48_v3 = vld [vmem:[%s3660_s0 + $0x38] sm:$0xff]  ;;  %v101_v18 = vsub.s32 3, %v88_v15  ;;  %v85_v19 = vld [vmem:[%s3663_s3] sm:$0xf] }
  0x23   :  { %v2924_v4 = vld [vmem:[%s3662_s2 + $0x48] ss:$16 sps:$4 sm:$0xff]   ;;  %v2931_v5 = vld [vmem:[%s3662_s2 + $0x24] ss:$16 sps:$4 sm:$0xff]   ;;  %v2936_v6 = vld [vmem:[%s3662_s2 + $0x2c] ss:$16 sps:$4 sm:$0xff]   ;;  %v52_v7 = vpack.c.bf16 %v48_v3, %v47_v2  ;;  %v3027_v22 = vrot.slane %v85_v19, %v97_v16 }
  0x24   :  { %278 = vmatpush1.bf16.msra.mxu0 %v2359_v23  ;;  %351 = vmatpush1.bf16.msra.mxu1 %v2360_v24  ;;  %v2945_v8 = vld [vmem:[%s3662_s2 + $0x20] ss:$16 sps:$4 sm:$0xff]   ;;  %v2950_v9 = vld [vmem:[%s3662_s2 + $0x28] ss:$16 sps:$4 sm:$0xff]   ;;  %v2957_v10 = vld [vmem:[%s3662_s2 + $0x4] ss:$16 sps:$4 sm:$0xff]  }
  0x25   :  { %279 = vmatprep.subr.bf16.mxu0 %v2361_v25  ;;  %352 = vmatprep.subr.bf16.mxu1 %v2363_v26  ;;  %v2962_v11 = vld [vmem:[%s3662_s2 + $0xc] ss:$16 sps:$4 sm:$0xff]   ;;  %v2969_v12 = vld [vmem:[%s3662_s2] ss:$16 sps:$4 sm:$0xff]   ;;  %v2974_v13 = vld [vmem:[%s3662_s2 + $0x8] ss:$16 sps:$4 sm:$0xff]   ;;  %v3033_v26 = vrot.slane %v85_v19, %v89_v17 }
  0x26   :  { %v93_v23 = vsub.s32 1, %v88_v15 }
  0x28   :  { %280 = vmatpush1.bf16.msra.mxu0 %v2365_v27  ;;  %353 = vmatpush1.bf16.msra.mxu1 %v2366_v28  ;;  %v3035_v27 = vrot.slane %v85_v19, %v101_v18 }
  0x29   :  { %281 = vmatprep.subr.bf16.mxu0 %v2367_v29  ;;  %354 = vmatprep.subr.bf16.mxu1 %v2369_v30  ;;  %v558_v30 = vand.u32 127, %v87_v14 }
  0x2b   :  { %v559_v55 = vadd.s32 128, %v558_v30  ;;  %v561_v2 = vadd.s32 384, %v558_v30  ;;  %vm610_vm0 = vcmp.lt.s32.totalorder %v558_v30, 64 }
  0x2c   :  { %282 = vmatpush1.bf16.msra.mxu0 %v2371_v31  ;;  %355 = vmatpush1.bf16.msra.mxu1 %v2372_v32  ;;  %v3037_v31 = vrot.slane %v85_v19, %v93_v23 }
  0x2d   :  { %819 = vmatprep.subr.bf16.mxu0 %v2767_v35  ;;  %860 = vmatprep.subr.bf16.mxu1 %v2772_v36 }
  0x2f   :  { %300 = vmatmul.mubr.bf16.vlgmr.msra.gmra.mxu0 %v49_v37  ;;  %373 = vmatmul.mubr.bf16.vlgmr.msra.gmra.mxu1 %v49_v37 }
  0x30   :  { %820 = vmatpush1.bf16.msra.mxu0 %v2777_v38  ;;  %861 = vmatpush1.bf16.msra.mxu1 %v2782_v39 }
  0x31   :  { %821 = vmatprep.subr.bf16.mxu0 %v2789_v40  ;;  %309 = vmatprep.mubr.bf16.mxu0 %v3668_v0 }
  0x32   :  { %382 = vmatprep.mubr.bf16.mxu1 %v3668_v0  ;;  %862 = vmatprep.subr.bf16.mxu1 %v2799_v42 }
  0x34   :  { %822 = vmatpush1.bf16.msra.mxu0 %v2794_v41  ;;  %863 = vmatpush1.bf16.msra.mxu1 %v2812_v45 }
  0x35   :  { %823 = vmatprep.subr.bf16.mxu0 %v2819_v46  ;;  %864 = vmatprep.subr.bf16.mxu1 %v2824_v47 }
  0x37   :  { %310 = vmatmul.mubr.bf16.gmra.mxu0 %v50_v48  ;;  %383 = vmatmul.mubr.bf16.gmra.mxu1 %v50_v48 }
  0x38   :  { %824 = vmatpush1.bf16.msra.mxu0 %v2833_v49  ;;  %865 = vmatpush1.bf16.msra.mxu1 %v2838_v50 }
  0x39   :  { %825 = vmatprep.subr.bf16.mxu0 %v2845_v51  ;;  %319 = vmatprep.mubr.bf16.mxu0 %v3668_v0 }
  0x3a   :  { %392 = vmatprep.mubr.bf16.mxu1 %v3668_v0  ;;  %866 = vmatprep.subr.bf16.mxu1 %v2850_v52 }
  0x3c   :  { %826 = vmatpush1.bf16.msra.mxu0 %v2855_v53  ;;  %867 = vmatpush1.bf16.msra.mxu1 %v2868_v56 }
  0x3d   :  { %827 = vmatprep.subr.bf16.mxu0 %v2875_v57  ;;  %868 = vmatprep.subr.bf16.mxu1 %v2880_v58 }
  0x3f   :  { %320 = vmatmul.mubr.bf16.gmra.mxu0 %v51_v61  ;;  %393 = vmatmul.mubr.bf16.gmra.mxu1 %v51_v61  ;;  %v560_v61 = vadd.s32 256, %v558_v30 }
  0x40   :  { %828 = vmatpush1.bf16.msra.mxu0 %v2887_v59  ;;  %869 = vmatpush1.bf16.msra.mxu1 %v2892_v60 }
  0x41   :  { %829 = vmatprep.subr.bf16.mxu0 %v2897_v62  ;;  %329 = vmatprep.mubr.bf16.mxu0 %v3668_v0 }
  0x42   :  { %402 = vmatprep.mubr.bf16.mxu1 %v3668_v0  ;;  %870 = vmatprep.subr.bf16.mxu1 %v2904_v63 }
  0x44   :  { %830 = vmatpush1.bf16.msra.mxu0 %v2911_v1  ;;  %871 = vmatpush1.bf16.msra.mxu1 %v2924_v4 }
  0x45   :  { %831 = vmatprep.subr.bf16.mxu0 %v2931_v5  ;;  %872 = vmatprep.subr.bf16.mxu1 %v2936_v6 }
  0x47   :  { %330 = vmatmul.mubr.bf16.gmra.mxu0 %v52_v7  ;;  %403 = vmatmul.mubr.bf16.gmra.mxu1 %v52_v7 }
  0x48   :  { %832 = vmatpush1.bf16.msra.mxu0 %v2945_v8  ;;  %873 = vmatpush1.bf16.msra.mxu1 %v2950_v9 }
  0x49   :  { %833 = vmatprep.subr.bf16.mxu0 %v2957_v10  ;;  %851 = vmatprep.mubr.bf16.mxu0 %v3668_v0 }
  0x4a   :  { %874 = vmatprep.subr.bf16.mxu1 %v2962_v11  ;;  %892 = vmatprep.mubr.bf16.mxu1 %v3668_v0 }
  0x4c   :  { %834 = vmatpush1.bf16.msra.mxu0 %v2969_v12  ;;  %875 = vmatpush1.bf16.msra.mxu1 %v2974_v13 }
  0x4d   :  { %943 = vmatprep.subr.bf16.mxu0 %v2767_v35  ;;  %984 = vmatprep.subr.bf16.mxu1 %v2772_v36 }
  0x4f   :  { %852 = vmatmul.mubr.bf16.vlgmr.msra.gmra.mxu0 %v3668_v0  ;;  %893 = vmatmul.mubr.bf16.vlgmr.msra.gmra.mxu1 %v3668_v0 }
  0x50   :  { %944 = vmatpush1.bf16.msra.mxu0 %v2777_v38  ;;  %985 = vmatpush1.bf16.msra.mxu1 %v2782_v39 }
  0x51   :  { %945 = vmatprep.subr.bf16.mxu0 %v2789_v40  ;;  %986 = vmatprep.subr.bf16.mxu1 %v2799_v42 }
  0x52   :  { %975 = vmatprep.mubr.bf16.mxu0 %v3668_v0  ;;  %1016 = vmatprep.mubr.bf16.mxu1 %v3668_v0 }
  0x54   :  { %946 = vmatpush1.bf16.msra.mxu0 %v2794_v41  ;;  %987 = vmatpush1.bf16.msra.mxu1 %v2812_v45 }
  0x55   :  { %947 = vmatprep.subr.bf16.mxu0 %v2819_v46  ;;  %988 = vmatprep.subr.bf16.mxu1 %v2824_v47 }
  0x58   :  { %948 = vmatpush1.bf16.msra.mxu0 %v2833_v49  ;;  %989 = vmatpush1.bf16.msra.mxu1 %v2838_v50 }
  0x59   :  { %949 = vmatprep.subr.bf16.mxu0 %v2845_v51  ;;  %990 = vmatprep.subr.bf16.mxu1 %v2850_v52 }
  0x5c   :  { %950 = vmatpush1.bf16.msra.mxu0 %v2855_v53  ;;  %991 = vmatpush1.bf16.msra.mxu1 %v2868_v56 }
  0x5d   :  { %951 = vmatprep.subr.bf16.mxu0 %v2875_v57  ;;  %992 = vmatprep.subr.bf16.mxu1 %v2880_v58 }
  0x60   :  { %952 = vmatpush1.bf16.msra.mxu0 %v2887_v59  ;;  %993 = vmatpush1.bf16.msra.mxu1 %v2892_v60 }
  0x61   :  { %953 = vmatprep.subr.bf16.mxu0 %v2897_v62  ;;  %994 = vmatprep.subr.bf16.mxu1 %v2904_v63 }
  0x64   :  { %954 = vmatpush1.bf16.msra.mxu0 %v2911_v1  ;;  %995 = vmatpush1.bf16.msra.mxu1 %v2924_v4 }
  0x65   :  { %955 = vmatprep.subr.bf16.mxu0 %v2931_v5  ;;  %996 = vmatprep.subr.bf16.mxu1 %v2936_v6 }
  0x68   :  { %956 = vmatpush1.bf16.msra.mxu0 %v2945_v8  ;;  %997 = vmatpush1.bf16.msra.mxu1 %v2950_v9 }
  0x69   :  { %957 = vmatprep.subr.bf16.mxu0 %v2957_v10  ;;  %998 = vmatprep.subr.bf16.mxu1 %v2962_v11 }
  0x6c   :  { %958 = vmatpush1.bf16.msra.mxu0 %v2969_v12  ;;  %999 = vmatpush1.bf16.msra.mxu1 %v2974_v13 }
  0x6d   :  { %1068 = vmatprep.subr.bf16.mxu0 %v2767_v35  ;;  %1109 = vmatprep.subr.bf16.mxu1 %v2772_v36 }
  0xef   :  { %v3023_v20 = vpop.f32.mrf.mxu0  ;;  %v3025_v21 = vpop.f32.mrf.mxu1 }
  0xf1   :  { %v3029_v24 = vpop.f32.mrf.mxu0  ;;  %v3031_v25 = vpop.f32.mrf.mxu1 }
  0xf3   :  { %v305_v28 = vpop.f32.mrf.mxu0  ;;  %v378_v29 = vpop.f32.mrf.mxu1 }
  0xf4   :  { %v306_v32 = vadd.f32 %v305_v28, %v3033_v26  ;;  %v379_v33 = vadd.f32 %v378_v29, %v3027_v22  ;;  %v573_v29 = vand.u32 127, %v559_v55 }
  0xf5   :  { %v307_v34 = vpop.f32.mrf.mxu0  ;;  %v380_v37 = vpop.f32.mrf.mxu1 }
  0xf6   :  { %v308_v43 = vadd.f32 %v307_v34, %v3037_v31  ;;  %v381_v44 = vadd.f32 %v380_v37, %v3035_v27  ;;  %v580_v34 = vand.u32 127, %v560_v61  ;;  %v587_v37 = vand.u32 127, %v561_v2 }
  0xf7   :  { %v311_v48 = vpop.f32.mrf.mxu0  ;;  %v384_v54 = vpop.f32.mrf.mxu1  ;;  %vm611_vm1 = vcmp.lt.s32.totalorder %v573_v29, 64 }
  0xf8   :  { %v3043_v3 = vpack.c.bf16 %v308_v43, %v306_v32  ;;  %v3045_v7 = vpack.c.bf16 %v381_v44, %v379_v33  ;;  %v312_v14 = vadd.f32 %v311_v48, %v3033_v26  ;;  %v385_v15 = vadd.f32 %v384_v54, %v3027_v22  ;;  %vm3063_vm4 = vmpackc.low %vm611_vm1, %vm610_vm0 }
  0xf9   :  { %v313_v16 = vpop.f32.mrf.mxu0  ;;  %v386_v17 = vpop.f32.mrf.mxu1  ;;  %vm612_vm2 = vcmp.lt.s32.totalorder %v580_v34, 64  ;;  %vm613_vm3 = vcmp.lt.s32.totalorder %v587_v37, 64 }
  0xfa   :  { %v314_v18 = vadd.f32 %v313_v16, %v3037_v31  ;;  %v387_v19 = vadd.f32 %v386_v17, %v3035_v27  ;;  %vm3067_vm5 = vmpackc.low %vm613_vm3, %vm612_vm2 }
  0xfb   :  { %v315_v23 = vpop.f32.mrf.mxu0  ;;  %v388_v28 = vpop.f32.mrf.mxu1 }
  0xfc   :  { %v3051_v0 = vpack.c.bf16 %v314_v18, %v312_v14  ;;  %v3053_v32 = vpack.c.bf16 %v387_v19, %v385_v15  ;;  %v316_v33 = vadd.f32 %v315_v23, %v3033_v26  ;;  %v389_v43 = vadd.f32 %v388_v28, %v3027_v22 }
  0xfd   :  { %v317_v44 = vpop.f32.mrf.mxu0  ;;  %v390_v48 = vpop.f32.mrf.mxu1 }
  0xfe   :  { %v318_v54 = vadd.f32 %v317_v44, %v3037_v31  ;;  %v391_v16 = vadd.f32 %v390_v48, %v3035_v27 }
  0xff   :  { %v321_v17 = vpop.f32.mrf.mxu0  ;;  %v394_v36 = vpop.f32.mrf.mxu1 }
 0x100   :  { %v2263_v55 = vpack.c.bf16 %v318_v54, %v316_v33  ;;  %v2264_v61 = vpack.c.bf16 %v391_v16, %v389_v43  ;;  %v322_v2 = vadd.f32 %v321_v17, %v3033_v26  ;;  %v395_v14 = vadd.f32 %v394_v36, %v3027_v22 }
 0x101   :  { %v323_v15 = vpop.f32.mrf.mxu0  ;;  %v396_v18 = vpop.f32.mrf.mxu1 }
 0x102   :  { %v324_v19 = vadd.f32 %v323_v15, %v3037_v31  ;;  %v397_v23 = vadd.f32 %v396_v18, %v3035_v27 }
 0x103   :  { %v325_v30 = vpop.f32.mrf.mxu0  ;;  %v398_v29 = vpop.f32.mrf.mxu1 }
 0x104   :  { %v2265_v37 = vpack.c.bf16 %v324_v19, %v322_v2  ;;  %v2266_v33 = vpack.c.bf16 %v397_v23, %v395_v14  ;;  %v326_v36 = vadd.f32 %v325_v30, %v3033_v26  ;;  %v399_v43 = vadd.f32 %v398_v29, %v3027_v22 }
 0x105   :  { %v327_v44 = vpop.f32.mrf.mxu0  ;;  %v400_v48 = vpop.f32.mrf.mxu1 }
 0x106   :  { %v328_v54 = vadd.f32 %v327_v44, %v3037_v31  ;;  %v401_v16 = vadd.f32 %v400_v48, %v3035_v27  ;;  %v3077_v17 = vsel %vm3063_vm4, %v2263_v55, %v2265_v37  ;;  %v3081_v15 = vsel %vm3067_vm5, %v2264_v61, %v2266_v33 }
 0x107   :  { %3685 = vst [vmem:[#allocation10_spill] sm:$0xff] %v3077_v17  ;;  %3686 = vst [vmem:[#allocation11_spill] sm:$0xff] %v3081_v15  ;;  %v331_v2 = vpop.f32.mrf.mxu0  ;;  %v404_v14 = vpop.f32.mrf.mxu1  ;;  %v3087_v48 = vsel %vm3063_vm4, %v2265_v37, %v2263_v55  ;;  %v3091_v17 = vsel %vm3067_vm5, %v2266_v33, %v2264_v61  ;;  %v304_v61 = vadd.f32 %v3029_v24, %v3037_v31 }
 0x108   :  { %v2267_v18 = vpack.c.bf16 %v328_v54, %v326_v36  ;;  %v2268_v19 = vpack.c.bf16 %v401_v16, %v399_v43  ;;  %v332_v23 = vadd.f32 %v331_v2, %v3033_v26  ;;  %v405_v30 = vadd.f32 %v404_v14, %v3027_v22  ;;  %3687 = vst [vmem:[#allocation12_spill] sm:$0xff] %v3087_v48 }
 0x109   :  { %v333_v29 = vpop.f32.mrf.mxu0  ;;  %v406_v44 = vpop.f32.mrf.mxu1  ;;  %3688 = vst [vmem:[#allocation13_spill] sm:$0xff] %v3091_v17  ;;  %v302_v16 = vadd.f32 %v3023_v20, %v3033_v26  ;;  %v375_v20 = vadd.f32 %v3025_v21, %v3027_v22  ;;  %v377_v24 = vadd.f32 %v3031_v25, %v3035_v27 }
 0x10a   :  { %v334_v15 = vadd.f32 %v333_v29, %v3037_v31  ;;  %v407_v35 = vadd.f32 %v406_v44, %v3035_v27  ;;  %v3098_v36 = vsel %vm3063_vm4, %v3051_v0, %v2267_v18  ;;  %v3103_v43 = vsel %vm3067_vm5, %v3053_v32, %v2268_v19 }
 0x10b   :  { %3689 = vst [vmem:[#allocation14_spill] sm:$0xff] %v3103_v43  ;;  %v335_v55 = vpop.f32.mrf.mxu0  ;;  %v408_v37 = vpop.f32.mrf.mxu1 }
 0x10c   :  { %v2269_v33 = vpack.c.bf16 %v334_v15, %v332_v23  ;;  %v2270_v54 = vpack.c.bf16 %v407_v35, %v405_v30  ;;  %v336_v2 = vadd.f32 %v335_v55, %v3033_v26  ;;  %v409_v14 = vadd.f32 %v408_v37, %v3027_v22 }
 0x10d   :  { %v337_v29 = vpop.f32.mrf.mxu0  ;;  %v410_v44 = vpop.f32.mrf.mxu1  ;;  %v2257_v15 = vpack.c.bf16 %v304_v61, %v302_v16  ;;  %v3130_v30 = vsel %vm3063_vm4, %v2267_v18, %v3051_v0  ;;  %v3135_v55 = vsel %vm3067_vm5, %v2268_v19, %v3053_v32  ;;  %v2258_v19 = vpack.c.bf16 %v377_v24, %v375_v20 }
 0x10e   :  { %v338_v17 = vadd.f32 %v337_v29, %v3037_v31  ;;  %v411_v48 = vadd.f32 %v410_v44, %v3035_v27  ;;  %v3116_v43 = vsel %vm3063_vm4, %v3043_v3, %v2269_v33  ;;  %v3121_v35 = vsel %vm3067_vm5, %v3045_v7, %v2270_v54 }
 0x10f   :  { %v853_v26 = vpop.f32.mrf.mxu0  ;;  %v894_v31 = vpop.f32.mrf.mxu1  ;;  %v3142_v25 = vsel %vm3063_vm4, %v2269_v33, %v3043_v3  ;;  %v3147_v0 = vsel %vm3067_vm5, %v2270_v54, %v3045_v7 }
 0x110   :  { %v2271_v23 = vpack.c.bf16 %v338_v17, %v336_v2  ;;  %v2272_v21 = vpack.c.bf16 %v411_v48, %v409_v14 }
 0x111   :  { %v855_v37 = vpop.f32.mrf.mxu0  ;;  %v896_v29 = vpop.f32.mrf.mxu1 }
 0x112   :  { %v653_v22 = vsel %vm3063_vm4, %v2257_v15, %v2271_v23  ;;  %v3151_v14 = vsel %vm3063_vm4, %v2271_v23, %v2257_v15  ;;  %v3155_v3 = vsel %vm3067_vm5, %v2272_v21, %v2258_v19  ;;  %v654_v54 = vsel %vm3067_vm5, %v2258_v19, %v2272_v21 }
 0x113   :  { %v655_v27 = vunpack.c.l.bf16 %v653_v22  ;;  %v656_v17 = vunpack.c.h.bf16 %v653_v22  ;;  %v857_v32 = vpop.f32.mrf.mxu0  ;;  %v898_v18 = vpop.f32.mrf.mxu1  ;;  %v657_v44 = vunpack.c.l.bf16 %v654_v54  ;;  %v658_v24 = vunpack.c.h.bf16 %v654_v54 }
 0x114   :  { %v938_v54 = vunpack.c.l.bf16 %v3116_v43 }
 0x115   :  { %v901_v61 = vadd.f32 %v853_v26, %v655_v27  ;;  %v902_v48 = vadd.f32 %v855_v37, %v656_v17  ;;  %v858_v16 = vpop.f32.mrf.mxu0  ;;  %v899_v2 = vpop.f32.mrf.mxu1  ;;  %v903_v20 = vadd.f32 %v894_v31, %v657_v44  ;;  %v904_v37 = vadd.f32 %v896_v29, %v658_v24 }
 0x116   :  { %v3690_v2 = vmov 0  }
 0x117   :  { %v2202_v33 = vmul.f32 -1.442695, %v901_v61  ;;  %v2203_v7 = vmul.f32 -1.442695, %v902_v48  ;;  %v2204_v26 = vmul.f32 -1.442695, %v903_v20 }
 0x119   :  { %2429 = vpow2.f32 %v2202_v33  ;;  %v3691_v33 = vld [vmem:[#allocation8_spill] sm:$0xff] }
 0x11a   :  { %2431 = vpow2.f32 %v2203_v7  ;;  %v3692_v7 = vld [vmem:[#allocation9_spill] sm:$0xff] }
 0x11b   :  { %2433 = vpow2.f32 %v2204_v26  ;;  %v939_v26 = vunpack.c.h.bf16 %v3116_v43 }
 0x11c   :  { %2435 = vtanh.f32 %v904_v37 }
 0x126   :  { %v2430_v22 = vpop.eup %2429 }
 0x127   :  { %v2432_v28 = vpop.eup %2431  ;;  %v914_v15 = vadd.f32 1.0, %v2430_v22 }
 0x128   :  { %v915_v23 = vadd.f32 1.0, %v2432_v28  ;;  %v2434_v27 = vpop.eup %2433 }
 0x129   :  { %2437 = vrcp.f32 %v914_v15  ;;  %v2436_v17 = vpop.eup %2435  ;;  %v916_v21 = vadd.f32 1.0, %v2434_v27 }
 0x12a   :  { %2439 = vrcp.f32 %v915_v23 }
 0x12b   :  { %2441 = vrcp.f32 %v916_v21  ;;  %v940_v21 = vunpack.c.l.bf16 %v3121_v35 }
 0x136   :  { %v2438_v32 = vpop.eup %2437 }
 0x137   :  { %v2440_v34 = vpop.eup %2439  ;;  %v925_v18 = vmul.f32 %v2438_v32, %v2436_v17 }
 0x138   :  { %v924_v19 = vmul.f32 0.0, %v2440_v34  ;;  %v2442_v31 = vpop.eup %2441 }
 0x13a   :  { %v3159_v61 = vadd.f32 %v925_v18, %v924_v19  ;;  %v941_v19 = vunpack.c.h.bf16 %v3121_v35 }
 0x13c   :  { %2443 = vtanh.f32 %v3159_v61 }
 0x149   :  { %v2444_v29 = vpop.eup %2443 }
 0x14a   :  { %v3162_v48 = vmul.f32 %v2444_v29, %v2442_v31 }
 0x14c   :  { %v942_v16 = vpack.c.bf16 %v3162_v48, %v3162_v48 }
 0x14e   :  { %976 = vmatmul.mubr.bf16.vlgmr.msra.gmra.mxu0 %v942_v16  ;;  %1017 = vmatmul.mubr.bf16.vlgmr.msra.gmra.mxu1 %v942_v16 }
 0x14f   :  { %1069 = vmatpush1.bf16.msra.mxu0 %v2777_v38  ;;  %1110 = vmatpush1.bf16.msra.mxu1 %v2782_v39 }
 0x150   :  { %1070 = vmatprep.subr.bf16.mxu0 %v2789_v40  ;;  %1111 = vmatprep.subr.bf16.mxu1 %v2799_v42 }
 0x151   :  { %1100 = vmatprep.mubr.bf16.mxu0 %v3690_v2  ;;  %1141 = vmatprep.mubr.bf16.mxu1 %v3690_v2 }
 0x153   :  { %1071 = vmatpush1.bf16.msra.mxu0 %v2794_v41  ;;  %1112 = vmatpush1.bf16.msra.mxu1 %v2812_v45 }
 0x154   :  { %1072 = vmatprep.subr.bf16.mxu0 %v2819_v46  ;;  %1113 = vmatprep.subr.bf16.mxu1 %v2824_v47 }
 0x157   :  { %1073 = vmatpush1.bf16.msra.mxu0 %v2833_v49  ;;  %1114 = vmatpush1.bf16.msra.mxu1 %v2838_v50 }
 0x158   :  { %1074 = vmatprep.subr.bf16.mxu0 %v2845_v51  ;;  %1115 = vmatprep.subr.bf16.mxu1 %v2850_v52 }
 0x15b   :  { %1075 = vmatpush1.bf16.msra.mxu0 %v2855_v53  ;;  %1116 = vmatpush1.bf16.msra.mxu1 %v2868_v56 }
 0x15c   :  { %1076 = vmatprep.subr.bf16.mxu0 %v2875_v57  ;;  %1117 = vmatprep.subr.bf16.mxu1 %v2880_v58 }
 0x15f   :  { %1077 = vmatpush1.bf16.msra.mxu0 %v2887_v59  ;;  %1118 = vmatpush1.bf16.msra.mxu1 %v2892_v60 }
 0x160   :  { %1078 = vmatprep.subr.bf16.mxu0 %v2897_v62  ;;  %1119 = vmatprep.subr.bf16.mxu1 %v2904_v63 }
 0x163   :  { %1079 = vmatpush1.bf16.msra.mxu0 %v2911_v1  ;;  %1120 = vmatpush1.bf16.msra.mxu1 %v2924_v4 }
 0x164   :  { %1080 = vmatprep.subr.bf16.mxu0 %v2931_v5  ;;  %1121 = vmatprep.subr.bf16.mxu1 %v2936_v6 }
 0x167   :  { %1081 = vmatpush1.bf16.msra.mxu0 %v2945_v8  ;;  %1122 = vmatpush1.bf16.msra.mxu1 %v2950_v9 }
 0x168   :  { %1082 = vmatprep.subr.bf16.mxu0 %v2957_v10  ;;  %1123 = vmatprep.subr.bf16.mxu1 %v2962_v11 }
 0x16b   :  { %1083 = vmatpush1.bf16.msra.mxu0 %v2969_v12  ;;  %1124 = vmatpush1.bf16.msra.mxu1 %v2974_v13 }
 0x16c   :  { %1193 = vmatprep.subr.bf16.mxu0 %v3691_v33  ;;  %1234 = vmatprep.subr.bf16.mxu1 %v3692_v7 }
 0x20e   :  { %v977_v44 = vpop.f32.mrf.mxu0  ;;  %v1018_v20 = vpop.f32.mrf.mxu1 }
 0x20f   :  { %v1025_v24 = vadd.f32 %v977_v44, %v938_v54  ;;  %v1027_v18 = vadd.f32 %v1018_v20, %v940_v21 }
 0x210   :  { %v979_v37 = vpop.f32.mrf.mxu0  ;;  %v1020_v22 = vpop.f32.mrf.mxu1 }
 0x211   :  { %v2205_v28 = vmul.f32 -1.442695, %v1025_v24  ;;  %v1026_v15 = vadd.f32 %v979_v37, %v939_v26  ;;  %v2207_v31 = vmul.f32 -1.442695, %v1027_v18  ;;  %v1028_v29 = vadd.f32 %v1020_v22, %v941_v19 }
 0x212   :  { %v981_v23 = vpop.f32.mrf.mxu0  ;;  %v1022_v27 = vpop.f32.mrf.mxu1  ;;  %v1064_v19 = vunpack.c.h.bf16 %v3098_v36 }
 0x213   :  { %2445 = vpow2.f32 %v2205_v28  ;;  %v2206_v17 = vmul.f32 -1.442695, %v1026_v15 }
 0x214   :  { %v982_v32 = vpop.f32.mrf.mxu0  ;;  %v1023_v34 = vpop.f32.mrf.mxu1 }
 0x215   :  { %2447 = vpow2.f32 %v2206_v17 }
 0x216   :  { %2449 = vpow2.f32 %v2207_v31 }
 0x217   :  { %2451 = vtanh.f32 %v1028_v29 }
 0x220   :  { %v2446_v16 = vpop.eup %2445 }
 0x221   :  { %v1038_v43 = vadd.f32 1.0, %v2446_v16 }
 0x222   :  { %v2448_v54 = vpop.eup %2447 }
 0x223   :  { %2453 = vrcp.f32 %v1038_v43  ;;  %v1039_v44 = vadd.f32 1.0, %v2448_v54  ;;  %v2450_v24 = vpop.eup %2449 }
 0x224   :  { %v2452_v26 = vpop.eup %2451  ;;  %v1040_v23 = vadd.f32 1.0, %v2450_v24 }
 0x225   :  { %2455 = vrcp.f32 %v1039_v44 }
 0x226   :  { %2457 = vrcp.f32 %v1040_v23 }
 0x230   :  { %v2454_v37 = vpop.eup %2453 }
 0x231   :  { %v1049_v28 = vmul.f32 %v2454_v37, %v2452_v26  ;;  %v3693_v37 = vld [vmem:[#allocation14_spill] sm:$0xff] }
 0x232   :  { %v2456_v15 = vpop.eup %2455 }
 0x233   :  { %v1048_v20 = vmul.f32 %v2456_v15, %v3159_v61  ;;  %v2458_v35 = vpop.eup %2457  ;;  %v1063_v61 = vunpack.c.l.bf16 %v3098_v36  ;;  %v1066_v15 = vunpack.c.h.bf16 %v3693_v37 }
 0x235   :  { %v3205_v27 = vadd.f32 %v1049_v28, %v1048_v20 }
 0x237   :  { %2459 = vtanh.f32 %v3205_v27 }
 0x244   :  { %v2460_v22 = vpop.eup %2459 }
 0x245   :  { %v1052_v17 = vmul.f32 %v2460_v22, %v2458_v35 }
 0x247   :  { %v3209_v32 = vpack.c.bf16 %v1052_v17, %v3162_v48  ;;  %v1067_v34 = vpack.c.bf16 %v1052_v17, %v1052_v17 }
 0x249   :  { %1931 = vrot.lane.b32.xlu0 %v3209_v32, %s2612_s27  ;;  %1101 = vmatmul.mubr.bf16.vlgmr.msra.gmra.mxu0 %v1067_v34 }
 0x24a   :  { %1142 = vmatmul.mubr.bf16.vlgmr.msra.gmra.mxu1 %v1067_v34  ;;  %1194 = vmatpush1.bf16.msra.mxu0 %v2777_v38 }
 0x24b   :  { %1235 = vmatpush1.bf16.msra.mxu1 %v2782_v39  ;;  %1195 = vmatprep.subr.bf16.mxu0 %v2789_v40 }
 0x24c   :  { %1236 = vmatprep.subr.bf16.mxu1 %v2799_v42  ;;  %1225 = vmatprep.mubr.bf16.mxu0 %v3690_v2 }
 0x24d   :  { %1266 = vmatprep.mubr.bf16.mxu1 %v3690_v2 }
 0x24e   :  { %1196 = vmatpush1.bf16.msra.mxu0 %v2794_v41 }
 0x24f   :  { %1237 = vmatpush1.bf16.msra.mxu1 %v2812_v45  ;;  %1197 = vmatprep.subr.bf16.mxu0 %v2819_v46 }
 0x250   :  { %1238 = vmatprep.subr.bf16.mxu1 %v2824_v47 }
 0x252   :  { %1198 = vmatpush1.bf16.msra.mxu0 %v2833_v49 }
 0x253   :  { %1239 = vmatpush1.bf16.msra.mxu1 %v2838_v50  ;;  %1199 = vmatprep.subr.bf16.mxu0 %v2845_v51 }
 0x254   :  { %1240 = vmatprep.subr.bf16.mxu1 %v2850_v52 }
 0x256   :  { %1200 = vmatpush1.bf16.msra.mxu0 %v2855_v53 }
 0x257   :  { %1241 = vmatpush1.bf16.msra.mxu1 %v2868_v56  ;;  %1201 = vmatprep.subr.bf16.mxu0 %v2875_v57 }
 0x258   :  { %1242 = vmatprep.subr.bf16.mxu1 %v2880_v58 }
 0x25a   :  { %1202 = vmatpush1.bf16.msra.mxu0 %v2887_v59 }
 0x25b   :  { %1243 = vmatpush1.bf16.msra.mxu1 %v2892_v60  ;;  %1203 = vmatprep.subr.bf16.mxu0 %v2897_v62 }
 0x25c   :  { %1244 = vmatprep.subr.bf16.mxu1 %v2904_v63 }
 0x25e   :  { %1204 = vmatpush1.bf16.msra.mxu0 %v2911_v1 }
 0x25f   :  { %1245 = vmatpush1.bf16.msra.mxu1 %v2924_v4  ;;  %1205 = vmatprep.subr.bf16.mxu0 %v2931_v5 }
 0x260   :  { %1246 = vmatprep.subr.bf16.mxu1 %v2936_v6 }
 0x262   :  { %1206 = vmatpush1.bf16.msra.mxu0 %v2945_v8 }
 0x263   :  { %1247 = vmatpush1.bf16.msra.mxu1 %v2950_v9  ;;  %1207 = vmatprep.subr.bf16.mxu0 %v2957_v10 }
 0x264   :  { %1248 = vmatprep.subr.bf16.mxu1 %v2962_v11 }
 0x266   :  { %1208 = vmatpush1.bf16.msra.mxu0 %v2969_v12 }
 0x267   :  { %1249 = vmatpush1.bf16.msra.mxu1 %v2974_v13  ;;  %1316 = vmatprep.subr.bf16.mxu0 %v3691_v33 }
 0x268   :  { %1357 = vmatprep.subr.bf16.mxu1 %v3692_v7  ;;  %v1065_v7 = vunpack.c.l.bf16 %v3693_v37 }
 0x309   :  { %v1102_v48 = vpop.f32.mrf.mxu0 }
 0x30a   :  { %v1150_v21 = vadd.f32 %v1102_v48, %v1063_v61  ;;  %v1143_v18 = vpop.f32.mrf.mxu1 }
 0x30b   :  { %v1104_v31 = vpop.f32.mrf.mxu0  ;;  %v1152_v28 = vadd.f32 %v1143_v18, %v1065_v7 }
 0x30c   :  { %v2208_v29 = vmul.f32 -1.442695, %v1150_v21  ;;  %v1151_v16 = vadd.f32 %v1104_v31, %v1064_v19  ;;  %v1145_v43 = vpop.f32.mrf.mxu1 }
 0x30d   :  { %v1106_v54 = vpop.f32.mrf.mxu0  ;;  %v2210_v23 = vmul.f32 -1.442695, %v1152_v28  ;;  %v1153_v20 = vadd.f32 %v1145_v43, %v1066_v15 }
 0x30e   :  { %2461 = vpow2.f32 %v2208_v29  ;;  %v2209_v44 = vmul.f32 -1.442695, %v1151_v16  ;;  %v1147_v24 = vpop.f32.mrf.mxu1 }
 0x30f   :  { %v1107_v26 = vpop.f32.mrf.mxu0 }
 0x310   :  { %2463 = vpow2.f32 %v2209_v44  ;;  %v1148_v33 = vpop.f32.mrf.mxu1 }
 0x311   :  { %2465 = vpow2.f32 %v2210_v23 }
 0x312   :  { %2467 = vtanh.f32 %v1153_v20 }
 0x31b   :  { %v2462_v35 = vpop.eup %2461 }
 0x31c   :  { %v1163_v36 = vadd.f32 1.0, %v2462_v35 }
 0x31d   :  { %v2464_v22 = vpop.eup %2463 }
 0x31e   :  { %2469 = vrcp.f32 %v1163_v36  ;;  %v1164_v17 = vadd.f32 1.0, %v2464_v22  ;;  %v2466_v34 = vpop.eup %2465 }
 0x31f   :  { %v2468_v61 = vpop.eup %2467  ;;  %v1165_v31 = vadd.f32 1.0, %v2466_v34 }
 0x320   :  { %2471 = vrcp.f32 %v1164_v17 }
 0x321   :  { %2473 = vrcp.f32 %v1165_v31 }
 0x32b   :  { %v2470_v48 = vpop.eup %2469 }
 0x32c   :  { %v1174_v21 = vmul.f32 %v2470_v48, %v2468_v61 }
 0x32d   :  { %v2472_v19 = vpop.eup %2471 }
 0x32e   :  { %v1173_v18 = vmul.f32 %v2472_v19, %v3205_v27  ;;  %v2474_v16 = vpop.eup %2473 }
 0x330   :  { %v3252_v29 = vadd.f32 %v1174_v21, %v1173_v18  ;;  %v3319_v18 = vld [vmem:[%s3662_s2 + $0xe0] ss:$16 sps:$4 sm:$0xff]  }
 0x332   :  { %2475 = vtanh.f32 %v3252_v29 }
 0x33f   :  { %v2476_v43 = vpop.eup %2475 }
 0x340   :  { %v3255_v54 = vmul.f32 %v2476_v43, %v2474_v16  ;;  %v3331_v16 = vld [vmem:[%s3662_s2 + $0xc4] ss:$16 sps:$4 sm:$0xff]   ;;  %v3337_v43 = vld [vmem:[%s3662_s2 + $0xcc] ss:$16 sps:$4 sm:$0xff]  }
 0x342   :  { %v1192_v44 = vpack.c.bf16 %v3255_v54, %v3255_v54 }
 0x344   :  { %1226 = vmatmul.mubr.bf16.vlgmr.msra.gmra.mxu0 %v1192_v44  ;;  %1267 = vmatmul.mubr.bf16.vlgmr.msra.gmra.mxu1 %v1192_v44  ;;  %v3351_v44 = vld [vmem:[%s3662_s2 + $0xc8] ss:$16 sps:$4 sm:$0xff]  }
 0x345   :  { %1317 = vmatpush1.bf16.msra.mxu0 %v2777_v38  ;;  %1358 = vmatpush1.bf16.msra.mxu1 %v2782_v39  ;;  %v3294_v38 = vld [vmem:[%s3662_s2 + $0xe4] ss:$16 sps:$4 sm:$0xff]   ;;  %v3300_v39 = vld [vmem:[%s3662_s2 + $0xec] ss:$16 sps:$4 sm:$0xff]  }
 0x346   :  { %1318 = vmatprep.subr.bf16.mxu0 %v2789_v40  ;;  %1359 = vmatprep.subr.bf16.mxu1 %v2799_v42  ;;  %v3694_v40 = vld [vmem:[#allocation10_spill] sm:$0xff] }
 0x347   :  { %1348 = vmatprep.mubr.bf16.mxu0 %v3690_v2  ;;  %1389 = vmatprep.mubr.bf16.mxu1 %v3690_v2 }
 0x349   :  { %1319 = vmatpush1.bf16.msra.mxu0 %v2794_v41  ;;  %1360 = vmatpush1.bf16.msra.mxu1 %v2812_v45  ;;  %v1188_v41 = vunpack.c.l.bf16 %v3694_v40 }
 0x34a   :  { %1320 = vmatprep.subr.bf16.mxu0 %v2819_v46  ;;  %1361 = vmatprep.subr.bf16.mxu1 %v2824_v47  ;;  %v1189_v47 = vunpack.c.h.bf16 %v3694_v40  ;;  %v3357_v40 = vld [vmem:[%s3662_s2 + $0xa4] ss:$16 sps:$4 sm:$0xff]  }
 0x34d   :  { %1321 = vmatpush1.bf16.msra.mxu0 %v2833_v49  ;;  %1362 = vmatpush1.bf16.msra.mxu1 %v2838_v50 }
 0x34e   :  { %1322 = vmatprep.subr.bf16.mxu0 %v2845_v51  ;;  %1363 = vmatprep.subr.bf16.mxu1 %v2850_v52 }
 0x351   :  { %1323 = vmatpush1.bf16.msra.mxu0 %v2855_v53  ;;  %1364 = vmatpush1.bf16.msra.mxu1 %v2868_v56 }
 0x352   :  { %1324 = vmatprep.subr.bf16.mxu0 %v2875_v57  ;;  %1365 = vmatprep.subr.bf16.mxu1 %v2880_v58 }
 0x355   :  { %1325 = vmatpush1.bf16.msra.mxu0 %v2887_v59  ;;  %1366 = vmatpush1.bf16.msra.mxu1 %v2892_v60  ;;  %v3695_v60 = vld [vmem:[#allocation11_spill] sm:$0xff] }
 0x356   :  { %1326 = vmatprep.subr.bf16.mxu0 %v2897_v62  ;;  %1367 = vmatprep.subr.bf16.mxu1 %v2904_v63  ;;  %v1190_v62 = vunpack.c.l.bf16 %v3695_v60  ;;  %v1191_v27 = vunpack.c.h.bf16 %v3695_v60 }
 0x359   :  { %1327 = vmatpush1.bf16.msra.mxu0 %v2911_v1  ;;  %1368 = vmatpush1.bf16.msra.mxu1 %v2924_v4 }
 0x35a   :  { %1328 = vmatprep.subr.bf16.mxu0 %v2931_v5  ;;  %1369 = vmatprep.subr.bf16.mxu1 %v2936_v6 }
 0x35d   :  { %1329 = vmatpush1.bf16.msra.mxu0 %v2945_v8  ;;  %1370 = vmatpush1.bf16.msra.mxu1 %v2950_v9 }
 0x35e   :  { %1330 = vmatprep.subr.bf16.mxu0 %v2957_v10  ;;  %1371 = vmatprep.subr.bf16.mxu1 %v2962_v11 }
 0x361   :  { %1331 = vmatpush1.bf16.msra.mxu0 %v2969_v12  ;;  %1372 = vmatpush1.bf16.msra.mxu1 %v2974_v13 }
 0x362   :  { %1439 = vmatprep.subr.bf16.mxu0 %v3294_v38  ;;  %1480 = vmatprep.subr.bf16.mxu1 %v3300_v39 }
 0x404   :  { %v1227_v42 = vpop.f32.mrf.mxu0  ;;  %v1268_v45 = vpop.f32.mrf.mxu1 }
 0x405   :  { %v1275_v46 = vadd.f32 %v1227_v42, %v1188_v41  ;;  %v1277_v63 = vadd.f32 %v1268_v45, %v1190_v62  ;;  %v3363_v41 = vld [vmem:[%s3662_s2 + $0xac] ss:$16 sps:$4 sm:$0xff]   ;;  %v3369_v42 = vld [vmem:[%s3662_s2 + $0xa0] ss:$16 sps:$4 sm:$0xff]   ;;  %v3375_v45 = vld [vmem:[%s3662_s2 + $0xa8] ss:$16 sps:$4 sm:$0xff]  }
 0x406   :  { %v1229_v49 = vpop.f32.mrf.mxu0  ;;  %v1270_v50 = vpop.f32.mrf.mxu1 }
 0x407   :  { %v2211_v51 = vmul.f32 -1.442695, %v1275_v46  ;;  %v1276_v52 = vadd.f32 %v1229_v49, %v1189_v47  ;;  %v2213_v24 = vmul.f32 -1.442695, %v1277_v63  ;;  %v1278_v26 = vadd.f32 %v1270_v50, %v1191_v27  ;;  %v3381_v46 = vld [vmem:[%s3662_s2 + $0x84] ss:$16 sps:$4 sm:$0xff]  }
 0x408   :  { %v1231_v53 = vpop.f32.mrf.mxu0  ;;  %v1272_v56 = vpop.f32.mrf.mxu1  ;;  %v3387_v47 = vld [vmem:[%s3662_s2 + $0x8c] ss:$16 sps:$4 sm:$0xff]   ;;  %v3393_v49 = vld [vmem:[%s3662_s2 + $0x80] ss:$16 sps:$4 sm:$0xff]   ;;  %v3399_v50 = vld [vmem:[%s3662_s2 + $0x88] ss:$16 sps:$4 sm:$0xff]  }
 0x409   :  { %2477 = vpow2.f32 %v2211_v51  ;;  %v2212_v57 = vmul.f32 -1.442695, %v1276_v52  ;;  %v3405_v51 = vld [vmem:[%s3662_s2 + $0x64] ss:$16 sps:$4 sm:$0xff]   ;;  %v3411_v52 = vld [vmem:[%s3662_s2 + $0x6c] ss:$16 sps:$4 sm:$0xff]  }
 0x40a   :  { %v1232_v58 = vpop.f32.mrf.mxu0  ;;  %v1273_v59 = vpop.f32.mrf.mxu1  ;;  %v3417_v53 = vld [vmem:[%s3662_s2 + $0x60] ss:$16 sps:$4 sm:$0xff]   ;;  %v3423_v56 = vld [vmem:[%s3662_s2 + $0x68] ss:$16 sps:$4 sm:$0xff]  }
 0x40b   :  { %2479 = vpow2.f32 %v2212_v57  ;;  %v3429_v57 = vld [vmem:[%s3662_s2 + $0x44] ss:$16 sps:$4 sm:$0xff]   ;;  %v3435_v58 = vld [vmem:[%s3662_s2 + $0x4c] ss:$16 sps:$4 sm:$0xff]  }
 0x40c   :  { %2481 = vpow2.f32 %v2213_v24  ;;  %v3697_v24 = vld [vmem:[#allocation13_spill] sm:$0xff] }
 0x40d   :  { %2483 = vtanh.f32 %v1278_v26  ;;  %v1313_v26 = vunpack.c.l.bf16 %v3697_v24 }
 0x416   :  { %v2478_v33 = vpop.eup %2477 }
 0x417   :  { %v1288_v37 = vadd.f32 1.0, %v2478_v33 }
 0x418   :  { %v2480_v7 = vpop.eup %2479 }
 0x419   :  { %2485 = vrcp.f32 %v1288_v37  ;;  %v1289_v28 = vadd.f32 1.0, %v2480_v7  ;;  %v2482_v15 = vpop.eup %2481  ;;  %v1314_v37 = vunpack.c.h.bf16 %v3697_v24 }
 0x41a   :  { %v2484_v23 = vpop.eup %2483  ;;  %v1290_v22 = vadd.f32 1.0, %v2482_v15 }
 0x41b   :  { %2487 = vrcp.f32 %v1289_v28 }
 0x41c   :  { %2489 = vrcp.f32 %v1290_v22 }
 0x426   :  { %v2486_v20 = vpop.eup %2485 }
 0x427   :  { %v1299_v35 = vmul.f32 %v2486_v20, %v2484_v23 }
 0x428   :  { %v2488_v36 = vpop.eup %2487 }
 0x429   :  { %v1298_v17 = vmul.f32 %v2488_v36, %v3252_v29  ;;  %v2490_v61 = vpop.eup %2489  ;;  %v3325_v29 = vld [vmem:[%s3662_s2 + $0xe8] ss:$16 sps:$4 sm:$0xff]  }
 0x42b   :  { %v3308_v34 = vadd.f32 %v1299_v35, %v1298_v17 }
 0x42d   :  { %2491 = vtanh.f32 %v3308_v34 }
 0x43a   :  { %v2492_v48 = vpop.eup %2491 }
 0x43b   :  { %v1302_v21 = vmul.f32 %v2492_v48, %v2490_v61 }
 0x43d   :  { %v3312_v19 = vpack.c.bf16 %v1302_v21, %v3255_v54  ;;  %v1315_v31 = vpack.c.bf16 %v1302_v21, %v1302_v21  ;;  %v3345_v54 = vld [vmem:[%s3662_s2 + $0xc0] ss:$16 sps:$4 sm:$0xff]  }
 0x43f   :  { %1933 = vrot.lane.b32.xlu0 %v3312_v19, %s2612_s27  ;;  %1349 = vmatmul.mubr.bf16.vlgmr.msra.gmra.mxu0 %v1315_v31 }
 0x440   :  { %1390 = vmatmul.mubr.bf16.vlgmr.msra.gmra.mxu1 %v1315_v31  ;;  %1440 = vmatpush1.bf16.msra.mxu0 %v3319_v18 }
 0x441   :  { %1481 = vmatpush1.bf16.msra.mxu1 %v3325_v29  ;;  %1441 = vmatprep.subr.bf16.mxu0 %v3331_v16 }
 0x442   :  { %1482 = vmatprep.subr.bf16.mxu1 %v3337_v43  ;;  %1471 = vmatprep.mubr.bf16.mxu0 %v3690_v2 }
 0x443   :  { %1512 = vmatprep.mubr.bf16.mxu1 %v3690_v2 }
 0x444   :  { %1442 = vmatpush1.bf16.msra.mxu0 %v3345_v54 }
 0x445   :  { %1483 = vmatpush1.bf16.msra.mxu1 %v3351_v44  ;;  %1443 = vmatprep.subr.bf16.mxu0 %v3357_v40 }
 0x446   :  { %1484 = vmatprep.subr.bf16.mxu1 %v3363_v41 }
 0x448   :  { %1444 = vmatpush1.bf16.msra.mxu0 %v3369_v42 }
 0x449   :  { %1485 = vmatpush1.bf16.msra.mxu1 %v3375_v45  ;;  %1445 = vmatprep.subr.bf16.mxu0 %v3381_v46 }
 0x44a   :  { %1486 = vmatprep.subr.bf16.mxu1 %v3387_v47 }
 0x44c   :  { %1446 = vmatpush1.bf16.msra.mxu0 %v3393_v49 }
 0x44d   :  { %1487 = vmatpush1.bf16.msra.mxu1 %v3399_v50  ;;  %1447 = vmatprep.subr.bf16.mxu0 %v3405_v51 }
 0x44e   :  { %1488 = vmatprep.subr.bf16.mxu1 %v3411_v52 }
 0x450   :  { %1448 = vmatpush1.bf16.msra.mxu0 %v3417_v53 }
 0x451   :  { %1489 = vmatpush1.bf16.msra.mxu1 %v3423_v56  ;;  %1449 = vmatprep.subr.bf16.mxu0 %v3429_v57 }
 0x452   :  { %1490 = vmatprep.subr.bf16.mxu1 %v3435_v58 }
 0x454   :  { %1450 = vmatpush1.bf16.msra.mxu0 %v2911_v1  ;;  %v3696_v1 = vld [vmem:[#allocation12_spill] sm:$0xff] }
 0x455   :  { %1491 = vmatpush1.bf16.msra.mxu1 %v2924_v4  ;;  %1451 = vmatprep.subr.bf16.mxu0 %v2931_v5  ;;  %v1311_v4 = vunpack.c.l.bf16 %v3696_v1 }
 0x456   :  { %1492 = vmatprep.subr.bf16.mxu1 %v2936_v6 }
 0x458   :  { %1452 = vmatpush1.bf16.msra.mxu0 %v2945_v8  ;;  %v1312_v8 = vunpack.c.h.bf16 %v3696_v1 }
 0x459   :  { %1493 = vmatpush1.bf16.msra.mxu1 %v2950_v9  ;;  %1453 = vmatprep.subr.bf16.mxu0 %v2957_v10 }
 0x45a   :  { %1494 = vmatprep.subr.bf16.mxu1 %v2962_v11 }
 0x45c   :  { %1454 = vmatpush1.bf16.msra.mxu0 %v2969_v12 }
 0x45d   :  { %1495 = vmatpush1.bf16.msra.mxu1 %v2974_v13  ;;  %1562 = vmatprep.subr.bf16.mxu0 %v3294_v38 }
 0x45e   :  { %1603 = vmatprep.subr.bf16.mxu1 %v3300_v39 }
 0x4ff   :  { %v1350_v5 = vpop.f32.mrf.mxu0 }
 0x500   :  { %v1398_v6 = vadd.f32 %v1350_v5, %v1311_v4  ;;  %v1391_v59 = vpop.f32.mrf.mxu1 }
 0x501   :  { %v1352_v9 = vpop.f32.mrf.mxu0  ;;  %v1400_v33 = vadd.f32 %v1391_v59, %v1313_v26 }
 0x502   :  { %v2214_v60 = vmul.f32 -1.442695, %v1398_v6  ;;  %v1399_v10 = vadd.f32 %v1352_v9, %v1312_v8  ;;  %v1393_v62 = vpop.f32.mrf.mxu1  ;;  %v3493_v8 = vld [vmem:[%s3662_s2 + $0x48] ss:$16 sps:$4 sm:$0xff]   ;;  %v3499_v9 = vld [vmem:[%s3662_s2 + $0x24] ss:$16 sps:$4 sm:$0xff]  }
 0x503   :  { %v1354_v11 = vpop.f32.mrf.mxu0  ;;  %v2216_v7 = vmul.f32 -1.442695, %v1400_v33  ;;  %v1401_v28 = vadd.f32 %v1393_v62, %v1314_v37  ;;  %v3517_v62 = vld [vmem:[%s3662_s2 + $0x28] ss:$16 sps:$4 sm:$0xff]   ;;  %v1435_v37 = vunpack.c.h.bf16 %v3130_v30 }
 0x504   :  { %2493 = vpow2.f32 %v2214_v60  ;;  %v2215_v12 = vmul.f32 -1.442695, %v1399_v10  ;;  %v1395_v63 = vpop.f32.mrf.mxu1  ;;  %v3505_v60 = vld [vmem:[%s3662_s2 + $0x2c] ss:$16 sps:$4 sm:$0xff]   ;;  %v3511_v10 = vld [vmem:[%s3662_s2 + $0x20] ss:$16 sps:$4 sm:$0xff]  }
 0x505   :  { %v1355_v13 = vpop.f32.mrf.mxu0  ;;  %v3523_v11 = vld [vmem:[%s3662_s2 + $0x4] ss:$16 sps:$4 sm:$0xff]   ;;  %v3535_v63 = vld [vmem:[%s3662_s2] ss:$16 sps:$4 sm:$0xff]  }
 0x506   :  { %2495 = vpow2.f32 %v2215_v12  ;;  %v1396_v27 = vpop.f32.mrf.mxu1  ;;  %v3529_v12 = vld [vmem:[%s3662_s2 + $0xc] ss:$16 sps:$4 sm:$0xff]   ;;  %v3541_v13 = vld [vmem:[%s3662_s2 + $0x8] ss:$16 sps:$4 sm:$0xff]  }
 0x507   :  { %2497 = vpow2.f32 %v2216_v7  ;;  %v1434_v27 = vunpack.c.l.bf16 %v3130_v30 }
 0x508   :  { %2499 = vtanh.f32 %v1401_v28 }
 0x511   :  { %v2494_v15 = vpop.eup %2493 }
 0x512   :  { %v1411_v23 = vadd.f32 1.0, %v2494_v15 }
 0x513   :  { %v2496_v20 = vpop.eup %2495 }
 0x514   :  { %2501 = vrcp.f32 %v1411_v23  ;;  %v1412_v35 = vadd.f32 1.0, %v2496_v20  ;;  %v2498_v36 = vpop.eup %2497 }
 0x515   :  { %v2500_v22 = vpop.eup %2499  ;;  %v1413_v21 = vadd.f32 1.0, %v2498_v36 }
 0x516   :  { %2503 = vrcp.f32 %v1412_v35 }
 0x517   :  { %2505 = vrcp.f32 %v1413_v21 }
 0x521   :  { %v2502_v17 = vpop.eup %2501 }
 0x522   :  { %v1422_v61 = vmul.f32 %v2502_v17, %v2500_v22 }
 0x523   :  { %v2504_v48 = vpop.eup %2503 }
 0x524   :  { %v1421_v31 = vmul.f32 %v2504_v48, %v3308_v34  ;;  %v2506_v4 = vpop.eup %2505  ;;  %v3487_v34 = vld [vmem:[%s3662_s2 + $0x40] ss:$16 sps:$4 sm:$0xff]  }
 0x526   :  { %v3455_v1 = vadd.f32 %v1422_v61, %v1421_v31  ;;  %v1437_v61 = vunpack.c.h.bf16 %v3135_v55 }
 0x528   :  { %2507 = vtanh.f32 %v3455_v1 }
 0x535   :  { %v2508_v5 = vpop.eup %2507 }
 0x536   :  { %v3458_v6 = vmul.f32 %v2508_v5, %v2506_v4 }
 0x538   :  { %v1438_v59 = vpack.c.bf16 %v3458_v6, %v3458_v6 }
 0x53a   :  { %1472 = vmatmul.mubr.bf16.vlgmr.msra.gmra.mxu0 %v1438_v59  ;;  %1513 = vmatmul.mubr.bf16.vlgmr.msra.gmra.mxu1 %v1438_v59 }
 0x53b   :  { %1563 = vmatpush1.bf16.msra.mxu0 %v3319_v18  ;;  %1604 = vmatpush1.bf16.msra.mxu1 %v3325_v29 }
 0x53c   :  { %1564 = vmatprep.subr.bf16.mxu0 %v3331_v16  ;;  %1605 = vmatprep.subr.bf16.mxu1 %v3337_v43 }
 0x53d   :  { %1594 = vmatprep.mubr.bf16.mxu0 %v3690_v2  ;;  %1635 = vmatprep.mubr.bf16.mxu1 %v3690_v2 }
 0x53f   :  { %1565 = vmatpush1.bf16.msra.mxu0 %v3345_v54  ;;  %1606 = vmatpush1.bf16.msra.mxu1 %v3351_v44 }
 0x540   :  { %1566 = vmatprep.subr.bf16.mxu0 %v3357_v40  ;;  %1607 = vmatprep.subr.bf16.mxu1 %v3363_v41 }
 0x543   :  { %1567 = vmatpush1.bf16.msra.mxu0 %v3369_v42  ;;  %1608 = vmatpush1.bf16.msra.mxu1 %v3375_v45 }
 0x544   :  { %1568 = vmatprep.subr.bf16.mxu0 %v3381_v46  ;;  %1609 = vmatprep.subr.bf16.mxu1 %v3387_v47 }
 0x547   :  { %1569 = vmatpush1.bf16.msra.mxu0 %v3393_v49  ;;  %1610 = vmatpush1.bf16.msra.mxu1 %v3399_v50 }
 0x548   :  { %1570 = vmatprep.subr.bf16.mxu0 %v3405_v51  ;;  %1611 = vmatprep.subr.bf16.mxu1 %v3411_v52 }
 0x54b   :  { %1571 = vmatpush1.bf16.msra.mxu0 %v3417_v53  ;;  %1612 = vmatpush1.bf16.msra.mxu1 %v3423_v56 }
 0x54c   :  { %1572 = vmatprep.subr.bf16.mxu0 %v3429_v57  ;;  %1613 = vmatprep.subr.bf16.mxu1 %v3435_v58 }
 0x54f   :  { %1573 = vmatpush1.bf16.msra.mxu0 %v3487_v34  ;;  %1614 = vmatpush1.bf16.msra.mxu1 %v3493_v8 }
 0x550   :  { %1574 = vmatprep.subr.bf16.mxu0 %v3499_v9  ;;  %1615 = vmatprep.subr.bf16.mxu1 %v3505_v60 }
 0x553   :  { %1575 = vmatpush1.bf16.msra.mxu0 %v3511_v10  ;;  %1616 = vmatpush1.bf16.msra.mxu1 %v3517_v62 }
 0x554   :  { %1576 = vmatprep.subr.bf16.mxu0 %v3523_v11  ;;  %1617 = vmatprep.subr.bf16.mxu1 %v3529_v12 }
 0x557   :  { %1577 = vmatpush1.bf16.msra.mxu0 %v3535_v63  ;;  %1618 = vmatpush1.bf16.msra.mxu1 %v3541_v13 }
 0x558   :  { %1685 = vmatprep.subr.bf16.mxu0 %v3294_v38  ;;  %1726 = vmatprep.subr.bf16.mxu1 %v3300_v39  ;;  %v1436_v38 = vunpack.c.l.bf16 %v3135_v55 }
 0x5fa   :  { %v1473_v24 = vpop.f32.mrf.mxu0  ;;  %v1514_v26 = vpop.f32.mrf.mxu1 }
 0x5fb   :  { %v1521_v33 = vadd.f32 %v1473_v24, %v1434_v27  ;;  %v1523_v39 = vadd.f32 %v1514_v26, %v1436_v38  ;;  %v2424_v38 = vld [vmem:[#allocation5 + $0x10] sm:$0xff]  }
 0x5fc   :  { %v1475_v7 = vpop.f32.mrf.mxu0  ;;  %v1516_v28 = vpop.f32.mrf.mxu1 }
 0x5fd   :  { %v2217_v15 = vmul.f32 -1.442695, %v1521_v33  ;;  %v1522_v23 = vadd.f32 %v1475_v7, %v1435_v37  ;;  %v2219_v48 = vmul.f32 -1.442695, %v1523_v39  ;;  %v1524_v21 = vadd.f32 %v1516_v28, %v1437_v61  ;;  %v1932_v39 = vpop.permute.xlu0 %1931  ;;  %v2425_v61 = vld [vmem:[%s3664_s4 + $0x8] sm:$0xff]  }
 0x5fe   :  { %v1477_v20 = vpop.f32.mrf.mxu0  ;;  %v1518_v35 = vpop.f32.mrf.mxu1 }
 0x5ff   :  { %2509 = vpow2.f32 %v2217_v15  ;;  %v2218_v36 = vmul.f32 -1.442695, %v1522_v23 }
 0x600   :  { %v1478_v22 = vpop.f32.mrf.mxu0  ;;  %v1519_v17 = vpop.f32.mrf.mxu1 }
 0x601   :  { %2511 = vpow2.f32 %v2218_v36  ;;  %v2423_v17 = vld [vmem:[%s3664_s4 + $0x10] sm:$0xff]  }
 0x602   :  { %2513 = vpow2.f32 %v2219_v48  ;;  %v2426_v48 = vld [vmem:[#allocation5 + $0x8] sm:$0xff]  }
 0x603   :  { %2515 = vtanh.f32 %v1524_v21  ;;  %v2427_v21 = vld [vmem:[%s3664_s4] sm:$0xff]  }
 0x60c   :  { %v2510_v31 = vpop.eup %2509 }
 0x60d   :  { %v1534_v30 = vadd.f32 1.0, %v2510_v31  ;;  %v2428_v31 = vld [vmem:[#allocation5] sm:$0xff]  }
 0x60e   :  { %v2512_v4 = vpop.eup %2511 }
 0x60f   :  { %2517 = vrcp.f32 %v1534_v30  ;;  %v1535_v5 = vadd.f32 1.0, %v2512_v4  ;;  %v2514_v59 = vpop.eup %2513  ;;  %v1680_v4 = vunpack.c.l.bf16 %v3151_v14 }
 0x610   :  { %v2516_v27 = vpop.eup %2515  ;;  %v1536_v7 = vadd.f32 1.0, %v2514_v59 }
 0x611   :  { %2519 = vrcp.f32 %v1535_v5 }
 0x612   :  { %2521 = vrcp.f32 %v1536_v7 }
 0x61c   :  { %v2518_v24 = vpop.eup %2517 }
 0x61d   :  { %v1545_v33 = vmul.f32 %v2518_v24, %v2516_v27  ;;  %v1681_v24 = vunpack.c.h.bf16 %v3151_v14 }
 0x61e   :  { %v2520_v37 = vpop.eup %2519 }
 0x61f   :  { %v1544_v26 = vmul.f32 %v2520_v37, %v3455_v1  ;;  %v2522_v55 = vpop.eup %2521 }
 0x621   :  { %v3551_v15 = vadd.f32 %v1545_v33, %v1544_v26 }
 0x623   :  { %2523 = vtanh.f32 %v3551_v15 }
 0x630   :  { %v2524_v28 = vpop.eup %2523 }
 0x631   :  { %v1548_v23 = vmul.f32 %v2524_v28, %v2522_v55 }
 0x633   :  { %v3555_v20 = vpack.c.bf16 %v1548_v23, %v3458_v6  ;;  %v1561_v35 = vpack.c.bf16 %v1548_v23, %v1548_v23 }
 0x635   :  { %1935 = vrot.lane.b32.xlu1 %v3555_v20, %s2612_s27  ;;  %1595 = vmatmul.mubr.bf16.vlgmr.msra.gmra.mxu0 %v1561_v35 }
 0x636   :  { %1636 = vmatmul.mubr.bf16.vlgmr.msra.gmra.mxu1 %v1561_v35  ;;  %1686 = vmatpush1.bf16.msra.mxu0 %v3319_v18  ;;  %v2422_v18 = vld [vmem:[#allocation5 + $0x18] sm:$0xff]  }
 0x637   :  { %1727 = vmatpush1.bf16.msra.mxu1 %v3325_v29  ;;  %1687 = vmatprep.subr.bf16.mxu0 %v3331_v16  ;;  %v1557_v29 = vunpack.c.l.bf16 %v3142_v25 }
 0x638   :  { %1728 = vmatprep.subr.bf16.mxu1 %v3337_v43  ;;  %1717 = vmatprep.mubr.bf16.mxu0 %v3690_v2 }
 0x639   :  { %1758 = vmatprep.mubr.bf16.mxu1 %v3690_v2  ;;  %v2421_v2 = vld [vmem:[%s3664_s4 + $0x18] sm:$0xff]  }
 0x63a   :  { %1688 = vmatpush1.bf16.msra.mxu0 %v3345_v54 }
 0x63b   :  { %1729 = vmatpush1.bf16.msra.mxu1 %v3351_v44  ;;  %1689 = vmatprep.subr.bf16.mxu0 %v3357_v40  ;;  %v1558_v44 = vunpack.c.h.bf16 %v3142_v25 }
 0x63c   :  { %1730 = vmatprep.subr.bf16.mxu1 %v3363_v41 }
 0x63e   :  { %1690 = vmatpush1.bf16.msra.mxu0 %v3369_v42 }
 0x63f   :  { %1731 = vmatpush1.bf16.msra.mxu1 %v3375_v45  ;;  %1691 = vmatprep.subr.bf16.mxu0 %v3381_v46 }
 0x640   :  { %1732 = vmatprep.subr.bf16.mxu1 %v3387_v47 }
 0x642   :  { %1692 = vmatpush1.bf16.msra.mxu0 %v3393_v49 }
 0x643   :  { %1733 = vmatpush1.bf16.msra.mxu1 %v3399_v50  ;;  %1693 = vmatprep.subr.bf16.mxu0 %v3405_v51 }
 0x644   :  { %1734 = vmatprep.subr.bf16.mxu1 %v3411_v52  ;;  %v1559_v52 = vunpack.c.l.bf16 %v3147_v0 }
 0x646   :  { %1694 = vmatpush1.bf16.msra.mxu0 %v3417_v53 }
 0x647   :  { %1735 = vmatpush1.bf16.msra.mxu1 %v3423_v56  ;;  %1695 = vmatprep.subr.bf16.mxu0 %v3429_v57  ;;  %v1560_v56 = vunpack.c.h.bf16 %v3147_v0 }
 0x648   :  { %1736 = vmatprep.subr.bf16.mxu1 %v3435_v58 }
 0x64a   :  { %1696 = vmatpush1.bf16.msra.mxu0 %v3487_v34 }
 0x64b   :  { %1737 = vmatpush1.bf16.msra.mxu1 %v3493_v8  ;;  %1697 = vmatprep.subr.bf16.mxu0 %v3499_v9 }
 0x64c   :  { %1738 = vmatprep.subr.bf16.mxu1 %v3505_v60 }
 0x64e   :  { %1698 = vmatpush1.bf16.msra.mxu0 %v3511_v10 }
 0x64f   :  { %1739 = vmatpush1.bf16.msra.mxu1 %v3517_v62  ;;  %1699 = vmatprep.subr.bf16.mxu0 %v3523_v11 }
 0x650   :  { %1740 = vmatprep.subr.bf16.mxu1 %v3529_v12 }
 0x652   :  { %1700 = vmatpush1.bf16.msra.mxu0 %v3535_v63 }
 0x653   :  { %1741 = vmatpush1.bf16.msra.mxu1 %v3541_v13  ;;  %2289 = vmatprep.subr.bf16.mxu0 %v2421_v2 }
 0x654   :  { %2305 = vmatprep.subr.bf16.mxu1 %v2422_v18 }
 0x6a7   :  { %v1936_v30 = vpop.permute.xlu1 %1935 }
 0x6f5   :  { %v1596_v16 = vpop.f32.mrf.mxu0 }
 0x6f6   :  { %v1644_v43 = vadd.f32 %v1596_v16, %v1557_v29  ;;  %v1637_v54 = vpop.f32.mrf.mxu1 }
 0x6f7   :  { %v1598_v40 = vpop.f32.mrf.mxu0  ;;  %v1646_v53 = vadd.f32 %v1637_v54, %v1559_v52 }
 0x6f8   :  { %v2220_v41 = vmul.f32 -1.442695, %v1644_v43  ;;  %v1645_v42 = vadd.f32 %v1598_v40, %v1558_v44  ;;  %v1639_v45 = vpop.f32.mrf.mxu1 }
 0x6f9   :  { %v1600_v46 = vpop.f32.mrf.mxu0  ;;  %v2222_v57 = vmul.f32 -1.442695, %v1646_v53  ;;  %v1647_v58 = vadd.f32 %v1639_v45, %v1560_v56 }
 0x6fa   :  { %2525 = vpow2.f32 %v2220_v41  ;;  %v2221_v47 = vmul.f32 -1.442695, %v1645_v42  ;;  %v1641_v49 = vpop.f32.mrf.mxu1 }
 0x6fb   :  { %v1601_v50 = vpop.f32.mrf.mxu0 }
 0x6fc   :  { %2527 = vpow2.f32 %v2221_v47  ;;  %v1642_v51 = vpop.f32.mrf.mxu1 }
 0x6fd   :  { %2529 = vpow2.f32 %v2222_v57 }
 0x6fe   :  { %2531 = vtanh.f32 %v1647_v58 }
 0x707   :  { %v2526_v1 = vpop.eup %2525 }
 0x708   :  { %v1657_v25 = vadd.f32 1.0, %v2526_v1 }
 0x709   :  { %v2528_v6 = vpop.eup %2527 }
 0x70a   :  { %2533 = vrcp.f32 %v1657_v25  ;;  %v1658_v34 = vadd.f32 1.0, %v2528_v6  ;;  %v2530_v8 = vpop.eup %2529 }
 0x70b   :  { %v2532_v9 = vpop.eup %2531  ;;  %v1659_v11 = vadd.f32 1.0, %v2530_v8  ;;  %v2242_v8 = vld [vmem:[%s3666_s6] ss:$0 sm:$0xff] }
 0x70c   :  { %2535 = vrcp.f32 %v1658_v34 }
 0x70d   :  { %2537 = vrcp.f32 %v1659_v11 }
 0x717   :  { %v2534_v60 = vpop.eup %2533 }
 0x718   :  { %v1668_v10 = vmul.f32 %v2534_v60, %v2532_v9 }
 0x719   :  { %v2536_v62 = vpop.eup %2535 }
 0x71a   :  { %v1667_v12 = vmul.f32 %v2536_v62, %v3551_v15  ;;  %v2538_v0 = vpop.eup %2537 }
 0x71c   :  { %v3599_v63 = vadd.f32 %v1668_v10, %v1667_v12 }
 0x71e   :  { %2539 = vtanh.f32 %v3599_v63 }
 0x72b   :  { %v2540_v13 = vpop.eup %2539 }
 0x72c   :  { %v3602_v36 = vmul.f32 %v2540_v13, %v2538_v0 }
 0x72e   :  { %v1684_v22 = vpack.c.bf16 %v3602_v36, %v3602_v36 }
 0x730   :  { %1718 = vmatmul.mubr.bf16.vlgmr.msra.gmra.mxu0 %v1684_v22  ;;  %1759 = vmatmul.mubr.bf16.vlgmr.msra.gmra.mxu1 %v1684_v22 }
 0x731   :  { %2290 = vmatpush3.bf16.msra.mxu0 %v2421_v2  ;;  %2306 = vmatpush3.bf16.msra.mxu1 %v2422_v18  ;;  %v1683_v2 = vunpack.c.h.bf16 %v3155_v3 }
 0x732   :  { %2297 = vmatprep.mubr.msk.bf16.mxu0 %vm1841_vm6, %v3209_v32  ;;  %2313 = vmatprep.mubr.msk.bf16.mxu1 %vm1841_vm6, %v1932_v39  ;;  %v1934_v32 = vpop.permute.xlu0 %1933 }
 0x733   :  { %2291 = vmatprep.subr.bf16.mxu0 %v2423_v17  ;;  %2307 = vmatprep.subr.bf16.mxu1 %v2424_v38 }
 0x735   :  { %2292 = vmatpush3.bf16.msra.mxu0 %v2423_v17  ;;  %2308 = vmatpush3.bf16.msra.mxu1 %v2424_v38 }
 0x736   :  { %2293 = vmatprep.subr.bf16.mxu0 %v2425_v61  ;;  %2309 = vmatprep.subr.bf16.mxu1 %v2426_v48 }
 0x739   :  { %2294 = vmatpush3.bf16.msra.mxu0 %v2425_v61  ;;  %2310 = vmatpush3.bf16.msra.mxu1 %v2426_v48 }
 0x73a   :  { %2295 = vmatprep.subr.bf16.mxu0 %v2427_v21  ;;  %2311 = vmatprep.subr.bf16.mxu1 %v2428_v31 }
 0x73d   :  { %2296 = vmatpush3.bf16.msra.mxu0 %v2427_v21  ;;  %2312 = vmatpush3.bf16.msra.mxu1 %v2428_v31 }
 0x740   :  { %2298 = vmatmul.mubr.msk.bf16.vlgmr.msra.gmra.mxu0 %vm1841_vm6, %v3312_v19  ;;  %2314 = vmatmul.mubr.msk.bf16.vlgmr.msra.gmra.mxu1 %vm1841_vm6, %v1934_v32 }
 0x741   :  { %2301 = vmatprep.mubr.msk.bf16.mxu0 %vm1841_vm6, %v3555_v20  ;;  %2317 = vmatprep.mubr.msk.bf16.mxu1 %vm1841_vm6, %v1936_v30  ;;  %v1682_v20 = vunpack.c.l.bf16 %v3155_v3 }
 0x7f0   :  { %v1719_v5 = vpop.f32.mrf.mxu0  ;;  %v1760_v59 = vpop.f32.mrf.mxu1 }
 0x7f1   :  { %v1767_v27 = vadd.f32 %v1719_v5, %v1680_v4  ;;  %v1769_v35 = vadd.f32 %v1760_v59, %v1682_v20 }
 0x7f2   :  { %v1721_v33 = vpop.f32.mrf.mxu0  ;;  %v1762_v37 = vpop.f32.mrf.mxu1 }
 0x7f3   :  { %v2223_v7 = vmul.f32 -1.442695, %v1767_v27  ;;  %v1768_v26 = vadd.f32 %v1721_v33, %v1681_v24  ;;  %v2225_v18 = vmul.f32 -1.442695, %v1769_v35  ;;  %v1770_v29 = vadd.f32 %v1762_v37, %v1683_v2 }
 0x7f4   :  { %v1723_v15 = vpop.f32.mrf.mxu0  ;;  %v1764_v19 = vpop.f32.mrf.mxu1 }
 0x7f5   :  { %2541 = vpow2.f32 %v2223_v7  ;;  %v2224_v55 = vmul.f32 -1.442695, %v1768_v26 }
 0x7f6   :  { %v1724_v28 = vpop.f32.mrf.mxu0  ;;  %v1765_v23 = vpop.f32.mrf.mxu1 }
 0x7f7   :  { %2543 = vpow2.f32 %v2224_v55 }
 0x7f8   :  { %2545 = vpow2.f32 %v2225_v18 }
 0x7f9   :  { %2547 = vtanh.f32 %v1770_v29 }
 0x800   :  { %v2299_v56 = vpop.f32.mrf.mxu0  ;;  %v2315_v57 = vpop.f32.mrf.mxu1 }
 0x801   :  { %v2049_v5 = vadd.f32 %v2299_v56, %v2242_v8 }
 0x802   :  { %v2542_v16 = vpop.eup %2541  ;;  %v1888_v58 = vpop.f32.mrf.mxu0 }
 0x803   :  { %v1780_v14 = vadd.f32 1.0, %v2542_v16  ;;  %v2009_v1 = vpop.f32.mrf.mxu1  ;;  %v2047_v32 = vadd.f32 %v2242_v8, %v1888_v58 }
 0x804   :  { %v2544_v43 = vpop.eup %2543  ;;  %v2300_v25 = vpop.f32.mrf.mxu0 }
 0x805   :  { %2549 = vrcp.f32 %v1780_v14  ;;  %v1781_v54 = vadd.f32 1.0, %v2544_v43  ;;  %v2546_v44 = vpop.eup %2545  ;;  %v2316_v6 = vpop.f32.mrf.mxu1  ;;  %v2050_v48 = vadd.f32 %v2300_v25, %v2242_v8 }
 0x806   :  { %v2548_v40 = vpop.eup %2547  ;;  %v1782_v46 = vadd.f32 1.0, %v2546_v44  ;;  %v1891_v34 = vpop.f32.mrf.mxu0 }
 0x807   :  { %2551 = vrcp.f32 %v1781_v54  ;;  %v2012_v10 = vpop.f32.mrf.mxu1  ;;  %v2048_v39 = vadd.f32 %v2242_v8, %v1891_v34 }
 0x808   :  { %2553 = vrcp.f32 %v1782_v46 }
 0x812   :  { %v2550_v41 = vpop.eup %2549 }
 0x813   :  { %v1791_v42 = vmul.f32 %v2550_v41, %v2548_v40 }
 0x814   :  { %v2552_v45 = vpop.eup %2551 }
 0x815   :  { %v1790_v47 = vmul.f32 %v2552_v45, %v3599_v63  ;;  %v2554_v3 = vpop.eup %2553 }
 0x817   :  { %v1792_v49 = vadd.f32 %v1791_v42, %v1790_v47 }
 0x819   :  { %2555 = vtanh.f32 %v1792_v49 }
 0x826   :  { %v2556_v50 = vpop.eup %2555 }
 0x827   :  { %v1794_v51 = vmul.f32 %v2556_v50, %v2554_v3 }
 0x829   :  { %v1808_v52 = vpack.c.bf16 %v1794_v51, %v3602_v36 }
 0x82b   :  { %1937 = vrot.lane.b32.xlu1 %v1808_v52, %s2612_s27  ;;  %2302 = vmatmul.mubr.msk.bf16.gmra.mxu0 %vm1841_vm6, %v1808_v52 }
 0x89d   :  { %v1938_v53 = vpop.permute.xlu1 %1937 }
 0x89e   :  { %2318 = vmatmul.mubr.msk.bf16.gmra.mxu1 %vm1841_vm6, %v1938_v53 }
 0x8eb   :  { %v2303_v9 = vpop.f32.mrf.mxu0 }
 0x8ec   :  { %v2053_v60 = vadd.f32 %v2303_v9, %v2242_v8 }
 0x8ed   :  { %v1904_v62 = vpop.f32.mrf.mxu0 }
 0x8ee   :  { %v2110_v11 = vadd.f32 %v2053_v60, %v2012_v10  ;;  %v2051_v12 = vadd.f32 %v2242_v8, %v1904_v62 }
 0x8ef   :  { %v2304_v63 = vpop.f32.mrf.mxu0 }
 0x8f0   :  { %2254 = vst [vmem:[%s3667_s7 + $0x30] sm:$0xff] %v2110_v11  ;;  %v2098_v0 = vadd.f32 %v2316_v6, %v2051_v12  ;;  %v2054_v13 = vadd.f32 %v2304_v63, %v2242_v8 }
 0x8f1   :  { %v1907_v36 = vpop.f32.mrf.mxu0 }
 0x8f2   :  { %2250 = vst [vmem:[%s3667_s7 + $0x20] sm:$0xff] %v2098_v0  ;;  %v2115_v22 = vadd.f32 %v2054_v13, %v2009_v1  ;;  %v2052_v17 = vadd.f32 %v2242_v8, %v1907_v36 }
 0x8f4   :  { %2256 = vst [vmem:[%s3667_s7 + $0x38] sm:$0xff] %v2115_v22  ;;  %v2104_v38 = vadd.f32 %v2315_v57, %v2052_v17 }
 0x8f6   :  { %2252 = vst [vmem:[%s3667_s7 + $0x28] sm:$0xff] %v2104_v38 }
 0x95e   :  { %v2319_v61 = vpop.f32.mrf.mxu1 }
 0x95f   :  { %v2080_v21 = vadd.f32 %v2319_v61, %v2048_v39 }
 0x960   :  { %v2025_v31 = vpop.f32.mrf.mxu1 }
 0x961   :  { %2244 = vst [vmem:[%s3667_s7 + $0x8] sm:$0xff] %v2080_v21  ;;  %v2092_v30 = vadd.f32 %v2050_v48, %v2025_v31 }
 0x962   :  { %v2320_v4 = vpop.f32.mrf.mxu1 }
 0x963   :  { %2248 = vst [vmem:[%s3667_s7 + $0x18] sm:$0xff] %v2092_v30  ;;  %v2074_v59 = vadd.f32 %v2320_v4, %v2047_v32 }
 0x964   :  { %v2028_v27 = vpop.f32.mrf.mxu1 }
 0x965   :  { %2075 = vst [vmem:[%s3667_s7] sm:$0xff] %v2074_v59  ;;  %v2086_v24 = vadd.f32 %v2049_v5, %v2028_v27 }
 0x967   :  { %2246 = vst [vmem:[%s3667_s7 + $0x10] sm:$0xff] %v2086_v24 }
 0x968   :  { %2121 = vsyncpa [#allocation6], 1 }

</bundles_post_ra>
